<compile_context>
chip_gen: v6e
topology: v6e:2x2x1
jax: 0.10.0
libtpu: 0.0.40
codegen_flags: <defaults>
</compile_context>

<pallas_src>
import jax
import jax.numpy as jnp
from jax import lax
from jax.experimental import pallas as pl
from jax.experimental.pallas import tpu as pltpu


COMPUTE_DTYPE = jnp.bfloat16           # MXU operand dtype (accumulation is f32)
_VMEM_LIMIT = 64 * 1024 * 1024         # explicit scoped-VMEM ceiling
_WORKSET_BUDGET = 12 * 1024 * 1024     # target per-grid-step working set


# ----------------------------- Pallas kernels ------------------------------ #

def _deconv_kernel(x_ref, w_ref, b_ref, o_ref):
    """ConvTranspose2d(k=2, s=2) core: (TM, Cin) @ (Cin, 4*C2) + bias."""
    y = jnp.dot(x_ref[...], w_ref[...], preferred_element_type=jnp.float32)
    o_ref[...] = (y + b_ref[...]).astype(o_ref.dtype)


def _conv3x3_kernel(*refs):
    """TR output rows of a 3x3 'same' conv (+ bias + ReLU), concat-fused inputs.

    refs = (main_0, halo_0, main_1, halo_1, ..., w_ref, b_ref, o_ref)
      main_a: (1, TR,   Wp, C_a) padded rows [i*TR, (i+1)*TR)
      halo_a: (1, HALO, Wp, C_a) padded rows starting at (i+1)*TR (first 2 used)
      w_ref : (9 * sum(C_a), Cout) im2col weights, rows ordered (input, kh, kw, c)
      o_ref : (1, TR, Wo, Cout)
    """
    *act_refs, w_ref, b_ref, o_ref = refs
    tr, wo, cout = o_ref.shape[1], o_ref.shape[2], o_ref.shape[3]

    # Build the im2col patch matrix in VMEM/vregs: columns ordered
    # (input, kh, kw, c) to match the weight slab built in the wrapper.
    pieces = []
    for j in range(0, len(act_refs), 2):
        main = act_refs[j][0]                             # (TR, Wp, C)
        halo = act_refs[j + 1][0]                         # (HALO, Wp, C)
        rows = jnp.concatenate([main, halo[:2]], axis=0)  # (TR + 2, Wp, C)
        for kh in range(3):
            for kw in range(3):
                pieces.append(rows[kh:kh + tr, kw:kw + wo, :])   # (TR, Wo, C)
    patches = jnp.concatenate(pieces, axis=-1)            # (TR, Wo, 9*sumC)
    k = patches.shape[-1]

    # One K = 9*sum(C) contraction with M = TR*Wo on the MXU.
    y = jnp.dot(patches.reshape(tr * wo, k), w_ref[...],
                preferred_element_type=jnp.float32)
    y = jnp.maximum(y + b_ref[...], 0.0)                  # f32 bias + ReLU
    o_ref[0] = y.reshape(tr, wo, cout).astype(o_ref.dtype)


# ----------------------------- tile selection ------------------------------ #

def _pick_deconv_tile(n, bytes_per_row, budget):
    """Largest divisor of n (16-aligned preferred, then 8) within budget."""
    cap = max(8, budget // max(1, bytes_per_row))
    for align in (16, 8):          # 16: bf16 sublane packing; 8: tiling floor
        best = 0
        for t in range(align, min(n, cap) + 1, align):
            if n % t == 0:
                best = t
        if best:
            return best
    return n                       # tiny/awkward n: whole array (full-dim block)


def _pick_conv_row_tile(h_out, bytes_per_out_row, budget):
    """Largest divisor of h_out (>= 2) whose working set fits the budget."""
    cap = max(2, budget // max(1, bytes_per_out_row))
    best = 1
    for t in range(2, min(h_out, cap) + 1):
        if h_out % t == 0:
            best = t
    return best if best > 1 else h_out


# ------------------------------- wrappers ---------------------------------- #

def _deconv_matmul(x2d, w2d, b2d):
    """(N, Cin) @ (Cin, 4*C2) + bias, row-tiled and pipelined."""
    n, cin = x2d.shape
    cout = w2d.shape[1]
    row_bytes = 2 * 2 * cin + 2 * 2 * cout + 4 * cout   # dbl-buf in/out + f32 acc
    const_bytes = 2 * 2 * cin * cout + 4 * cout
    tm = _pick_deconv_tile(n, row_bytes,
                           max(_WORKSET_BUDGET - const_bytes, 64 * 1024))
    return pl.pallas_call(
        _deconv_kernel,
        out_shape=jax.ShapeDtypeStruct((n, cout), COMPUTE_DTYPE),
        grid=(n // tm,),
        in_specs=[
            pl.BlockSpec((tm, cin), lambda i: (i, 0)),
            pl.BlockSpec((cin, cout), lambda i: (0, 0)),
            pl.BlockSpec((1, cout), lambda i: (0, 0)),
        ],
        out_specs=pl.BlockSpec((tm, cout), lambda i: (i, 0)),
        compiler_params=pltpu.CompilerParams(
            dimension_semantics=("parallel",),
            vmem_limit_bytes=_VMEM_LIMIT),
    )(x2d, w2d, b2d)


def _conv3x3_relu_fused(acts, w_im2col, bias, out_dtype):
    """3x3 'same' conv + ReLU over one or more unpadded NHWC activations.

    acts:     list of (B, Ho, Wo, C_a) NHWC activations (bf16).  Passing >1
              activation fuses the channel concat into the conv.
    w_im2col: (9 * sum(C_a), Cout) weights, rows ordered (input, kh, kw, c).
    """
    B, Ho, Wo, _ = acts[0].shape
    Cout = w_im2col.shape[1]
    c_sum = sum(a.shape[-1] for a in acts)
    assert w_im2col.shape[0] == 9 * c_sum, "weight slab / activation order mismatch"
    Wp = Wo + 2
    osz = jnp.dtype(out_dtype).itemsize

    # Per-output-row working-set bytes (dbl-buffered inputs, patch slab,
    # f32 result, dbl-buffered output) -> row tile TR within budget.
    row_bytes = (2 * 2 * Wp * c_sum
                 + 2 * Wp * c_sum
                 + 2 * Wo * 9 * c_sum
                 + 4 * Wo * Cout
                 + 2 * osz * Wo * Cout)
    const_bytes = 2 * 2 * w_im2col.size + 4 * Cout
    TR = _pick_conv_row_tile(Ho, row_bytes,
                             max(_WORKSET_BUDGET - const_bytes, 64 * 1024))
    halo = 8 if TR % 8 == 0 else TR       # halo block stays block-aligned either way

    in_specs, operands = [], []
    for a in acts:
        assert a.shape[:3] == (B, Ho, Wo)
        C = a.shape[-1]
        # 'same' zero padding; extra bottom rows keep every halo block in-bounds.
        a_p = jnp.pad(a, ((0, 0), (1, halo - 1), (1, 1), (0, 0)))
        in_specs.append(pl.BlockSpec((1, TR, Wp, C),
                                     lambda b, i: (b, i, 0, 0)))
        operands.append(a_p)
        in_specs.append(pl.BlockSpec((1, halo, Wp, C),
                                     lambda b, i, s=TR // halo: (b, (i + 1) * s, 0, 0)))
        operands.append(a_p)
    in_specs += [
        pl.BlockSpec((w_im2col.shape[0], Cout), lambda b, i: (0, 0)),
        pl.BlockSpec((1, Cout), lambda b, i: (0, 0)),
    ]
    operands += [w_im2col, bias.reshape(1, Cout).astype(jnp.float32)]

    return pl.pallas_call(
        _conv3x3_kernel,
        out_shape=jax.ShapeDtypeStruct((B, Ho, Wo, Cout), out_dtype),
        grid=(B, Ho // TR),
        in_specs=in_specs,
        out_specs=pl.BlockSpec((1, TR, Wo, Cout), lambda b, i: (b, i, 0, 0)),
        compiler_params=pltpu.CompilerParams(
            dimension_semantics=("parallel", "parallel"),
            vmem_limit_bytes=_VMEM_LIMIT),
    )(*operands)


def up_block_forward(params, x_nchw, skip_nchw):
    """UpBlock.forward: deconv -> concat(skip) -> (conv3x3 + ReLU) x 2.

    x_nchw:    (B, in_channels, H, W)
    skip_nchw: (B, in_channels // 2, 2H, 2W)
    returns    (B, out_channels, 2H, 2W)   (NCHW, like PyTorch)
    """
    cdt = COMPUTE_DTYPE
    B, Cin, H, W = x_nchw.shape
    C2 = Cin // 2
    Ho, Wo = 2 * H, 2 * W
    Cout = params["c1_w"].shape[0]

    x = jnp.transpose(x_nchw, (0, 2, 3, 1)).astype(cdt)        # (B,H,W,Cin)
    skip = jnp.transpose(skip_nchw, (0, 2, 3, 1)).astype(cdt)  # (B,Ho,Wo,C2)

    # ---- ConvTranspose2d(Cin, C2, k=2, s=2): one matmul per input pixel ----
    # (Cin, C2, 2, 2) -> (Cin, 4*C2), columns grouped as (di, dj, c).
    w_up = jnp.transpose(params["up_w"], (0, 2, 3, 1)).reshape(Cin, 4 * C2)
    b_up = jnp.tile(params["up_b"], 4).reshape(1, 4 * C2).astype(jnp.float32)
    y2d = _deconv_matmul(x.reshape(B * H * W, Cin), w_up.astype(cdt), b_up)

    # TODO(synk): fuse this 2x2 scatter into the deconv kernel's out_spec
    #             ((1, 2, Wo, C2) blocks) to drop one HBM round trip of `up`.
    up = y2d.reshape(B, H, W, 2, 2, C2)
    up = jnp.transpose(up, (0, 1, 3, 2, 4, 5)).reshape(B, Ho, Wo, C2)

    # ---- conv1 (+ReLU), channel concat fused: K = 9*C2 (up) + 9*C2 (skip) --
    w_hwio1 = jnp.transpose(params["c1_w"], (2, 3, 1, 0))       # (3,3,Cin,Cout)
    w1 = jnp.concatenate(
        [w_hwio1[:, :, :C2, :].reshape(9 * C2, Cout),           # up channels
         w_hwio1[:, :, C2:, :].reshape(9 * C2, Cout)],          # skip channels
        axis=0).astype(cdt)
    h1 = _conv3x3_relu_fused([up, skip], w1, params["c1_b"], cdt)

    # ---- conv2 (+ReLU): K = 9*Cout ----
    # TODO(synk): write conv1's output pre-padded and fold the final NCHW
    #             transpose into conv2's out_spec (lane-dense stores).
    w2 = jnp.transpose(params["c2_w"], (2, 3, 1, 0)).reshape(9 * Cout, Cout)
    h2 = _conv3x3_relu_fused([h1], w2.astype(cdt), params["c2_b"], jnp.float32)

    return jnp.transpose(h2, (0, 3, 1, 2))


# --------------------------- pure-JAX reference ----------------------------- #

def up_block_reference(params, x_nchw, skip_nchw):
    """lax.conv reference with the same bf16-operand / f32-accumulate casts."""
    cdt = COMPUTE_DTYPE
    x = jnp.transpose(x_nchw, (0, 2, 3, 1)).astype(cdt)
    skip = jnp.transpose(skip_nchw, (0, 2, 3, 1)).astype(cdt)

    # ConvTranspose2d(k=2, s=2, p=0) == conv with lhs_dilation=2, pad=1,
    # spatially flipped kernel, in/out channels swapped.
    wt = params["up_w"].astype(cdt)                          # (Cin, C2, 2, 2)
    rhs = jnp.transpose(wt[:, :, ::-1, ::-1], (2, 3, 0, 1))  # HWIO
    up = lax.conv_general_dilated(
        x, rhs, window_strides=(1, 1), padding=((1, 1), (1, 1)),
        lhs_dilation=(2, 2), dimension_numbers=("NHWC", "HWIO", "NHWC"),
        preferred_element_type=jnp.float32,
    ) + params["up_b"]
    up = up.astype(cdt)

    cat = jnp.concatenate([up, skip], axis=-1)

    def conv_relu(h, w_oihw, b, out_dtype):
        rhs = jnp.transpose(w_oihw, (2, 3, 1, 0)).astype(cdt)   # HWIO
        y = lax.conv_general_dilated(
            h, rhs, window_strides=(1, 1), padding="SAME",
            dimension_numbers=("NHWC", "HWIO", "NHWC"),
            preferred_element_type=jnp.float32,
        ) + b
        return jnp.maximum(y, 0.0).astype(out_dtype)

    h = conv_relu(cat, params["c1_w"], params["c1_b"], cdt)
    h = conv_relu(h, params["c2_w"], params["c2_b"], jnp.float32)
    return jnp.transpose(h, (0, 3, 1, 2))


# ----------------------------------- main ----------------------------------- #

if __name__ == "__main__":
    in_channels, out_channels = 8, 4
    C2 = in_channels // 2
    B, H, W = 2, 8, 8

    key = jax.random.PRNGKey(0)
    keys = jax.random.split(key, 8)

    # Deterministic synthetic parameters (shapes from UpBlock.__init__).
    params = {
        "up_w": 0.1 * jax.random.normal(keys[0], (in_channels, C2, 2, 2), jnp.float32),
        "up_b": 0.1 * jax.random.normal(keys[1], (C2,), jnp.float32),
        "c1_w": 0.1 * jax.random.normal(keys[2], (out_channels, in_channels, 3, 3), jnp.float32),
        "c1_b": 0.1 * jax.random.normal(keys[3], (out_channels,), jnp.float32),
        "c2_w": 0.1 * jax.random.normal(keys[4], (out_channels, out_channels, 3, 3), jnp.float32),
        "c2_b": 0.1 * jax.random.normal(keys[5], (out_channels,), jnp.float32),
    }

    x = jax.random.normal(keys[6], (B, in_channels, H, W), jnp.float32)
    skip = jax.random.normal(keys[7], (B, C2, 2 * H, 2 * W), jnp.float32)

    fwd = jax.jit(up_block_forward)
    ref_fn = jax.jit(up_block_reference)

    out = jax.block_until_ready(fwd(params, x, skip))
    ref = jax.block_until_ready(ref_fn(params, x, skip))

    assert out.shape == (B, out_channels, 2 * H, 2 * W), out.shape
    err = float(jnp.max(jnp.abs(out - ref)))
    assert err < 1e-2, f"max abs err {err}"
    print("KERNEL_OK")
</pallas_src>

<mosaic_0001>
module attributes {stable_mosaic.version = 11 : i64} {
  func.func @_deconv_kernel(%arg0: i32, %arg1: memref<128x8xbf16, #tpu.memory_space<vmem>>, %arg2: memref<8x16xbf16, #tpu.memory_space<vmem>>, %arg3: memref<1x16xf32, #tpu.memory_space<vmem>>, %arg4: memref<128x16xbf16, #tpu.memory_space<vmem>>) attributes {dimension_semantics = [#tpu.dimension_semantics<parallel>], iteration_bounds = array<i64: 1>, scalar_prefetch = 0 : i64, scratch_operands = 0 : i64, tpu.core_type = #tpu.core_type<tc>, window_params = [{transform_indices = @transform_0, window_bounds = array<i64: 128, 8>}, {pipeline_mode = #tpu.pipeline_mode<synchronous>, transform_indices = @transform_1, window_bounds = array<i64: 8, 16>}, {pipeline_mode = #tpu.pipeline_mode<synchronous>, transform_indices = @transform_2, window_bounds = array<i64: 1, 16>}, {transform_indices = @transform_3, window_bounds = array<i64: 128, 16>}]} {
    %c0 = arith.constant 0 : index
    %c0_0 = arith.constant 0 : index
    %0 = vector.load %arg1[%c0, %c0_0] : memref<128x8xbf16, #tpu.memory_space<vmem>>, vector<128x8xbf16>
    %c0_1 = arith.constant 0 : index
    %c0_2 = arith.constant 0 : index
    %1 = vector.load %arg2[%c0_1, %c0_2] : memref<8x16xbf16, #tpu.memory_space<vmem>>, vector<8x16xbf16>
    %cst = arith.constant dense<0.000000e+00> : vector<128x16xf32>
    %2 = tpu.matmul %0, %1, %cst {dimension_numbers = #tpu.dot_dimension_numbers<[1], [0], [0], [1], [0, 0, 1, 1], [], []>} : vector<128x8xbf16>, vector<8x16xbf16>, vector<128x16xf32> -> vector<128x16xf32>
    %c0_3 = arith.constant 0 : index
    %c0_4 = arith.constant 0 : index
    %3 = vector.load %arg3[%c0_3, %c0_4] : memref<1x16xf32, #tpu.memory_space<vmem>>, vector<1x16xf32>
    %4 = vector.broadcast %3 : vector<1x16xf32> to vector<128x16xf32>
    %5 = arith.addf %2, %4 : vector<128x16xf32>
    %6 = arith.truncf %5 : vector<128x16xf32> to vector<128x16xbf16>
    %c0_5 = arith.constant 0 : index
    %c0_6 = arith.constant 0 : index
    %7 = vector.load %arg4[%c0_5, %c0_6] : memref<128x16xbf16, #tpu.memory_space<vmem>>, vector<128x16xbf16>
    tpu.vector_store %arg4[%c0_5, %c0_6], %6 {strides = array<i32>} : memref<128x16xbf16, #tpu.memory_space<vmem>>, vector<128x16xbf16>,
    return
  }
  func.func @transform_0(%arg0: i32) -> (i32, i32) {
    %c0_i32 = arith.constant 0 : i32
    %c0_i32_0 = arith.constant 0 : i32
    return %arg0, %c0_i32 : i32, i32
  }
  func.func @transform_1(%arg0: i32) -> (i32, i32) {
    %c0_i32 = arith.constant 0 : i32
    %c0_i32_0 = arith.constant 0 : i32
    %c0_i32_1 = arith.constant 0 : i32
    return %c0_i32, %c0_i32_0 : i32, i32
  }
  func.func @transform_2(%arg0: i32) -> (i32, i32) {
    %c0_i32 = arith.constant 0 : i32
    %c0_i32_0 = arith.constant 0 : i32
    %c0_i32_1 = arith.constant 0 : i32
    return %c0_i32, %c0_i32_0 : i32, i32
  }
  func.func @transform_3(%arg0: i32) -> (i32, i32) {
    %c0_i32 = arith.constant 0 : i32
    %c0_i32_0 = arith.constant 0 : i32
    return %arg0, %c0_i32 : i32, i32
  }
}

module attributes {stable_mosaic.version = 11 : i64} {
  func.func @_conv3x3_kernel(%arg0: i32, %arg1: i32, %arg2: memref<1x16x18x4xbf16, #tpu.memory_space<vmem>>, %arg3: memref<1x8x18x4xbf16, #tpu.memory_space<vmem>>, %arg4: memref<1x16x18x4xbf16, #tpu.memory_space<vmem>>, %arg5: memref<1x8x18x4xbf16, #tpu.memory_space<vmem>>, %arg6: memref<72x4xbf16, #tpu.memory_space<vmem>>, %arg7: memref<1x4xf32, #tpu.memory_space<vmem>>, %arg8: memref<1x16x16x4xbf16, #tpu.memory_space<vmem>>) attributes {dimension_semantics = [#tpu.dimension_semantics<parallel>, #tpu.dimension_semantics<parallel>], iteration_bounds = array<i64: 2, 1>, scalar_prefetch = 0 : i64, scratch_operands = 0 : i64, tpu.core_type = #tpu.core_type<tc>, window_params = [{transform_indices = @transform_0, window_bounds = array<i64: 1, 16, 18, 4>}, {transform_indices = @transform_1, window_bounds = array<i64: 1, 8, 18, 4>}, {transform_indices = @transform_2, window_bounds = array<i64: 1, 16, 18, 4>}, {transform_indices = @transform_3, window_bounds = array<i64: 1, 8, 18, 4>}, {pipeline_mode = #tpu.pipeline_mode<synchronous>, transform_indices = @transform_4, window_bounds = array<i64: 72, 4>}, {pipeline_mode = #tpu.pipeline_mode<synchronous>, transform_indices = @transform_5, window_bounds = array<i64: 1, 4>}, {transform_indices = @transform_6, window_bounds = array<i64: 1, 16, 16, 4>}]} {
    %c0 = arith.constant 0 : index
    %c0_0 = arith.constant 0 : index
    %c0_1 = arith.constant 0 : index
    %c0_2 = arith.constant 0 : index
    %0 = vector.load %arg2[%c0, %c0_0, %c0_1, %c0_2] : memref<1x16x18x4xbf16, #tpu.memory_space<vmem>>, vector<1x16x18x4xbf16>
    %1 = vector.shape_cast %0 : vector<1x16x18x4xbf16> to vector<16x18x4xbf16>
    %c0_3 = arith.constant 0 : index
    %c0_4 = arith.constant 0 : index
    %c0_5 = arith.constant 0 : index
    %c0_6 = arith.constant 0 : index
    %2 = vector.load %arg3[%c0_3, %c0_4, %c0_5, %c0_6] : memref<1x8x18x4xbf16, #tpu.memory_space<vmem>>, vector<1x8x18x4xbf16>
    %3 = vector.shape_cast %2 : vector<1x8x18x4xbf16> to vector<8x18x4xbf16>
    %4 = vector.extract_strided_slice %3 {offsets = [0, 0, 0], sizes = [2, 18, 4], strides = [1, 1, 1]} : vector<8x18x4xbf16> to vector<2x18x4xbf16>
    %5 = tpu.concatenate %1, %4 in 0 : vector<16x18x4xbf16>, vector<2x18x4xbf16> -> vector<18x18x4xbf16>
    %6 = vector.extract_strided_slice %5 {offsets = [0, 0, 0], sizes = [16, 16, 4], strides = [1, 1, 1]} : vector<18x18x4xbf16> to vector<16x16x4xbf16>
    %7 = vector.extract_strided_slice %5 {offsets = [0, 1, 0], sizes = [16, 16, 4], strides = [1, 1, 1]} : vector<18x18x4xbf16> to vector<16x16x4xbf16>
    %8 = vector.extract_strided_slice %5 {offsets = [0, 2, 0], sizes = [16, 16, 4], strides = [1, 1, 1]} : vector<18x18x4xbf16> to vector<16x16x4xbf16>
    %9 = vector.extract_strided_slice %5 {offsets = [1, 0, 0], sizes = [16, 16, 4], strides = [1, 1, 1]} : vector<18x18x4xbf16> to vector<16x16x4xbf16>
    %10 = vector.extract_strided_slice %5 {offsets = [1, 1, 0], sizes = [16, 16, 4], strides = [1, 1, 1]} : vector<18x18x4xbf16> to vector<16x16x4xbf16>
    %11 = vector.extract_strided_slice %5 {offsets = [1, 2, 0], sizes = [16, 16, 4], strides = [1, 1, 1]} : vector<18x18x4xbf16> to vector<16x16x4xbf16>
    %12 = vector.extract_strided_slice %5 {offsets = [2, 0, 0], sizes = [16, 16, 4], strides = [1, 1, 1]} : vector<18x18x4xbf16> to vector<16x16x4xbf16>
    %13 = vector.extract_strided_slice %5 {offsets = [2, 1, 0], sizes = [16, 16, 4], strides = [1, 1, 1]} : vector<18x18x4xbf16> to vector<16x16x4xbf16>
    %14 = vector.extract_strided_slice %5 {offsets = [2, 2, 0], sizes = [16, 16, 4], strides = [1, 1, 1]} : vector<18x18x4xbf16> to vector<16x16x4xbf16>
    %c0_7 = arith.constant 0 : index
    %c0_8 = arith.constant 0 : index
    %c0_9 = arith.constant 0 : index
    %c0_10 = arith.constant 0 : index
    %15 = vector.load %arg4[%c0_7, %c0_8, %c0_9, %c0_10] : memref<1x16x18x4xbf16, #tpu.memory_space<vmem>>, vector<1x16x18x4xbf16>
    %16 = vector.shape_cast %15 : vector<1x16x18x4xbf16> to vector<16x18x4xbf16>
    %c0_11 = arith.constant 0 : index
    %c0_12 = arith.constant 0 : index
    %c0_13 = arith.constant 0 : index
    %c0_14 = arith.constant 0 : index
    %17 = vector.load %arg5[%c0_11, %c0_12, %c0_13, %c0_14] : memref<1x8x18x4xbf16, #tpu.memory_space<vmem>>, vector<1x8x18x4xbf16>
    %18 = vector.shape_cast %17 : vector<1x8x18x4xbf16> to vector<8x18x4xbf16>
    %19 = vector.extract_strided_slice %18 {offsets = [0, 0, 0], sizes = [2, 18, 4], strides = [1, 1, 1]} : vector<8x18x4xbf16> to vector<2x18x4xbf16>
    %20 = tpu.concatenate %16, %19 in 0 : vector<16x18x4xbf16>, vector<2x18x4xbf16> -> vector<18x18x4xbf16>
    %21 = vector.extract_strided_slice %20 {offsets = [0, 0, 0], sizes = [16, 16, 4], strides = [1, 1, 1]} : vector<18x18x4xbf16> to vector<16x16x4xbf16>
    %22 = vector.extract_strided_slice %20 {offsets = [0, 1, 0], sizes = [16, 16, 4], strides = [1, 1, 1]} : vector<18x18x4xbf16> to vector<16x16x4xbf16>
    %23 = vector.extract_strided_slice %20 {offsets = [0, 2, 0], sizes = [16, 16, 4], strides = [1, 1, 1]} : vector<18x18x4xbf16> to vector<16x16x4xbf16>
    %24 = vector.extract_strided_slice %20 {offsets = [1, 0, 0], sizes = [16, 16, 4], strides = [1, 1, 1]} : vector<18x18x4xbf16> to vector<16x16x4xbf16>
    %25 = vector.extract_strided_slice %20 {offsets = [1, 1, 0], sizes = [16, 16, 4], strides = [1, 1, 1]} : vector<18x18x4xbf16> to vector<16x16x4xbf16>
    %26 = vector.extract_strided_slice %20 {offsets = [1, 2, 0], sizes = [16, 16, 4], strides = [1, 1, 1]} : vector<18x18x4xbf16> to vector<16x16x4xbf16>
    %27 = vector.extract_strided_slice %20 {offsets = [2, 0, 0], sizes = [16, 16, 4], strides = [1, 1, 1]} : vector<18x18x4xbf16> to vector<16x16x4xbf16>
    %28 = vector.extract_strided_slice %20 {offsets = [2, 1, 0], sizes = [16, 16, 4], strides = [1, 1, 1]} : vector<18x18x4xbf16> to vector<16x16x4xbf16>
    %29 = vector.extract_strided_slice %20 {offsets = [2, 2, 0], sizes = [16, 16, 4], strides = [1, 1, 1]} : vector<18x18x4xbf16> to vector<16x16x4xbf16>
    %30 = tpu.concatenate %6, %7, %8, %9, %10, %11, %12, %13, %14, %21, %22, %23, %24, %25, %26, %27 in 2 : vector<16x16x4xbf16>, vector<16x16x4xbf16>, vector<16x16x4xbf16>, vector<16x16x4xbf16>, vector<16x16x4xbf16>, vector<16x16x4xbf16>, vector<16x16x4xbf16>, vector<16x16x4xbf16>, vector<16x16x4xbf16>, vector<16x16x4xbf16>, vector<16x16x4xbf16>, vector<16x16x4xbf16>, vector<16x16x4xbf16>, vector<16x16x4xbf16>, vector<16x16x4xbf16>, vector<16x16x4xbf16> -> vector<16x16x64xbf16>
    %31 = tpu.concatenate %28, %29 in 2 : vector<16x16x4xbf16>, vector<16x16x4xbf16> -> vector<16x16x8xbf16>
    %32 = tpu.concatenate %30, %31 in 2 : vector<16x16x64xbf16>, vector<16x16x8xbf16> -> vector<16x16x72xbf16>
    %33 = vector.shape_cast %32 : vector<16x16x72xbf16> to vector<256x72xbf16>
    %c0_15 = arith.constant 0 : index
    %c0_16 = arith.constant 0 : index
    %34 = vector.load %arg6[%c0_15, %c0_16] : memref<72x4xbf16, #tpu.memory_space<vmem>>, vector<72x4xbf16>
    %cst = arith.constant dense<0.000000e+00> : vector<256x4xf32>
    %35 = tpu.matmul %33, %34, %cst {dimension_numbers = #tpu.dot_dimension_numbers<[1], [0], [0], [1], [0, 0, 1, 1], [], []>} : vector<256x72xbf16>, vector<72x4xbf16>, vector<256x4xf32> -> vector<256x4xf32>
    %c0_17 = arith.constant 0 : index
    %c0_18 = arith.constant 0 : index
    %36 = vector.load %arg7[%c0_17, %c0_18] : memref<1x4xf32, #tpu.memory_space<vmem>>, vector<1x4xf32>
    %37 = vector.broadcast %36 : vector<1x4xf32> to vector<256x4xf32>
    %38 = arith.addf %35, %37 : vector<256x4xf32>
    %cst_19 = arith.constant 0.000000e+00 : f32
    %39 = vector.broadcast %cst_19 : f32 to vector<256x4xf32>
    %40 = arith.maximumf %38, %39 : vector<256x4xf32>
    %41 = vector.shape_cast %40 : vector<256x4xf32> to vector<16x16x4xf32>
    %42 = arith.truncf %41 : vector<16x16x4xf32> to vector<16x16x4xbf16>
    %c0_20 = arith.constant 0 : index
    %c0_21 = arith.constant 0 : index
    %c0_22 = arith.constant 0 : index
    %c0_23 = arith.constant 0 : index
    %43 = vector.load %arg8[%c0_20, %c0_21, %c0_22, %c0_23] : memref<1x16x16x4xbf16, #tpu.memory_space<vmem>>, vector<1x16x16x4xbf16>
    %44 = vector.shape_cast %43 : vector<1x16x16x4xbf16> to vector<16x16x4xbf16>
    %45 = vector.shape_cast %42 : vector<16x16x4xbf16> to vector<1x16x16x4xbf16>
    tpu.vector_store %arg8[%c0_20, %c0_21, %c0_22, %c0_23], %45 {strides = array<i32>} : memref<1x16x16x4xbf16, #tpu.memory_space<vmem>>, vector<1x16x16x4xbf16>,
    return
  }
  func.func @transform_0(%arg0: i32, %arg1: i32) -> (i32, i32, i32, i32) {
    %c0_i32 = arith.constant 0 : i32
    %c0_i32_0 = arith.constant 0 : i32
    %c0_i32_1 = arith.constant 0 : i32
    return %arg0, %arg1, %c0_i32, %c0_i32_0 : i32, i32, i32, i32
  }
  func.func @transform_1(%arg0: i32, %arg1: i32) -> (i32, i32, i32, i32) {
    %c1_i32 = arith.constant 1 : i32
    %0 = arith.addi %arg1, %c1_i32 : i32
    %c2_i32 = arith.constant 2 : i32
    %1 = arith.muli %0, %c2_i32 : i32
    %c0_i32 = arith.constant 0 : i32
    %c0_i32_0 = arith.constant 0 : i32
    %c0_i32_1 = arith.constant 0 : i32
    return %arg0, %1, %c0_i32, %c0_i32_0 : i32, i32, i32, i32
  }
  func.func @transform_2(%arg0: i32, %arg1: i32) -> (i32, i32, i32, i32) {
    %c0_i32 = arith.constant 0 : i32
    %c0_i32_0 = arith.constant 0 : i32
    %c0_i32_1 = arith.constant 0 : i32
    return %arg0, %arg1, %c0_i32, %c0_i32_0 : i32, i32, i32, i32
  }
  func.func @transform_3(%arg0: i32, %arg1: i32) -> (i32, i32, i32, i32) {
    %c1_i32 = arith.constant 1 : i32
    %0 = arith.addi %arg1, %c1_i32 : i32
    %c2_i32 = arith.constant 2 : i32
    %1 = arith.muli %0, %c2_i32 : i32
    %c0_i32 = arith.constant 0 : i32
    %c0_i32_0 = arith.constant 0 : i32
    %c0_i32_1 = arith.constant 0 : i32
    return %arg0, %1, %c0_i32, %c0_i32_0 : i32, i32, i32, i32
  }
  func.func @transform_4(%arg0: i32, %arg1: i32) -> (i32, i32) {
    %c0_i32 = arith.constant 0 : i32
    %c0_i32_0 = arith.constant 0 : i32
    %c0_i32_1 = arith.constant 0 : i32
    return %c0_i32, %c0_i32_0 : i32, i32
  }
  func.func @transform_5(%arg0: i32, %arg1: i32) -> (i32, i32) {
    %c0_i32 = arith.constant 0 : i32
    %c0_i32_0 = arith.constant 0 : i32
    %c0_i32_1 = arith.constant 0 : i32
    return %c0_i32, %c0_i32_0 : i32, i32
  }
  func.func @transform_6(%arg0: i32, %arg1: i32) -> (i32, i32, i32, i32) {
    %c0_i32 = arith.constant 0 : i32
    %c0_i32_0 = arith.constant 0 : i32
    %c0_i32_1 = arith.constant 0 : i32
    return %arg0, %arg1, %c0_i32, %c0_i32_0 : i32, i32, i32, i32
  }
}

module attributes {stable_mosaic.version = 11 : i64} {
  func.func @_conv3x3_kernel(%arg0: i32, %arg1: i32, %arg2: memref<1x16x18x4xbf16, #tpu.memory_space<vmem>>, %arg3: memref<1x8x18x4xbf16, #tpu.memory_space<vmem>>, %arg4: memref<36x4xbf16, #tpu.memory_space<vmem>>, %arg5: memref<1x4xf32, #tpu.memory_space<vmem>>, %arg6: memref<1x16x16x4xf32, #tpu.memory_space<vmem>>) attributes {dimension_semantics = [#tpu.dimension_semantics<parallel>, #tpu.dimension_semantics<parallel>], iteration_bounds = array<i64: 2, 1>, scalar_prefetch = 0 : i64, scratch_operands = 0 : i64, tpu.core_type = #tpu.core_type<tc>, window_params = [{transform_indices = @transform_0, window_bounds = array<i64: 1, 16, 18, 4>}, {transform_indices = @transform_1, window_bounds = array<i64: 1, 8, 18, 4>}, {pipeline_mode = #tpu.pipeline_mode<synchronous>, transform_indices = @transform_2, window_bounds = array<i64: 36, 4>}, {pipeline_mode = #tpu.pipeline_mode<synchronous>, transform_indices = @transform_3, window_bounds = array<i64: 1, 4>}, {transform_indices = @transform_4, window_bounds = array<i64: 1, 16, 16, 4>}]} {
    %c0 = arith.constant 0 : index
    %c0_0 = arith.constant 0 : index
    %c0_1 = arith.constant 0 : index
    %c0_2 = arith.constant 0 : index
    %0 = vector.load %arg2[%c0, %c0_0, %c0_1, %c0_2] : memref<1x16x18x4xbf16, #tpu.memory_space<vmem>>, vector<1x16x18x4xbf16>
    %1 = vector.shape_cast %0 : vector<1x16x18x4xbf16> to vector<16x18x4xbf16>
    %c0_3 = arith.constant 0 : index
    %c0_4 = arith.constant 0 : index
    %c0_5 = arith.constant 0 : index
    %c0_6 = arith.constant 0 : index
    %2 = vector.load %arg3[%c0_3, %c0_4, %c0_5, %c0_6] : memref<1x8x18x4xbf16, #tpu.memory_space<vmem>>, vector<1x8x18x4xbf16>
    %3 = vector.shape_cast %2 : vector<1x8x18x4xbf16> to vector<8x18x4xbf16>
    %4 = vector.extract_strided_slice %3 {offsets = [0, 0, 0], sizes = [2, 18, 4], strides = [1, 1, 1]} : vector<8x18x4xbf16> to vector<2x18x4xbf16>
    %5 = tpu.concatenate %1, %4 in 0 : vector<16x18x4xbf16>, vector<2x18x4xbf16> -> vector<18x18x4xbf16>
    %6 = vector.extract_strided_slice %5 {offsets = [0, 0, 0], sizes = [16, 16, 4], strides = [1, 1, 1]} : vector<18x18x4xbf16> to vector<16x16x4xbf16>
    %7 = vector.extract_strided_slice %5 {offsets = [0, 1, 0], sizes = [16, 16, 4], strides = [1, 1, 1]} : vector<18x18x4xbf16> to vector<16x16x4xbf16>
    %8 = vector.extract_strided_slice %5 {offsets = [0, 2, 0], sizes = [16, 16, 4], strides = [1, 1, 1]} : vector<18x18x4xbf16> to vector<16x16x4xbf16>
    %9 = vector.extract_strided_slice %5 {offsets = [1, 0, 0], sizes = [16, 16, 4], strides = [1, 1, 1]} : vector<18x18x4xbf16> to vector<16x16x4xbf16>
    %10 = vector.extract_strided_slice %5 {offsets = [1, 1, 0], sizes = [16, 16, 4], strides = [1, 1, 1]} : vector<18x18x4xbf16> to vector<16x16x4xbf16>
    %11 = vector.extract_strided_slice %5 {offsets = [1, 2, 0], sizes = [16, 16, 4], strides = [1, 1, 1]} : vector<18x18x4xbf16> to vector<16x16x4xbf16>
    %12 = vector.extract_strided_slice %5 {offsets = [2, 0, 0], sizes = [16, 16, 4], strides = [1, 1, 1]} : vector<18x18x4xbf16> to vector<16x16x4xbf16>
    %13 = vector.extract_strided_slice %5 {offsets = [2, 1, 0], sizes = [16, 16, 4], strides = [1, 1, 1]} : vector<18x18x4xbf16> to vector<16x16x4xbf16>
    %14 = vector.extract_strided_slice %5 {offsets = [2, 2, 0], sizes = [16, 16, 4], strides = [1, 1, 1]} : vector<18x18x4xbf16> to vector<16x16x4xbf16>
    %15 = tpu.concatenate %6, %7, %8, %9, %10, %11, %12, %13, %14 in 2 : vector<16x16x4xbf16>, vector<16x16x4xbf16>, vector<16x16x4xbf16>, vector<16x16x4xbf16>, vector<16x16x4xbf16>, vector<16x16x4xbf16>, vector<16x16x4xbf16>, vector<16x16x4xbf16>, vector<16x16x4xbf16> -> vector<16x16x36xbf16>
    %16 = vector.shape_cast %15 : vector<16x16x36xbf16> to vector<256x36xbf16>
    %c0_7 = arith.constant 0 : index
    %c0_8 = arith.constant 0 : index
    %17 = vector.load %arg4[%c0_7, %c0_8] : memref<36x4xbf16, #tpu.memory_space<vmem>>, vector<36x4xbf16>
    %cst = arith.constant dense<0.000000e+00> : vector<256x4xf32>
    %18 = tpu.matmul %16, %17, %cst {dimension_numbers = #tpu.dot_dimension_numbers<[1], [0], [0], [1], [0, 0, 1, 1], [], []>} : vector<256x36xbf16>, vector<36x4xbf16>, vector<256x4xf32> -> vector<256x4xf32>
    %c0_9 = arith.constant 0 : index
    %c0_10 = arith.constant 0 : index
    %19 = vector.load %arg5[%c0_9, %c0_10] : memref<1x4xf32, #tpu.memory_space<vmem>>, vector<1x4xf32>
    %20 = vector.broadcast %19 : vector<1x4xf32> to vector<256x4xf32>
    %21 = arith.addf %18, %20 : vector<256x4xf32>
    %cst_11 = arith.constant 0.000000e+00 : f32
    %22 = vector.broadcast %cst_11 : f32 to vector<256x4xf32>
    %23 = arith.maximumf %21, %22 : vector<256x4xf32>
    %24 = vector.shape_cast %23 : vector<256x4xf32> to vector<16x16x4xf32>
    %c0_12 = arith.constant 0 : index
    %c0_13 = arith.constant 0 : index
    %c0_14 = arith.constant 0 : index
    %c0_15 = arith.constant 0 : index
    %25 = vector.load %arg6[%c0_12, %c0_13, %c0_14, %c0_15] : memref<1x16x16x4xf32, #tpu.memory_space<vmem>>, vector<1x16x16x4xf32>
    %26 = vector.shape_cast %25 : vector<1x16x16x4xf32> to vector<16x16x4xf32>
    %27 = vector.shape_cast %24 : vector<16x16x4xf32> to vector<1x16x16x4xf32>
    tpu.vector_store %arg6[%c0_12, %c0_13, %c0_14, %c0_15], %27 {strides = array<i32>} : memref<1x16x16x4xf32, #tpu.memory_space<vmem>>, vector<1x16x16x4xf32>,
    return
  }
  func.func @transform_0(%arg0: i32, %arg1: i32) -> (i32, i32, i32, i32) {
    %c0_i32 = arith.constant 0 : i32
    %c0_i32_0 = arith.constant 0 : i32
    %c0_i32_1 = arith.constant 0 : i32
    return %arg0, %arg1, %c0_i32, %c0_i32_0 : i32, i32, i32, i32
  }
  func.func @transform_1(%arg0: i32, %arg1: i32) -> (i32, i32, i32, i32) {
    %c1_i32 = arith.constant 1 : i32
    %0 = arith.addi %arg1, %c1_i32 : i32
    %c2_i32 = arith.constant 2 : i32
    %1 = arith.muli %0, %c2_i32 : i32
    %c0_i32 = arith.constant 0 : i32
    %c0_i32_0 = arith.constant 0 : i32
    %c0_i32_1 = arith.constant 0 : i32
    return %arg0, %1, %c0_i32, %c0_i32_0 : i32, i32, i32, i32
  }
  func.func @transform_2(%arg0: i32, %arg1: i32) -> (i32, i32) {
    %c0_i32 = arith.constant 0 : i32
    %c0_i32_0 = arith.constant 0 : i32
    %c0_i32_1 = arith.constant 0 : i32
    return %c0_i32, %c0_i32_0 : i32, i32
  }
  func.func @transform_3(%arg0: i32, %arg1: i32) -> (i32, i32) {
    %c0_i32 = arith.constant 0 : i32
    %c0_i32_0 = arith.constant 0 : i32
    %c0_i32_1 = arith.constant 0 : i32
    return %c0_i32, %c0_i32_0 : i32, i32
  }
  func.func @transform_4(%arg0: i32, %arg1: i32) -> (i32, i32, i32, i32) {
    %c0_i32 = arith.constant 0 : i32
    %c0_i32_0 = arith.constant 0 : i32
    %c0_i32_1 = arith.constant 0 : i32
    return %arg0, %arg1, %c0_i32, %c0_i32_0 : i32, i32, i32, i32
  }
}

</mosaic_0001>

<bundles_post_ra>
// kernel: tile.9
= control target key start
LH: loop header
LB: loop body
LE: loop exit
PB: predicated region body
PF: predicated region fallthrough
CT: control target
= control target key end

     0   :  { %vm8_vm0 = vcmask 31744   ;;  %s40_s8 = smov 4   ;;  %s41_s9 = smov 8   ;;  %vm14_vm1 = vcmask 130144   ;;  %vm20_vm2 = vcmask 97344   ;;  %vm26_vm3 = vcmask 64544   ;;  %s58_s0 = inlined_call_operand.vmem [shape: f32[4,4], index: 0, kind: input, shape index: {}]   ;;  %s59_s1 = inlined_call_operand.vmem [shape: f32[1,16], index: 1, kind: output, shape index: {}]  }
   0x1   :  { %v5_v0 = vld [vmem:[%s58_s0] sm:$0xf]  ;;  %s39_s0 = smov 12  }
   0x2   :  { %6 = vst [vmem:[#allocation1] sm:$0xf] %v5_v0 }
   0x9   :  { %v11_v1 = vld [vmem:[#allocation1 + $0x3] sm:$0x1]   ;;  %v23_v2 = vld [vmem:[#allocation1 + $0x1] sm:$0x1]   ;;  %v7_v3 = vld [vmem:[#allocation1] sm:$0x1]  }
   0xa   :  { %12 = vrot.lane.b32.xlu0 %v11_v1, %s39_s0  ;;  %24 = vrot.lane.b32.xlu1 %v23_v2, %s40_s8  ;;  %v17_v4 = vld [vmem:[#allocation1 + $0x2] sm:$0x1]   ;;  %9 = vst.msk [vmem:[#allocation0] sm:$0x1] %vm8_vm0, %v7_v3  }
   0xe   :  { %18 = vrot.lane.b32.xlu0 %v17_v4, %s41_s9 }
  0x7c   :  { %v13_v5 = vpop.permute.xlu0 %12   ;;  %v25_v6 = vpop.permute.xlu1 %24  }
  0x7d   :  { %15 = vst.msk [vmem:[#allocation0] sm:$0x1] %vm14_vm1, %v13_v5  }
  0x80   :  { %v19_v7 = vpop.permute.xlu0 %18  }
  0x81   :  { %21 = vst.msk [vmem:[#allocation0] sm:$0x1] %vm20_vm2, %v19_v7  }
  0x82   :  { %27 = vst.msk [vmem:[#allocation0] sm:$0x1] %vm26_vm3, %v25_v6  }
  0x89   :  { %v32_v8 = vld [vmem:[#allocation0] sm:$0x1] }
  0x8a   :  { %35 = vst [vmem:[%s59_s1] sm:$0x1] %v32_v8 }

// kernel: tile.8
= control target key start
LH: loop header
LB: loop body
LE: loop exit
PB: predicated region body
PF: predicated region fallthrough
CT: control target
= control target key end

     0   :  { %s22_s0 = inlined_call_operand.vmem [shape: f32[4], index: 0, kind: input, shape index: {}]   ;;  %s23_s1 = inlined_call_operand.vmem [shape: f32[4,4], index: 1, kind: output, shape index: {}]  }
   0x1   :  { %v4_v0 = vld [vmem:[%s22_s0] ss:$0 sm:$0xff] }
   0x2   :  { %5 = vst [vmem:[%s23_s1] sm:$0xf] %v4_v0 }

// kernel: up_block_forward.3
= control target key start
LH: loop header
LB: loop body
LE: loop exit
PB: predicated region body
PF: predicated region fallthrough
CT: control target
= control target key end

     0   :  { %vm104_vm0 = vcmask 1043456   ;;  %vm79_vm1 = vcmask 64512   ;;  %vm269_vm2 = vcmask 125952   ;;  %s500_s1 = inlined_call_operand.vmem [shape: bf16[8,16], index: 1, kind: input, shape index: {}]   ;;  %s501_s0 = inlined_call_operand.vmem [shape: bf16[128,8], index: 0, kind: input, shape index: {}]   ;;  %s502_s2 = inlined_call_operand.vmem [shape: f32[1,16], index: 2, kind: input, shape index: {}]   ;;  %s503_s3 = inlined_call_operand.vmem [shape: bf16[128,16], index: 3, kind: output, shape index: {}]  }
   0x1   :  { %v31_v0 = vld [vmem:[%s500_s1] sm:$0xf]  ;;  %v372_v4 = vld [vmem:[%s501_s0 + $0x8] sm:$0xff]   ;;  %v374_v6 = vld [vmem:[%s501_s0 + $0x10] sm:$0xff]  }
   0x2   :  { %368 = vmatprep.subr.msk.bf16.mxu0 %vm104_vm0, %v31_v0  ;;  %369 = vmatprep.subr.msk.bf16.mxu1 %vm104_vm0, %v31_v0  ;;  %v106_v1 = vsel %vm104_vm0, %v31_v0, 0  ;;  %v370_v2 = vld [vmem:[%s501_s0] sm:$0xff]   ;;  %v373_v5 = vld [vmem:[%s501_s0 + $0x28] sm:$0xff]   ;;  %v375_v7 = vld [vmem:[%s501_s0 + $0x30] sm:$0xff]  }
   0x3   :  { %349 = vmatpush3.bf16.msra.mxu0 %v106_v1  ;;  %367 = vmatpush3.bf16.msra.mxu1 %v106_v1  ;;  %v371_v3 = vld [vmem:[%s501_s0 + $0x20] sm:$0xff]   ;;  %v376_v8 = vld [vmem:[%s501_s0 + $0x18] sm:$0xff]  }
   0x4   :  { %350 = vmatprep.mubr.msk.bf16.mxu0 %vm79_vm1, %v370_v2  ;;  %358 = vmatprep.mubr.msk.bf16.mxu1 %vm79_vm1, %v371_v3  ;;  %v377_v9 = vld [vmem:[%s501_s0 + $0x38] sm:$0xff]   ;;  %v290_v10 = vld [vmem:[%s502_s2] ss:$0 sm:$0xff] }
   0x6   :  { %351 = vmatmul.mubr.msk.bf16.vlgmr.msra.gmra.mxu0 %vm79_vm1, %v372_v4  ;;  %359 = vmatmul.mubr.msk.bf16.vlgmr.msra.gmra.mxu1 %vm79_vm1, %v373_v5 }
   0x7   :  { %354 = vmatprep.mubr.msk.bf16.mxu0 %vm79_vm1, %v374_v6  ;;  %362 = vmatprep.mubr.msk.bf16.mxu1 %vm79_vm1, %v375_v7 }
   0xe   :  { %355 = vmatmul.mubr.msk.bf16.gmra.mxu0 %vm79_vm1, %v376_v8  ;;  %363 = vmatmul.mubr.msk.bf16.gmra.mxu1 %vm79_vm1, %v377_v9 }
  0xc6   :  { %v352_v11 = vpop.f32.mrf.mxu0  ;;  %v360_v13 = vpop.f32.mrf.mxu1 }
  0xc7   :  { %v151_v12 = vadd.f32 %v352_v11, %v290_v10  ;;  %v183_v14 = vadd.f32 %v360_v13, %v290_v10 }
  0xc8   :  { %v142_v15 = vpop.f32.mrf.mxu0  ;;  %v174_v18 = vpop.f32.mrf.mxu1 }
  0xc9   :  { %v325_v16 = vpack.c.bf16 %v151_v12, %v151_v12  ;;  %v143_v17 = vadd.f32 %v290_v10, %v142_v15  ;;  %v333_v19 = vpack.c.bf16 %v183_v14, %v183_v14  ;;  %v175_v20 = vadd.f32 %v290_v10, %v174_v18 }
  0xca   :  { %v353_v21 = vpop.f32.mrf.mxu0  ;;  %v361_v24 = vpop.f32.mrf.mxu1 }
  0xcb   :  { %272 = vst.msk [vmem:[%s503_s3 + $0x8] sm:$0xf] %vm269_vm2, %v325_v16  ;;  %v323_v22 = vpack.c.bf16 %v143_v17, %v143_v17  ;;  %v154_v23 = vadd.f32 %v353_v21, %v290_v10  ;;  %280 = vst.msk [vmem:[%s503_s3 + $0x28] sm:$0xf] %vm269_vm2, %v333_v19  ;;  %v331_v25 = vpack.c.bf16 %v175_v20, %v175_v20 }
  0xcc   :  { %v186_v26 = vadd.f32 %v361_v24, %v290_v10  ;;  %v145_v27 = vpop.f32.mrf.mxu0  ;;  %v177_v30 = vpop.f32.mrf.mxu1 }
  0xcd   :  { %270 = vst.msk [vmem:[%s503_s3] sm:$0xf] %vm269_vm2, %v323_v22  ;;  %v326_v28 = vpack.c.bf16 %v154_v23, %v154_v23  ;;  %v146_v29 = vadd.f32 %v290_v10, %v145_v27  ;;  %278 = vst.msk [vmem:[%s503_s3 + $0x20] sm:$0xf] %vm269_vm2, %v331_v25  ;;  %v178_v32 = vadd.f32 %v290_v10, %v177_v30 }
  0xce   :  { %v334_v31 = vpack.c.bf16 %v186_v26, %v186_v26  ;;  %v356_v33 = vpop.f32.mrf.mxu0  ;;  %v364_v36 = vpop.f32.mrf.mxu1 }
  0xcf   :  { %273 = vst.msk [vmem:[%s503_s3 + $0xc] sm:$0xf] %vm269_vm2, %v326_v28  ;;  %v324_v34 = vpack.c.bf16 %v146_v29, %v146_v29  ;;  %v167_v35 = vadd.f32 %v356_v33, %v290_v10  ;;  %v332_v37 = vpack.c.bf16 %v178_v32, %v178_v32  ;;  %v199_v38 = vadd.f32 %v364_v36, %v290_v10 }
  0xd0   :  { %281 = vst.msk [vmem:[%s503_s3 + $0x2c] sm:$0xf] %vm269_vm2, %v334_v31  ;;  %v158_v39 = vpop.f32.mrf.mxu0  ;;  %v190_v42 = vpop.f32.mrf.mxu1 }
  0xd1   :  { %271 = vst.msk [vmem:[%s503_s3 + $0x4] sm:$0xf] %vm269_vm2, %v324_v34  ;;  %v329_v40 = vpack.c.bf16 %v167_v35, %v167_v35  ;;  %v159_v41 = vadd.f32 %v290_v10, %v158_v39  ;;  %279 = vst.msk [vmem:[%s503_s3 + $0x24] sm:$0xf] %vm269_vm2, %v332_v37  ;;  %v337_v43 = vpack.c.bf16 %v199_v38, %v199_v38 }
  0xd2   :  { %v191_v44 = vadd.f32 %v290_v10, %v190_v42  ;;  %v357_v45 = vpop.f32.mrf.mxu0  ;;  %v365_v48 = vpop.f32.mrf.mxu1 }
  0xd3   :  { %276 = vst.msk [vmem:[%s503_s3 + $0x18] sm:$0xf] %vm269_vm2, %v329_v40  ;;  %v327_v46 = vpack.c.bf16 %v159_v41, %v159_v41  ;;  %v170_v47 = vadd.f32 %v357_v45, %v290_v10  ;;  %284 = vst.msk [vmem:[%s503_s3 + $0x38] sm:$0xf] %vm269_vm2, %v337_v43  ;;  %v202_v50 = vadd.f32 %v365_v48, %v290_v10 }
  0xd4   :  { %v335_v49 = vpack.c.bf16 %v191_v44, %v191_v44  ;;  %v161_v51 = vpop.f32.mrf.mxu0  ;;  %v193_v54 = vpop.f32.mrf.mxu1 }
  0xd5   :  { %274 = vst.msk [vmem:[%s503_s3 + $0x10] sm:$0xf] %vm269_vm2, %v327_v46  ;;  %v330_v52 = vpack.c.bf16 %v170_v47, %v170_v47  ;;  %v162_v53 = vadd.f32 %v290_v10, %v161_v51  ;;  %v338_v55 = vpack.c.bf16 %v202_v50, %v202_v50  ;;  %v194_v56 = vadd.f32 %v290_v10, %v193_v54 }
  0xd6   :  { %282 = vst.msk [vmem:[%s503_s3 + $0x30] sm:$0xf] %vm269_vm2, %v335_v49 }
  0xd7   :  { %277 = vst.msk [vmem:[%s503_s3 + $0x1c] sm:$0xf] %vm269_vm2, %v330_v52  ;;  %v328_v57 = vpack.c.bf16 %v162_v53, %v162_v53  ;;  %285 = vst.msk [vmem:[%s503_s3 + $0x3c] sm:$0xf] %vm269_vm2, %v338_v55  ;;  %v336_v58 = vpack.c.bf16 %v194_v56, %v194_v56 }
  0xd9   :  { %275 = vst.msk [vmem:[%s503_s3 + $0x14] sm:$0xf] %vm269_vm2, %v328_v57  ;;  %283 = vst.msk [vmem:[%s503_s3 + $0x34] sm:$0xf] %vm269_vm2, %v336_v58 }

// kernel: up_block_forward.5
= control target key start
LH: loop header
LB: loop body
LE: loop exit
PB: predicated region body
PF: predicated region fallthrough
CT: control target
= control target key end

     0   :  { %s1985_s15 = smov 0   ;;  %s1987_s16 = smov 0   ;;  %s2804_s0 = inlined_call_operand.vmem [shape: bf16[2,24,18,4], index: 0, kind: input, shape index: {}, may-alias: {0,1}]   ;;  %s2805_s1 = inlined_call_operand.vmem [shape: bf16[2,24,18,4], index: 1, kind: input, shape index: {}, may-alias: {0,1}]   ;;  %s2806_s2 = inlined_call_operand.vmem [shape: bf16[36,4], index: 2, kind: input, shape index: {}]   ;;  %s2807_s3 = inlined_call_operand.vmem [shape: f32[1,4], index: 3, kind: input, shape index: {}]   ;;  %s2808_s4 = inlined_call_operand.vmem [shape: f32[2,16,16,4], index: 4, kind: output, shape index: {}]  }
   0x1   :  { %s1989_s17 = smov 0  }
   0x2 LB: > { %s26_s18 = sadd.s32 1, %s1946_s16  ;;  %p1721_p0 = scmp.ge.s32.totalorder %s1950_s17, 1  ;;  %s1950_s17 = sphi %s1989_s17, %s14_s17   ;;  %s1946_s16 = sphi %s1987_s16, %s2810_s16   ;;  %s1942_s15 = sphi %s1985_s15, %s2809_s15  }
   0x3   : > { %p28_p1 = scmp.ge.s32.totalorder %s26_s18, 2  ;;  %p220_p2 = scmp.lt.s32.totalorder %s1950_s17, 3 }
   0x5   : > { %s2812_s18 = smov (%p28_p1, %s26_s18), 0  ;;  %p221_p3 = pnand %p1721_p0, %p220_p2 }
   0x6   : > { %p279_p4 = scmp.lt.s32.totalorder (!%p221_p3), %s1942_s15, 1  ;;  %s1952_s23 = smov (!%p221_p3), 12  }
   0x7   : > { %224 = sbr.rel (%p221_p3) target bundleno = 590 (0x24e), region = 36  ;;  %s1953_s24 = smov (!%p221_p3), 8  }
   0x8   : > { %s1954_s25 = smov (!%p221_p3), 4   ;;  %s1955_s26 = smov (!%p221_p3), 16  }
   0x9   : > { %s1956_s27 = smov (!%p221_p3), 20   ;;  %s1957_s28 = smov (!%p221_p3), 24  }
   0xa   : > { %s1958_s7 = smov (!%p221_p3), 28   ;;  %s1959_s10 = smov (!%p221_p3), 32  }
   0xc   : > { %s2814_s15 = smov (!%p279_p4, %s1942_s15), 1  ;;  %vm728_vm0 = vcmask 1046528   ;;  %vm503_vm1 = vsmask.f32 7424  ;;  %vm1371_vm2 = vcmask 1041408   ;;  %vm1047_vm3 = vcmask 31744  }
   0xd   : > { %s1852_s19 = smul.u32 288, %s2814_s15  ;;  %vm1080_vm4 = vcmask 64512   ;;  %vm1146_vm5 = vcmask 130048   ;;  %vm1113_vm6 = vcmask 97280   ;;  %vm1179_vm7 = vcmask 162816   ;;  %s1786_s21 = sshll.u32 %s2814_s15, 8 }
   0xe   : > { %vm1212_vm8 = vcmask 195584   ;;  %vm1245_vm9 = vcmask 228352   ;;  %vm1278_vm10 = vcmask 261120   ;;  %vm1338_vm11 = vcmask 293888  }
   0xf   : > { %s2011_s22 = scalar_lea.vmem %s2804_s0, %s1852_s19  ;;  %s1785_s11 = sadd.s32 192, %s1852_s19 }
  0x10   : > { %v2014_v0 = vld [vmem:[%s2011_s22 + $0x6c] sm:$0xff]   ;;  %v2024_v2 = vld [vmem:[%s2011_s22 + $0x60] sm:$0xff]   ;;  %v1890_v3 = vld [vmem:[%s2011_s22 + $0x68] ss:$0 sps:$4 sm:$0x11]   ;;  %s2197_s14 = scalar_lea.vmem %s2805_s1, %s1785_s11 }
  0x11   : > { %v2017_v1 = vld [vmem:[%s2011_s22 + $0xc] sm:$0xff]   ;;  %830 = vrot.lane.b32.xlu1 %v2014_v0, %s1952_s23  ;;  %v2028_v4 = vld [vmem:[%s2011_s22] sm:$0xff]   ;;  %v756_v5 = vrot.slane %v2014_v0, 1  ;;  %v753_v6 = vrot.slane %v2024_v2, 1  ;;  %v754_v7 = vrot.slane %v1890_v3, 1  ;;  %v613_v26 = vshrl.u32 %v2014_v0, 16 }
  0x12   : > { %814 = vrot.lane.b32.xlu0 %v2017_v1, %s1952_s23  ;;  %v1892_v8 = vld [vmem:[%s2011_s22 + $0x8] ss:$0 sps:$4 sm:$0x11]   ;;  %v732_v9 = vrot.slane %v2017_v1, 1  ;;  %v729_v10 = vrot.slane %v2028_v4, 1  ;;  %v517_v16 = vshrl.u32 %v2017_v1, 16 }
  0x13   : > { %v1893_v11 = vld [vmem:[%s2011_s22 + $0x74] ss:$0 sps:$4 sm:$0x11]   ;;  %v2037_v12 = vsel %vm728_vm0, %v753_v6, %v754_v7  ;;  %v730_v13 = vrot.slane %v1892_v8, 1  ;;  %v519_v17 = vshll.u32 %v2017_v1, 16  ;;  %v505_v18 = vshrl.u32 %v2028_v4, 16 }
  0x14   : > { %v1894_v14 = vld [vmem:[%s2011_s22 + $0x14] ss:$0 sps:$4 sm:$0x11]   ;;  %v757_v15 = vrot.slane %v1893_v11, 1  ;;  %v507_v22 = vshll.u32 %v2028_v4, 16  ;;  %v512_v25 = vshll.u32 %v1892_v8, 16 }
  0x15   : > { %793 = vrot.lane.b32.xlu1 %v2037_v12, %s1953_s24  ;;  %v731_v19 = vsel %vm728_vm0, %v729_v10, %v730_v13  ;;  %v733_v20 = vrot.slane %v1894_v14, 1  ;;  %v524_v21 = vshll.u32 %v1894_v14, 16  ;;  %v521_v24 = vrot.slane %v519_v17, 1  ;;  %v2059_v39 = vld [vmem:[%s2011_s22 + $0x78] sm:$0xff]   ;;  %v2117_v14 = vld [vmem:[%s2011_s22 + $0x24] sm:$0xff]  }
  0x16   : > { %777 = vrot.lane.b32.xlu0 %v731_v19, %s1953_s24  ;;  %v2049_v23 = vsel %vm728_vm0, %v756_v5, %v757_v15  ;;  %v509_v29 = vrot.slane %v507_v22, 1  ;;  %v615_v30 = vshll.u32 %v2014_v0, 16  ;;  %v514_v32 = vrot.slane %v512_v25, 1  ;;  %v2065_v46 = vld [vmem:[%s2011_s22 + $0x18] sm:$0xff]  }
  0x17   : > { %v734_v27 = vsel %vm728_vm0, %v732_v9, %v733_v20  ;;  %v526_v28 = vrot.slane %v524_v21, 1  ;;  %v522_v31 = vor.u32 %v521_v24, %v517_v16  ;;  %v620_v33 = vshll.u32 %v1893_v11, 16  ;;  %v1897_v47 = vld [vmem:[%s2011_s22 + $0x80] ss:$0 sps:$4 sm:$0x11]   ;;  %v2110_v11 = vld [vmem:[%s2011_s22 + $0x84] sm:$0xff]  }
  0x18   : > { %v601_v34 = vshrl.u32 %v2024_v2, 16  ;;  %v510_v35 = vor.u32 %v509_v29, %v505_v18  ;;  %v617_v36 = vrot.slane %v615_v30, 1  ;;  %v603_v37 = vshll.u32 %v2024_v2, 16  ;;  %v1898_v52 = vld [vmem:[%s2011_s22 + $0x20] ss:$0 sps:$4 sm:$0x11]  }
  0x19   : > { %795 = vrot.lane.b32.xlu1 %v2049_v23, %s1953_s24  ;;  %v608_v38 = vshll.u32 %v1890_v3, 16  ;;  %v527_v40 = vsel %vm503_vm1, %v522_v31, %v526_v28  ;;  %v622_v41 = vrot.slane %v620_v33, 1  ;;  %v627_v50 = vshll.u32 %v2059_v39, 16  ;;  %v1901_v15 = vld [vmem:[%s2011_s22 + $0x8c] ss:$0 sps:$4 sm:$0x11]  }
  0x1a   : > { %779 = vrot.lane.b32.xlu0 %v734_v27, %s1953_s24  ;;  %v515_v42 = vsel %vm503_vm1, %v510_v35, %v514_v32  ;;  %v618_v43 = vor.u32 %v617_v36, %v613_v26  ;;  %v605_v44 = vrot.slane %v603_v37, 1  ;;  %v531_v53 = vshll.u32 %v2065_v46, 16  ;;  %v1902_v17 = vld [vmem:[%s2011_s22 + $0x2c] ss:$0 sps:$4 sm:$0x11]   ;;  %v1919_v33 = vld [vmem:[%s2806_s2] sm:$0xff]  }
  0x1b   : > { %v610_v45 = vrot.slane %v608_v38, 1  ;;  %v625_v54 = vshrl.u32 %v2059_v39, 16  ;;  %v629_v55 = vrot.slane %v627_v50, 1  ;;  %v632_v56 = vshll.u32 %v1897_v47, 16  ;;  %v1916_v28 = vld [vmem:[%s2806_s2 + $0x8] sm:$0xff]  }
  0x1c   : > { %v2070_v48 = vsel %vm503_vm1, %v618_v43, %v622_v41  ;;  %v606_v49 = vor.u32 %v605_v44, %v601_v34  ;;  %v529_v57 = vshrl.u32 %v2065_v46, 16  ;;  %v533_v58 = vrot.slane %v531_v53, 1  ;;  %v1915_v19 = vld [vmem:[%s2806_s2 + $0x10] ss:$0 sps:$4 sm:$0x33]  }
  0x1d   : > { %698 = vrot.lane.b32.xlu1 %v527_v40, %s1954_s25  ;;  %v536_v59 = vshll.u32 %v1898_v52, 16  ;;  %v630_v60 = vor.u32 %v629_v55, %v625_v54  ;;  %v634_v61 = vrot.slane %v632_v56, 1  ;;  %v759_v6 = vrot.slane %v2059_v39, 1  ;;  %1850 = vmatprep.subr.msk.bf16.mxu0 %vm1371_vm2, %v1915_v19  ;;  %v2173_v43 = vld [vmem:[%s2011_s22 + $0x90] sm:$0xff]  }
  0x1e   : > { %696 = vrot.lane.b32.xlu0 %v515_v42, %s1954_s25  ;;  %v2075_v51 = vsel %vm503_vm1, %v606_v49, %v610_v45  ;;  %v534_v62 = vor.u32 %v533_v58, %v529_v57  ;;  %v760_v7 = vrot.slane %v1897_v47, 1  ;;  %v735_v8 = vrot.slane %v2065_v46, 1  ;;  %1851 = vmatprep.subr.msk.bf16.mxu1 %vm1371_vm2, %v1915_v19  ;;  %v2178_v44 = vld [vmem:[%s2011_s22 + $0x30] sm:$0xff]   ;;  %v1905_v45 = vld [vmem:[%s2011_s22 + $0x98] ss:$0 sps:$4 sm:$0x11]  }
  0x1f   : > { %v538_v63 = vrot.slane %v536_v59, 1  ;;  %v2092_v3 = vsel %vm503_vm1, %v630_v60, %v634_v61  ;;  %v736_v9 = vrot.slane %v1898_v52, 1  ;;  %v639_v16 = vshll.u32 %v2110_v11, 16  ;;  %v1906_v49 = vld [vmem:[%s2011_s22 + $0x38] ss:$0 sps:$4 sm:$0x11]  }
  0x20   : > { %v2107_v10 = vsel %vm728_vm0, %v759_v6, %v760_v7  ;;  %v543_v18 = vshll.u32 %v2117_v14, 16  ;;  %v637_v20 = vshrl.u32 %v2110_v11, 16  ;;  %v644_v22 = vshll.u32 %v1901_v15, 16 }
  0x21   : > { %714 = vrot.lane.b32.xlu1 %v2070_v48, %s1954_s25  ;;  %v2096_v5 = vsel %vm503_vm1, %v534_v62, %v538_v63  ;;  %v2114_v13 = vsel %vm728_vm0, %v735_v8, %v736_v9  ;;  %v641_v21 = vrot.slane %v639_v16, 1  ;;  %v1373_v24 = vsel %vm1371_vm2, %v1915_v19, 0  ;;  %v2214_v9 = vld [vmem:[%s2011_s22 + $0x9c] sm:$0xff]  }
  0x22   : > { %712 = vrot.lane.b32.xlu0 %v2075_v51, %s1954_s25  ;;  %v541_v25 = vshrl.u32 %v2117_v14, 16  ;;  %v545_v26 = vrot.slane %v543_v18, 1  ;;  %1807 = vmatpush3.bf16.msra.mxu0 %v1373_v24  ;;  %v646_v30 = vrot.slane %v644_v22, 1  ;;  %v762_v36 = vrot.slane %v2110_v11, 1 }
  0x23   : > { %1847 = vmatpush3.bf16.msra.mxu1 %v1373_v24  ;;  %v642_v29 = vor.u32 %v641_v21, %v637_v20  ;;  %1808 = vmatprep.subr.bf16.mxu0 %v1916_v28  ;;  %v763_v37 = vrot.slane %v1901_v15, 1  ;;  %v738_v38 = vrot.slane %v2117_v14, 1  ;;  %v651_v47 = vshll.u32 %v2173_v43, 16  ;;  %v1909_v15 = vld [vmem:[%s2011_s22 + $0xa4] ss:$0 sps:$4 sm:$0x11]  }
  0x24   : > { %v546_v31 = vor.u32 %v545_v26, %v541_v25  ;;  %1845 = vmatprep.subr.bf16.mxu1 %v1916_v28  ;;  %v555_v50 = vshll.u32 %v2178_v44, 16  ;;  %v656_v52 = vshll.u32 %v1905_v45, 16  ;;  %v649_v53 = vshrl.u32 %v2173_v43, 16 }
  0x25   : > { %832 = vrot.lane.b32.xlu1 %v2059_v39, %s1952_s23  ;;  %v647_v34 = vsel %vm503_vm1, %v642_v29, %v646_v30  ;;  %v764_v41 = vsel %vm728_vm0, %v762_v36, %v763_v37  ;;  %v653_v54 = vrot.slane %v651_v47, 1  ;;  %v553_v55 = vshrl.u32 %v2178_v44, 16 }
  0x26   : > { %816 = vrot.lane.b32.xlu0 %v2065_v46, %s1952_s23  ;;  %1809 = vmatpush3.bf16.msra.mxu0 %v1916_v28  ;;  %v557_v56 = vrot.slane %v555_v50, 1  ;;  %v560_v57 = vshll.u32 %v1906_v49, 16  ;;  %v658_v58 = vrot.slane %v656_v52, 1  ;;  %v741_v6 = vrot.slane %v2178_v44, 1 }
  0x27   : > { %1848 = vmatpush3.bf16.msra.mxu1 %v1916_v28  ;;  %1810 = vmatprep.subr.bf16.mxu0 %v1919_v33  ;;  %v654_v59 = vor.u32 %v653_v54, %v649_v53  ;;  %v742_v7 = vrot.slane %v1906_v49, 1  ;;  %v663_v16 = vshll.u32 %v2214_v9, 16  ;;  %v661_v19 = vshrl.u32 %v2214_v9, 16 }
  0x28   : > { %1846 = vmatprep.subr.bf16.mxu1 %v1919_v33  ;;  %v558_v60 = vor.u32 %v557_v56, %v553_v55  ;;  %v562_v61 = vrot.slane %v560_v57, 1  ;;  %v668_v21 = vshll.u32 %v1909_v15, 16  ;;  %v768_v36 = vrot.slane %v2214_v9, 1  ;;  %v2280_v56 = vld [vmem:[%s2011_s22 + $0xa8] sm:$0xff]  }
  0x29   : > { %877 = vrot.lane.b32.xlu1 %v2070_v48, %s1955_s26  ;;  %v659_v62 = vsel %vm503_vm1, %v654_v59, %v658_v58  ;;  %v665_v20 = vrot.slane %v663_v16, 1  ;;  %v769_v37 = vrot.slane %v1909_v15, 1  ;;  %v2286_v58 = vld [vmem:[%s2011_s22 + $0x48] sm:$0xff]  }
  0x2a   : > { %861 = vrot.lane.b32.xlu0 %v527_v40, %s1955_s26  ;;  %1811 = vmatpush3.bf16.msra.mxu0 %v1919_v33  ;;  %v739_v40 = vrot.slane %v1902_v17, 1  ;;  %v563_v63 = vsel %vm503_vm1, %v558_v60, %v562_v61  ;;  %v1913_v60 = vld [vmem:[%s2011_s22 + $0xb0] ss:$0 sps:$4 sm:$0x11]   ;;  %v675_v61 = vshll.u32 %v2280_v56, 16  ;;  %v577_v15 = vshrl.u32 %v2286_v58, 16 }
  0x2b   : > { %1849 = vmatpush3.bf16.msra.mxu1 %v1919_v33  ;;  %v666_v26 = vor.u32 %v665_v20, %v661_v19 }
  0x2c   : > { %v740_v42 = vsel %vm728_vm0, %v738_v38, %v739_v40 }
  0x2d   : > { %879 = vrot.lane.b32.xlu1 %v2092_v3, %s1955_s26 }
  0x2e   : > { %863 = vrot.lane.b32.xlu0 %v2096_v5, %s1955_s26 }
  0x31   : > { %912 = vrot.lane.b32.xlu1 %v2049_v23, %s1956_s27 }
  0x32   : > { %896 = vrot.lane.b32.xlu0 %v734_v27, %s1956_s27  ;;  %v548_v27 = vshll.u32 %v1902_v17, 16  ;;  %v1910_v17 = vld [vmem:[%s2011_s22 + $0x44] ss:$0 sps:$4 sm:$0x11]  }
  0x33   : > { %v572_v25 = vshll.u32 %v1910_v17, 16 }
  0x34   : > { %v550_v32 = vrot.slane %v548_v27, 1  ;;  %v670_v27 = vrot.slane %v668_v21, 1 }
  0x35   : > { %914 = vrot.lane.b32.xlu1 %v2107_v10, %s1956_s27  ;;  %v574_v29 = vrot.slane %v572_v25, 1 }
  0x36   : > { %898 = vrot.lane.b32.xlu0 %v2114_v13, %s1956_s27  ;;  %v551_v35 = vsel %vm503_vm1, %v546_v31, %v550_v32  ;;  %v671_v31 = vsel %vm503_vm1, %v666_v26, %v670_v27 }
  0x39   : > { %949 = vrot.lane.b32.xlu1 %v2059_v39, %s1957_s28 }
  0x3a   : > { %933 = vrot.lane.b32.xlu0 %v2065_v46, %s1957_s28 }
  0x3d   : > { %951 = vrot.lane.b32.xlu1 %v2110_v11, %s1957_s28 }
  0x3e   : > { %935 = vrot.lane.b32.xlu0 %v2117_v14, %s1957_s28 }
  0x41   : > { %996 = vrot.lane.b32.xlu1 %v2092_v3, %s1958_s7 }
  0x42   : > { %980 = vrot.lane.b32.xlu0 %v2096_v5, %s1958_s7 }
  0x45   : > { %998 = vrot.lane.b32.xlu1 %v647_v34, %s1958_s7 }
  0x46   : > { %982 = vrot.lane.b32.xlu0 %v551_v35, %s1958_s7 }
  0x49   : > { %1031 = vrot.lane.b32.xlu1 %v2107_v10, %s1959_s10 }
  0x4a   : > { %1015 = vrot.lane.b32.xlu0 %v2114_v13, %s1959_s10 }
  0x4d   : > { %716 = vrot.lane.b32.xlu1 %v2092_v3, %s1954_s25  ;;  %v765_v3 = vrot.slane %v2173_v43, 1 }
  0x4e   : > { %700 = vrot.lane.b32.xlu0 %v2096_v5, %s1954_s25  ;;  %v766_v5 = vrot.slane %v1905_v45, 1  ;;  %v770_v45 = vsel %vm728_vm0, %v768_v36, %v769_v37  ;;  %v771_v36 = vrot.slane %v2280_v56, 1  ;;  %v772_v37 = vrot.slane %v1913_v60, 1 }
  0x50   : > { %v767_v8 = vsel %vm728_vm0, %v765_v3, %v766_v5  ;;  %v579_v3 = vshll.u32 %v2286_v58, 16 }
  0x51   : > { %1033 = vrot.lane.b32.xlu1 %v764_v41, %s1959_s10 }
  0x52   : > { %1017 = vrot.lane.b32.xlu0 %v740_v42, %s1959_s10  ;;  %v581_v16 = vrot.slane %v579_v3, 1  ;;  %v2342_v3 = vld [vmem:[%s2011_s22 + $0xb4] sm:$0xff]  }
  0x55   : > { %718 = vrot.lane.b32.xlu1 %v647_v34, %s1954_s25 }
  0x56   : > { %702 = vrot.lane.b32.xlu0 %v551_v35, %s1954_s25 }
  0x59   : > { %797 = vrot.lane.b32.xlu1 %v2107_v10, %s1953_s24  ;;  %v743_v10 = vsel %vm728_vm0, %v741_v6, %v742_v7  ;;  %v673_v6 = vshrl.u32 %v2280_v56, 16  ;;  %v677_v7 = vrot.slane %v675_v61, 1 }
  0x5a   : > { %781 = vrot.lane.b32.xlu0 %v2114_v13, %s1953_s24  ;;  %v2219_v13 = vld [vmem:[%s2011_s22 + $0x3c] sm:$0xff]  }
  0x5b   : > { %v567_v18 = vshll.u32 %v2219_v13, 16  ;;  %v565_v22 = vshrl.u32 %v2219_v13, 16  ;;  %v744_v40 = vrot.slane %v2219_v13, 1  ;;  %v678_v19 = vor.u32 %v677_v7, %v673_v6 }
  0x5d   : > { %799 = vrot.lane.b32.xlu1 %v764_v41, %s1953_s24  ;;  %v569_v24 = vrot.slane %v567_v18, 1 }
  0x5e   : > { %783 = vrot.lane.b32.xlu0 %v740_v42, %s1953_s24 }
  0x5f   : > { %v570_v28 = vor.u32 %v569_v24, %v565_v22  ;;  %v582_v22 = vor.u32 %v581_v16, %v577_v15 }
  0x61   : > { %834 = vrot.lane.b32.xlu1 %v2110_v11, %s1952_s23  ;;  %v575_v33 = vsel %vm503_vm1, %v570_v28, %v574_v29 }
  0x62   : > { %818 = vrot.lane.b32.xlu0 %v2117_v14, %s1952_s23 }
  0x65   : > { %836 = vrot.lane.b32.xlu1 %v2173_v43, %s1952_s23 }
  0x66   : > { %820 = vrot.lane.b32.xlu0 %v2178_v44, %s1952_s23 }
  0x69   : > { %881 = vrot.lane.b32.xlu1 %v647_v34, %s1955_s26 }
  0x6a   : > { %865 = vrot.lane.b32.xlu0 %v551_v35, %s1955_s26 }
  0x6d   : > { %883 = vrot.lane.b32.xlu1 %v659_v62, %s1955_s26 }
  0x6e   : > { %867 = vrot.lane.b32.xlu0 %v563_v63, %s1955_s26 }
  0x71   : > { %916 = vrot.lane.b32.xlu1 %v764_v41, %s1956_s27  ;;  %v745_v41 = vrot.slane %v1910_v17, 1 }
  0x72   : > { %900 = vrot.lane.b32.xlu0 %v740_v42, %s1956_s27 }
  0x73   : > { %v2265_v49 = vsel %vm728_vm0, %v744_v40, %v745_v41 }
  0x75   : > { %918 = vrot.lane.b32.xlu1 %v767_v8, %s1956_s27 }
  0x76   : > { %902 = vrot.lane.b32.xlu0 %v743_v10, %s1956_s27 }
  0x79   : > { %953 = vrot.lane.b32.xlu1 %v2173_v43, %s1957_s28 }
  0x7a   : > { %937 = vrot.lane.b32.xlu0 %v2178_v44, %s1957_s28 }
  0x7d   : > { %955 = vrot.lane.b32.xlu1 %v2214_v9, %s1957_s28 }
  0x7e   : > { %939 = vrot.lane.b32.xlu0 %v2219_v13, %s1957_s28 }
  0x81   : > { %1000 = vrot.lane.b32.xlu1 %v659_v62, %s1958_s7 }
  0x82   : > { %984 = vrot.lane.b32.xlu0 %v563_v63, %s1958_s7 }
  0x83   : > { %v2238_v30 = vpop.permute.xlu1 %830 }
  0x84   : > { %v2242_v32 = vpop.permute.xlu0 %814 }
  0x85   : > { %1002 = vrot.lane.b32.xlu1 %v671_v31, %s1958_s7 }
  0x86   : > { %986 = vrot.lane.b32.xlu0 %v575_v33, %s1958_s7 }
  0x87   : > { %v2247_v34 = vpop.permute.xlu1 %793 }
  0x88   : > { %v2249_v35 = vpop.permute.xlu0 %777 }
  0x89   : > { %1035 = vrot.lane.b32.xlu1 %v767_v8, %s1959_s10 }
  0x8a   : > { %1019 = vrot.lane.b32.xlu0 %v743_v10, %s1959_s10 }
  0x8b   : > { %v2254_v38 = vpop.permute.xlu1 %795 }
  0x8c   : > { %v2257_v42 = vpop.permute.xlu0 %779 }
  0x8d   : > { %720 = vrot.lane.b32.xlu1 %v659_v62, %s1954_s25 }
  0x8e   : > { %704 = vrot.lane.b32.xlu0 %v563_v63, %s1954_s25  ;;  %v1914_v63 = vld [vmem:[%s2011_s22 + $0x50] ss:$0 sps:$4 sm:$0x11]  }
  0x8f   : > { %v2262_v47 = vpop.permute.xlu1 %698  ;;  %v584_v17 = vshll.u32 %v1914_v63, 16  ;;  %v748_v40 = vrot.slane %v1914_v63, 1 }
  0x90   : > { %v697_v50 = vpop.permute.xlu0 %696 }
  0x91   : > { %1037 = vrot.lane.b32.xlu1 %v770_v45, %s1959_s10  ;;  %v586_v24 = vrot.slane %v584_v17, 1  ;;  %v1049_v6 = vsel %vm1047_vm3, %v2028_v4, %v697_v50 }
  0x92   : > { %1021 = vrot.lane.b32.xlu0 %v2265_v49, %s1959_s10  ;;  %v1082_v4 = vsel %vm1080_vm4, %v1049_v6, %v2249_v35  ;;  %v2371_v35 = vld [vmem:[%s2011_s22 + $0x5c] ss:$0 sps:$4 sm:$0x11]  }
  0x93   : > { %v2270_v52 = vpop.permute.xlu1 %714  ;;  %v2323_v28 = vsel %vm503_vm1, %v582_v22, %v586_v24  ;;  %v685_v22 = vshrl.u32 %v2342_v3, 16 }
  0x94   : > { %v713_v53 = vpop.permute.xlu0 %712 }
  0x95   : > { %722 = vrot.lane.b32.xlu1 %v671_v31, %s1954_s25  ;;  %v1065_v41 = vsel %vm1047_vm3, %v2024_v2, %v713_v53 }
  0x96   : > { %706 = vrot.lane.b32.xlu0 %v575_v33, %s1954_s25  ;;  %v1098_v53 = vsel %vm1080_vm4, %v1065_v41, %v2247_v34  ;;  %v687_v34 = vshll.u32 %v2342_v3, 16 }
  0x97   : > { %v2274_v54 = vpop.permute.xlu1 %832  ;;  %v1131_v50 = vsel %vm1113_vm6, %v1098_v53, %v2238_v30  ;;  %v596_v53 = vshll.u32 %v2371_v35, 16 }
  0x98   : > { %v2276_v55 = vpop.permute.xlu0 %816 }
  0x99   : > { %801 = vrot.lane.b32.xlu1 %v767_v8, %s1953_s24  ;;  %v680_v8 = vshll.u32 %v1913_v60, 16  ;;  %v2339_v60 = vsel %vm728_vm0, %v771_v36, %v772_v37  ;;  %v689_v36 = vrot.slane %v687_v34, 1 }
  0x9a   : > { %785 = vrot.lane.b32.xlu0 %v743_v10, %s1953_s24 }
  0x9b   : > { %v2283_v57 = vpop.permute.xlu1 %877  ;;  %v682_v20 = vrot.slane %v680_v8, 1 }
  0x9c   : > { %v2288_v59 = vpop.permute.xlu0 %861  ;;  %v1164_v16 = vsel %vm1146_vm5, %v1131_v50, %v2283_v57 }
  0x9d   : > { %803 = vrot.lane.b32.xlu1 %v770_v45, %s1953_s24  ;;  %v2319_v26 = vsel %vm503_vm1, %v678_v19, %v682_v20  ;;  %v1115_v19 = vsel %vm1113_vm6, %v1082_v4, %v2242_v32  ;;  %v1067_v32 = vsel %vm1047_vm3, %v2014_v0, %v2270_v52  ;;  %v1051_v0 = vsel %vm1047_vm3, %v2017_v1, %v2262_v47 }
  0x9e   : > { %787 = vrot.lane.b32.xlu0 %v2265_v49, %s1953_s24  ;;  %v1148_v57 = vsel %vm1146_vm5, %v1115_v19, %v2288_v59  ;;  %v690_v4 = vor.u32 %v689_v36, %v685_v22  ;;  %v1084_v47 = vsel %vm1080_vm4, %v1051_v0, %v2257_v42 }
  0x9f   : > { %v2295_v62 = vpop.permute.xlu1 %879 }
  0xa0   : > { %v2299_v5 = vpop.permute.xlu0 %863 }
  0xa1   : > { %838 = vrot.lane.b32.xlu1 %v2214_v9, %s1952_s23 }
  0xa2   : > { %822 = vrot.lane.b32.xlu0 %v2219_v13, %s1952_s23 }
  0xa3   : > { %v913_v10 = vpop.permute.xlu1 %912 }
  0xa4   : > { %v2307_v18 = vpop.permute.xlu0 %896  ;;  %v1197_v20 = vsel %vm1179_vm7, %v1164_v16, %v913_v10  ;;  %v598_v16 = vrot.slane %v596_v53, 1  ;;  %v1922_v53 = vld [vmem:[%s2197_s14] sm:$0xff]  }
  0xa5   : > { %840 = vrot.lane.b32.xlu1 %v2280_v56, %s1952_s23  ;;  %v1181_v10 = vsel %vm1179_vm7, %v1148_v57, %v2307_v18 }
  0xa6   : > { %824 = vrot.lane.b32.xlu0 %v2286_v58, %s1952_s23 }
  0xa7   : > { %v2313_v21 = vpop.permute.xlu1 %914 }
  0xa8   : > { %v2315_v25 = vpop.permute.xlu0 %898 }
  0xa9   : > { %885 = vrot.lane.b32.xlu1 %v671_v31, %s1955_s26 }
  0xaa   : > { %869 = vrot.lane.b32.xlu0 %v575_v33, %s1955_s26  ;;  %v747_v33 = vrot.slane %v2286_v58, 1 }
  0xab   : > { %v950_v27 = vpop.permute.xlu1 %949 }
  0xac   : > { %v934_v29 = vpop.permute.xlu0 %933  ;;  %v2351_v7 = vsel %vm728_vm0, %v747_v33, %v748_v40  ;;  %v1230_v24 = vsel %vm1212_vm8, %v1197_v20, %v950_v27 }
  0xad   : > { %887 = vrot.lane.b32.xlu1 %v2319_v26, %s1955_s26  ;;  %v1214_v27 = vsel %vm1212_vm8, %v1181_v10, %v934_v29  ;;  %v1100_v29 = vsel %vm1080_vm4, %v1067_v32, %v2254_v38 }
  0xae   : > { %871 = vrot.lane.b32.xlu0 %v2323_v28, %s1955_s26  ;;  %v1133_v50 = vsel %vm1113_vm6, %v1100_v29, %v2274_v54  ;;  %v852_v29 = vshll.u32 %v1922_v53, 16 }
  0xaf   : > { %v2330_v31 = vpop.permute.xlu1 %951  ;;  %v1166_v38 = vsel %vm1146_vm5, %v1133_v50, %v2295_v62 }
  0xb0   : > { %v2335_v61 = vpop.permute.xlu0 %935  ;;  %v1199_v54 = vsel %vm1179_vm7, %v1166_v38, %v2313_v21 }
  0xb1   : > { %920 = vrot.lane.b32.xlu1 %v770_v45, %s1956_s27  ;;  %v2354_v45 = vld [vmem:[%s2011_s22 + $0x54] sm:$0xff]   ;;  %v1232_v42 = vsel %vm1212_vm8, %v1199_v54, %v2330_v31 }
  0xb2   : > { %904 = vrot.lane.b32.xlu0 %v2265_v49, %s1956_s27  ;;  %v2361_v49 = vld [vmem:[%s2011_s22 + $0xbc] ss:$0 sps:$4 sm:$0x11]   ;;  %v591_v17 = vshll.u32 %v2354_v45, 16  ;;  %v589_v59 = vshrl.u32 %v2354_v45, 16  ;;  %v750_v10 = vrot.slane %v2354_v45, 1 }
  0xb3   : > { %v997_v63 = vpop.permute.xlu1 %996  ;;  %v692_v37 = vshll.u32 %v2361_v49, 16 }
  0xb4   : > { %v981_v8 = vpop.permute.xlu0 %980  ;;  %v1263_v33 = vsel %vm1245_vm9, %v1230_v24, %v997_v63  ;;  %v593_v6 = vrot.slane %v591_v17, 1  ;;  %v1117_v17 = vsel %vm1113_vm6, %v1084_v47, %v2276_v55 }
  0xb5   : > { %922 = vrot.lane.b32.xlu1 %v2339_v60, %s1956_s27  ;;  %v1247_v52 = vsel %vm1245_vm9, %v1214_v27, %v981_v8  ;;  %v694_v34 = vrot.slane %v692_v37, 1  ;;  %v1150_v20 = vsel %vm1146_vm5, %v1117_v17, %v2299_v5  ;;  %v775_v37 = vrot.slane %v2361_v49, 1 }
  0xb6   : > { %906 = vrot.lane.b32.xlu0 %v2351_v7, %s1956_s27  ;;  %v594_v8 = vor.u32 %v593_v6, %v589_v59  ;;  %v1183_v22 = vsel %vm1179_vm7, %v1150_v20, %v2315_v25 }
  0xb7   : > { %v999_v15 = vpop.permute.xlu1 %998  ;;  %v695_v62 = vsel %vm503_vm1, %v690_v4, %v694_v34  ;;  %v1216_v57 = vsel %vm1212_vm8, %v1183_v22, %v2335_v61  ;;  %v854_v34 = vrot.slane %v852_v29, 1  ;;  %v893_v22 = vrot.slane %v1922_v53, 1 }
  0xb8   : > { %v983_v30 = vpop.permute.xlu0 %982  ;;  %v1265_v55 = vsel %vm1245_vm9, %v1232_v42, %v999_v15  ;;  %v599_v5 = vsel %vm503_vm1, %v594_v8, %v598_v16 }
  0xb9   : > { %957 = vrot.lane.b32.xlu1 %v2280_v56, %s1957_s28  ;;  %v1249_v31 = vsel %vm1245_vm9, %v1216_v57, %v983_v30  ;;  %v774_v30 = vrot.slane %v2342_v3, 1  ;;  %v2516_v57 = vld [vmem:[%s2197_s14 + $0xc] sm:$0xff]  }
  0xba   : > { %941 = vrot.lane.b32.xlu0 %v2286_v58, %s1957_s28 }
  0xbb   : > { %v1032_v40 = vpop.permute.xlu1 %1031  ;;  %v776_v59 = vsel %vm728_vm0, %v774_v30, %v775_v37  ;;  %v971_v30 = vshll.u32 %v2516_v57, 16 }
  0xbc   : > { %v1296_v41 = vsel %vm1278_vm10, %v1263_v33, %v1032_v40  ;;  %v1016_v18 = vpop.permute.xlu0 %1015  ;;  %v751_v33 = vrot.slane %v2371_v35, 1 }
  0xbd   : > { %959 = vrot.lane.b32.xlu1 %v2342_v3, %s1957_s28  ;;  %1828 = vmatprep.mubr.msk.bf16.mxu1 %vm1338_vm11, %v1296_v41  ;;  %v1280_v63 = vsel %vm1278_vm10, %v1247_v52, %v1016_v18  ;;  %v1923_v18 = vld [vmem:[%s2197_s14 + $0x8] ss:$0 sps:$4 sm:$0x11]  }
  0xbe   : > { %943 = vrot.lane.b32.xlu0 %v2354_v45, %s1957_s28  ;;  %1812 = vmatprep.mubr.msk.bf16.mxu0 %vm1338_vm11, %v1280_v63  ;;  %v752_v27 = vsel %vm728_vm0, %v750_v10, %v751_v33  ;;  %v857_v50 = vshll.u32 %v1923_v18, 16 }
  0xbf   : > { %v2411_v1 = vpop.permute.xlu1 %716 }
  0xc0   : > { %v2421_v19 = vpop.permute.xlu0 %700  ;;  %v859_v8 = vrot.slane %v857_v50, 1 }
  0xc1   : > { %1004 = vrot.lane.b32.xlu1 %v2319_v26, %s1958_s7  ;;  %v1053_v37 = vsel %vm1047_vm3, %v2065_v46, %v2421_v19  ;;  %v969_v46 = vshrl.u32 %v2516_v57, 16 }
  0xc2   : > { %988 = vrot.lane.b32.xlu0 %v2323_v28, %s1958_s7 }
  0xc3   : > { %v1034_v21 = vpop.permute.xlu1 %1033 }
  0xc4   : > { %v1298_v24 = vsel %vm1278_vm10, %v1265_v55, %v1034_v21  ;;  %v1018_v36 = vpop.permute.xlu0 %1017 }
  0xc5   : > { %1006 = vrot.lane.b32.xlu1 %v695_v62, %s1958_s7  ;;  %1829 = vmatmul.mubr.msk.bf16.vlgmr.msra.gmra.mxu1 %vm1338_vm11, %v1298_v24  ;;  %v1282_v25 = vsel %vm1278_vm10, %v1249_v31, %v1018_v36 }
  0xc6   : > { %990 = vrot.lane.b32.xlu0 %v599_v5, %s1958_s7  ;;  %1813 = vmatmul.mubr.msk.bf16.vlgmr.msra.gmra.mxu0 %vm1338_vm11, %v1282_v25  ;;  %v2526_v25 = vld [vmem:[%s2197_s14 + $0x14] ss:$0 sps:$4 sm:$0x11]  }
  0xc7   : > { %v2445_v15 = vpop.permute.xlu1 %718  ;;  %v976_v29 = vshll.u32 %v2526_v25, 16 }
  0xc8   : > { %v2447_v61 = vpop.permute.xlu0 %702 }
  0xc9   : > { %1039 = vrot.lane.b32.xlu1 %v2339_v60, %s1959_s10 }
  0xca   : > { %1023 = vrot.lane.b32.xlu0 %v2351_v7, %s1959_s10 }
  0xcb   : > { %v798_v32 = vpop.permute.xlu1 %797 }
  0xcc   : > { %v2457_v40 = vpop.permute.xlu0 %781 }
  0xcd   : > { %724 = vrot.lane.b32.xlu1 %v2319_v26, %s1954_s25 }
  0xce   : > { %708 = vrot.lane.b32.xlu0 %v2323_v28, %s1954_s25 }
  0xcf   : > { %v2464_v49 = vpop.permute.xlu1 %799 }
  0xd0   : > { %v2467_v41 = vpop.permute.xlu0 %783 }
  0xd1   : > { %1041 = vrot.lane.b32.xlu1 %v776_v59, %s1959_s10 }
  0xd2   : > { %1025 = vrot.lane.b32.xlu0 %v752_v27, %s1959_s10 }
  0xd3   : > { %v835_v35 = vpop.permute.xlu1 %834 }
  0xd4   : > { %v819_v6 = vpop.permute.xlu0 %818 }
  0xd5   : > { %726 = vrot.lane.b32.xlu1 %v695_v62, %s1954_s25 }
  0xd6   : > { %710 = vrot.lane.b32.xlu0 %v599_v5, %s1954_s25 }
  0xd7   : > { %v2473_v26 = vpop.permute.xlu1 %836 }
  0xd8   : > { %v2475_v28 = vpop.permute.xlu0 %820 }
  0xd9   : > { %805 = vrot.lane.b32.xlu1 %v2339_v60, %s1953_s24  ;;  %v850_v60 = vshrl.u32 %v1922_v53, 16 }
  0xda   : > { %789 = vrot.lane.b32.xlu0 %v2351_v7, %s1953_s24 }
  0xdb   : > { %v882_v0 = vpop.permute.xlu1 %881  ;;  %v855_v38 = vor.u32 %v854_v34, %v850_v60  ;;  %v1926_v60 = vld [vmem:[%s2011_s22 + $0x60] sm:$0xff]  }
  0xdc   : > { %v866_v52 = vpop.permute.xlu0 %865 }
  0xdd   : > { %807 = vrot.lane.b32.xlu1 %v776_v59, %s1953_s24  ;;  %v2502_v54 = vsel %vm503_vm1, %v855_v38, %v859_v8 }
  0xde   : > { %791 = vrot.lane.b32.xlu0 %v752_v27, %s1953_s24  ;;  %s2698_s24 = scalar_lea.vmem %s2808_s4, %s1786_s21 }
  0xdf   : > { %v2485_v63 = vpop.permute.xlu1 %883 }
  0xe0   : > { %v2487_v4 = vpop.permute.xlu0 %867 }
  0xe1   : > { %842 = vrot.lane.b32.xlu1 %v2342_v3, %s1952_s23 }
  0xe2   : > { %826 = vrot.lane.b32.xlu0 %v2354_v45, %s1952_s23 }
  0xe3   : > { %v917_v7 = vpop.permute.xlu1 %916 }
  0xe4   : > { %v901_v47 = vpop.permute.xlu0 %900 }
  0xe5   : > { %844 = vrot.lane.b32.xlu1 %v1922_v53, %s1952_s23 }
  0xe6   : > { %828 = vrot.lane.b32.xlu0 %v2024_v2, %s1952_s23  ;;  %v894_v2 = vrot.slane %v1923_v18, 1  ;;  %v973_v18 = vrot.slane %v971_v30, 1  ;;  %v1013_v30 = vrot.slane %v2526_v25, 1 }
  0xe7   : > { %v2496_v16 = vpop.permute.xlu1 %918 }
  0xe8   : > { %v2498_v17 = vpop.permute.xlu0 %902  ;;  %v974_v8 = vor.u32 %v973_v18, %v969_v46 }
  0xe9   : > { %889 = vrot.lane.b32.xlu1 %v695_v62, %s1955_s26  ;;  %v2513_v62 = vsel %vm728_vm0, %v893_v22, %v894_v2 }
  0xea   : > { %873 = vrot.lane.b32.xlu0 %v599_v5, %s1955_s26  ;;  %v1069_v5 = vsel %vm1047_vm3, %v2059_v39, %v2411_v1  ;;  %v1086_v1 = vsel %vm1080_vm4, %v1053_v37, %v2457_v40 }
  0xeb   : > { %v954_v20 = vpop.permute.xlu1 %953  ;;  %v1102_v36 = vsel %vm1080_vm4, %v1069_v5, %v798_v32  ;;  %v1119_v33 = vsel %vm1113_vm6, %v1086_v1, %v819_v6 }
  0xec   : > { %v938_v42 = vpop.permute.xlu0 %937  ;;  %v1135_v10 = vsel %vm1113_vm6, %v1102_v36, %v835_v35  ;;  %v1152_v19 = vsel %vm1146_vm5, %v1119_v33, %v866_v52  ;;  %v1071_v52 = vsel %vm1047_vm3, %v2110_v11, %v2445_v15  ;;  %v1927_v15 = vld [vmem:[%s2011_s22 + $0x6c] sm:$0xff]  }
  0xed   : > { %891 = vrot.lane.b32.xlu1 %v2502_v54, %s1955_s26  ;;  %v1168_v32 = vsel %vm1146_vm5, %v1135_v10, %v882_v0  ;;  %v1185_v40 = vsel %vm1179_vm7, %v1152_v19, %v901_v47  ;;  %v1104_v47 = vsel %vm1080_vm4, %v1071_v52, %v2464_v49 }
  0xee   : > { %875 = vrot.lane.b32.xlu0 %v2075_v51, %s1955_s26  ;;  %v1137_v11 = vsel %vm1113_vm6, %v1104_v47, %v2473_v26 }
  0xef   : > { %v956_v55 = vpop.permute.xlu1 %955  ;;  %v1170_v2 = vsel %vm1146_vm5, %v1137_v11, %v2485_v63 }
  0xf0   : > { %v2509_v21 = vpop.permute.xlu0 %939 }
  0xf1   : > { %924 = vrot.lane.b32.xlu1 %v776_v59, %s1956_s27  ;;  %v1201_v59 = vsel %vm1179_vm7, %v1168_v32, %v917_v7 }
  0xf2   : > { %908 = vrot.lane.b32.xlu0 %v752_v27, %s1956_s27  ;;  %v1234_v35 = vsel %vm1212_vm8, %v1201_v59, %v954_v20  ;;  %v978_v20 = vrot.slane %v976_v29, 1 }
  0xf3   : > { %v1001_v24 = vpop.permute.xlu1 %1000 }
  0xf4   : > { %v985_v31 = vpop.permute.xlu0 %984  ;;  %v1267_v0 = vsel %vm1245_vm9, %v1234_v35, %v1001_v24 }
  0xf5   : > { %926 = vrot.lane.b32.xlu1 %v2513_v62, %s1956_s27 }
  0xf6   : > { %910 = vrot.lane.b32.xlu0 %v2037_v12, %s1956_s27 }
  0xf7   : > { %v1003_v39 = vpop.permute.xlu1 %1002 }
  0xf8   : > { %v987_v27 = vpop.permute.xlu0 %986 }
  0xf9   : > { %961 = vrot.lane.b32.xlu1 %v1922_v53, %s1957_s28  ;;  %v1218_v53 = vsel %vm1212_vm8, %v1185_v40, %v938_v42  ;;  %v1055_v42 = vsel %vm1047_vm3, %v2117_v14, %v2447_v61  ;;  %v1203_v14 = vsel %vm1179_vm7, %v1170_v2, %v2496_v16 }
  0xfa   : > { %945 = vrot.lane.b32.xlu0 %v1926_v60, %s1957_s28  ;;  %v1251_v50 = vsel %vm1245_vm9, %v1218_v53, %v985_v31  ;;  %v1088_v49 = vsel %vm1080_vm4, %v1055_v42, %v2467_v41  ;;  %v1236_v5 = vsel %vm1212_vm8, %v1203_v14, %v956_v55  ;;  %v979_v41 = vsel %vm503_vm1, %v974_v8, %v978_v20 }
  0xfb   : > { %v1036_v6 = vpop.permute.xlu1 %1035  ;;  %v1121_v24 = vsel %vm1113_vm6, %v1088_v49, %v2475_v28  ;;  %v1269_v31 = vsel %vm1245_vm9, %v1236_v5, %v1003_v39  ;;  %v1012_v55 = vrot.slane %v2516_v57, 1 }
  0xfc   : > { %v1300_v34 = vsel %vm1278_vm10, %v1267_v0, %v1036_v6  ;;  %v1020_v7 = vpop.permute.xlu0 %1019  ;;  %v1154_v26 = vsel %vm1146_vm5, %v1121_v24, %v2487_v4 }
  0xfd   : > { %963 = vrot.lane.b32.xlu1 %v2516_v57, %s1957_s28  ;;  %1832 = vmatprep.mubr.msk.bf16.mxu1 %vm1338_vm11, %v1300_v34  ;;  %v1284_v38 = vsel %vm1278_vm10, %v1251_v50, %v1020_v7  ;;  %v1187_v63 = vsel %vm1179_vm7, %v1154_v26, %v2498_v17  ;;  %v1014_v37 = vsel %vm728_vm0, %v1012_v55, %v1013_v30 }
  0xfe   : > { %947 = vrot.lane.b32.xlu0 %v1927_v15, %s1957_s28  ;;  %1816 = vmatprep.mubr.msk.bf16.mxu0 %vm1338_vm11, %v1284_v38  ;;  %v1220_v16 = vsel %vm1212_vm8, %v1187_v63, %v2509_v21 }
  0xff   : > { %v721_v22 = vpop.permute.xlu1 %720  ;;  %v1253_v4 = vsel %vm1245_vm9, %v1220_v16, %v987_v27 }
 0x100   : > { %v705_v61 = vpop.permute.xlu0 %704 }
 0x101   : > { %1008 = vrot.lane.b32.xlu1 %v2502_v54, %s1958_s7  ;;  %v1057_v52 = vsel %vm1047_vm3, %v2178_v44, %v705_v61 }
 0x102   : > { %992 = vrot.lane.b32.xlu0 %v2075_v51, %s1958_s7 }
 0x103   : > { %v1038_v28 = vpop.permute.xlu1 %1037 }
 0x104   : > { %v1302_v54 = vsel %vm1278_vm10, %v1269_v31, %v1038_v28  ;;  %v1022_v36 = vpop.permute.xlu0 %1021 }
 0x105   : > { %1010 = vrot.lane.b32.xlu1 %v979_v41, %s1958_s7  ;;  %1833 = vmatmul.mubr.msk.bf16.gmra.mxu1 %vm1338_vm11, %v1302_v54  ;;  %v1286_v17 = vsel %vm1278_vm10, %v1253_v4, %v1022_v36 }
 0x106   : > { %994 = vrot.lane.b32.xlu0 %v2070_v48, %s1958_s7  ;;  %1817 = vmatmul.mubr.msk.bf16.gmra.mxu0 %vm1338_vm11, %v1286_v17 }
 0x107   : > { %v723_v51 = vpop.permute.xlu1 %722 }
 0x108   : > { %v707_v21 = vpop.permute.xlu0 %706  ;;  %v1075_v24 = vsel %vm1047_vm3, %v2214_v9, %v723_v51 }
 0x109   : > { %1043 = vrot.lane.b32.xlu1 %v2513_v62, %s1959_s10  ;;  %v1059_v41 = vsel %vm1047_vm3, %v2219_v13, %v707_v21 }
 0x10a   : > { %1027 = vrot.lane.b32.xlu0 %v2037_v12, %s1959_s10 }
 0x10b   : > { %v802_v10 = vpop.permute.xlu1 %801 }
 0x10c   : > { %v786_v39 = vpop.permute.xlu0 %785 }
 0x10d   : > { %1045 = vrot.lane.b32.xlu1 %v1014_v37, %s1959_s10  ;;  %v1090_v47 = vsel %vm1080_vm4, %v1057_v52, %v786_v39 }
 0x10e   : > { %1029 = vrot.lane.b32.xlu0 %v2049_v23, %s1959_s10  ;;  %v1073_v23 = vsel %vm1047_vm3, %v2173_v43, %v721_v22 }
 0x10f   : > { %v804_v48 = vpop.permute.xlu1 %803  ;;  %v1106_v34 = vsel %vm1080_vm4, %v1073_v23, %v802_v10 }
 0x110   : > { %v788_v57 = vpop.permute.xlu0 %787  ;;  %v1108_v26 = vsel %vm1080_vm4, %v1075_v24, %v804_v48 }
 0x111   : > { %v1092_v28 = vsel %vm1080_vm4, %v1059_v41, %v788_v57 }
 0x113   : > { %v839_v25 = vpop.permute.xlu1 %838 }
 0x114   : > { %v823_v1 = vpop.permute.xlu0 %822  ;;  %v1139_v50 = vsel %vm1113_vm6, %v1106_v34, %v839_v25 }
 0x115   : > { %v1123_v8 = vsel %vm1113_vm6, %v1090_v47, %v823_v1 }
 0x117   : > { %v841_v32 = vpop.permute.xlu1 %840 }
 0x118   : > { %v825_v33 = vpop.permute.xlu0 %824  ;;  %v1141_v63 = vsel %vm1113_vm6, %v1108_v26, %v841_v32 }
 0x119   : > { %v1125_v16 = vsel %vm1113_vm6, %v1092_v28, %v825_v33 }
 0x11b   : > { %v886_v59 = vpop.permute.xlu1 %885 }
 0x11c   : > { %v870_v62 = vpop.permute.xlu0 %869  ;;  %v1172_v38 = vsel %vm1146_vm5, %v1139_v50, %v886_v59 }
 0x11d   : > { %v1156_v43 = vsel %vm1146_vm5, %v1123_v8, %v870_v62 }
 0x11f   : > { %v888_v27 = vpop.permute.xlu1 %887 }
 0x120   : > { %v872_v46 = vpop.permute.xlu0 %871  ;;  %v1174_v9 = vsel %vm1146_vm5, %v1141_v63, %v888_v27 }
 0x121   : > { %v1158_v36 = vsel %vm1146_vm5, %v1125_v16, %v872_v46 }
 0x123   : > { %v921_v19 = vpop.permute.xlu1 %920 }
 0x124   : > { %v905_v35 = vpop.permute.xlu0 %904  ;;  %v1205_v20 = vsel %vm1179_vm7, %v1172_v38, %v921_v19 }
 0x125   : > { %v1189_v15 = vsel %vm1179_vm7, %v1156_v43, %v905_v35 }
 0x127   : > { %v923_v12 = vpop.permute.xlu1 %922 }
 0x128   : > { %v907_v18 = vpop.permute.xlu0 %906  ;;  %v1207_v54 = vsel %vm1179_vm7, %v1174_v9, %v923_v12 }
 0x129   : > { %v1191_v13 = vsel %vm1179_vm7, %v1158_v36, %v907_v18 }
 0x12b   : > { %v958_v29 = vpop.permute.xlu1 %957 }
 0x12c   : > { %v942_v40 = vpop.permute.xlu0 %941  ;;  %v1238_v11 = vsel %vm1212_vm8, %v1205_v20, %v958_v29 }
 0x12d   : > { %v1222_v49 = vsel %vm1212_vm8, %v1189_v15, %v942_v40 }
 0x12f   : > { %v960_v0 = vpop.permute.xlu1 %959 }
 0x130   : > { %v944_v60 = vpop.permute.xlu0 %943  ;;  %v1240_v17 = vsel %vm1212_vm8, %v1207_v54, %v960_v0 }
 0x131   : > { %v1224_v51 = vsel %vm1212_vm8, %v1191_v13, %v944_v60 }
 0x133   : > { %v1005_v6 = vpop.permute.xlu1 %1004 }
 0x134   : > { %v989_v53 = vpop.permute.xlu0 %988  ;;  %v1271_v44 = vsel %vm1245_vm9, %v1238_v11, %v1005_v6 }
 0x135   : > { %v1255_v14 = vsel %vm1245_vm9, %v1222_v49, %v989_v53 }
 0x137   : > { %v1007_v7 = vpop.permute.xlu1 %1006 }
 0x138   : > { %v991_v42 = vpop.permute.xlu0 %990  ;;  %v1273_v55 = vsel %vm1245_vm9, %v1240_v17, %v1007_v7 }
 0x139   : > { %v1257_v37 = vsel %vm1245_vm9, %v1224_v51, %v991_v42 }
 0x13b   : > { %v1040_v22 = vpop.permute.xlu1 %1039 }
 0x13c   : > { %v1304_v2 = vsel %vm1278_vm10, %v1271_v44, %v1040_v22  ;;  %v1024_v61 = vpop.permute.xlu0 %1023 }
 0x13d   : > { %1836 = vmatprep.mubr.msk.bf16.mxu1 %vm1338_vm11, %v1304_v2  ;;  %v1288_v5 = vsel %vm1278_vm10, %v1255_v14, %v1024_v61 }
 0x13e   : > { %1820 = vmatprep.mubr.msk.bf16.mxu0 %vm1338_vm11, %v1288_v5 }
 0x13f   : > { %v725_v31 = vpop.permute.xlu1 %724 }
 0x140   : > { %v709_v4 = vpop.permute.xlu0 %708  ;;  %v1077_v50 = vsel %vm1047_vm3, %v2280_v56, %v725_v31 }
 0x141   : > { %v1061_v38 = vsel %vm1047_vm3, %v2286_v58, %v709_v4 }
 0x143   : > { %v1042_v30 = vpop.permute.xlu1 %1041 }
 0x144   : > { %v1306_v21 = vsel %vm1278_vm10, %v1273_v55, %v1042_v30  ;;  %v1026_v10 = vpop.permute.xlu0 %1025 }
 0x145   : > { %1837 = vmatmul.mubr.msk.bf16.gmra.mxu1 %vm1338_vm11, %v1306_v21  ;;  %v1290_v39 = vsel %vm1278_vm10, %v1257_v37, %v1026_v10  ;;  %v2691_v10 = vld [vmem:[%s2807_s3] ss:$0 sm:$0xff] }
 0x146   : > { %1821 = vmatmul.mubr.msk.bf16.gmra.mxu0 %vm1338_vm11, %v1290_v39 }
 0x147   : > { %v727_v48 = vpop.permute.xlu1 %726 }
 0x148   : > { %v711_v57 = vpop.permute.xlu0 %710  ;;  %v1079_v11 = vsel %vm1047_vm3, %v2342_v3, %v727_v48 }
 0x149   : > { %v1063_v2 = vsel %vm1047_vm3, %v2354_v45, %v711_v57 }
 0x14b   : > { %v806_v25 = vpop.permute.xlu1 %805 }
 0x14c   : > { %v790_v1 = vpop.permute.xlu0 %789  ;;  %v1110_v47 = vsel %vm1080_vm4, %v1077_v50, %v806_v25 }
 0x14d   : > { %v1094_v42 = vsel %vm1080_vm4, %v1061_v38, %v790_v1 }
 0x14f   : > { %v808_v32 = vpop.permute.xlu1 %807 }
 0x150   : > { %v792_v33 = vpop.permute.xlu0 %791  ;;  %v1112_v22 = vsel %vm1080_vm4, %v1079_v11, %v808_v32 }
 0x151   : > { %v1096_v26 = vsel %vm1080_vm4, %v1063_v2, %v792_v33 }
 0x153   : > { %v843_v59 = vpop.permute.xlu1 %842 }
 0x154   : > { %v827_v62 = vpop.permute.xlu0 %826  ;;  %v1143_v8 = vsel %vm1113_vm6, %v1110_v47, %v843_v59 }
 0x155   : > { %v1127_v15 = vsel %vm1113_vm6, %v1094_v42, %v827_v62 }
 0x157   : > { %v845_v27 = vpop.permute.xlu1 %844 }
 0x158   : > { %v829_v46 = vpop.permute.xlu0 %828  ;;  %v1145_v24 = vsel %vm1113_vm6, %v1112_v22, %v845_v27 }
 0x159   : > { %v1129_v31 = vsel %vm1113_vm6, %v1096_v26, %v829_v46 }
 0x15b   : > { %v890_v19 = vpop.permute.xlu1 %889 }
 0x15c   : > { %v874_v35 = vpop.permute.xlu0 %873  ;;  %v1176_v43 = vsel %vm1146_vm5, %v1143_v8, %v890_v19 }
 0x15d   : > { %v1160_v49 = vsel %vm1146_vm5, %v1127_v15, %v874_v35 }
 0x15f   : > { %v892_v12 = vpop.permute.xlu1 %891 }
 0x160   : > { %v876_v18 = vpop.permute.xlu0 %875  ;;  %v1178_v5 = vsel %vm1146_vm5, %v1145_v24, %v892_v12 }
 0x161   : > { %v1162_v16 = vsel %vm1146_vm5, %v1129_v31, %v876_v18 }
 0x163   : > { %v925_v29 = vpop.permute.xlu1 %924 }
 0x164   : > { %v909_v40 = vpop.permute.xlu0 %908  ;;  %v1209_v56 = vsel %vm1179_vm7, %v1176_v43, %v925_v29 }
 0x165   : > { %v1193_v14 = vsel %vm1179_vm7, %v1160_v49, %v909_v40 }
 0x167   : > { %v927_v0 = vpop.permute.xlu1 %926 }
 0x168   : > { %v911_v60 = vpop.permute.xlu0 %910  ;;  %v1211_v28 = vsel %vm1179_vm7, %v1178_v5, %v927_v0 }
 0x169   : > { %v1195_v36 = vsel %vm1179_vm7, %v1162_v16, %v911_v60 }
 0x16b   : > { %v962_v6 = vpop.permute.xlu1 %961 }
 0x16c   : > { %v946_v23 = vpop.permute.xlu0 %945  ;;  %v1242_v58 = vsel %vm1212_vm8, %v1209_v56, %v962_v6 }
 0x16d   : > { %v1226_v41 = vsel %vm1212_vm8, %v1193_v14, %v946_v23 }
 0x16f   : > { %v964_v53 = vpop.permute.xlu1 %963 }
 0x170   : > { %v948_v34 = vpop.permute.xlu0 %947  ;;  %v1244_v54 = vsel %vm1212_vm8, %v1211_v28, %v964_v53 }
 0x171   : > { %v1228_v55 = vsel %vm1212_vm8, %v1195_v36, %v948_v34 }
 0x173   : > { %v1009_v52 = vpop.permute.xlu1 %1008 }
 0x174   : > { %v993_v7 = vpop.permute.xlu0 %992  ;;  %v1275_v3 = vsel %vm1245_vm9, %v1242_v58, %v1009_v52 }
 0x175   : > { %v1259_v45 = vsel %vm1245_vm9, %v1226_v41, %v993_v7 }
 0x177   : > { %v1011_v20 = vpop.permute.xlu1 %1010 }
 0x178   : > { %v995_v44 = vpop.permute.xlu0 %994  ;;  %v1277_v17 = vsel %vm1245_vm9, %v1244_v54, %v1011_v20 }
 0x179   : > { %v1261_v51 = vsel %vm1245_vm9, %v1228_v55, %v995_v44 }
 0x17b   : > { %v1044_v61 = vpop.permute.xlu1 %1043 }
 0x17c   : > { %v1308_v63 = vsel %vm1278_vm10, %v1275_v3, %v1044_v61  ;;  %v1028_v9 = vpop.permute.xlu0 %1027 }
 0x17d   : > { %1840 = vmatprep.mubr.msk.bf16.mxu1 %vm1338_vm11, %v1308_v63  ;;  %v1292_v4 = vsel %vm1278_vm10, %v1259_v45, %v1028_v9 }
 0x17e   : > { %1824 = vmatprep.mubr.msk.bf16.mxu0 %vm1338_vm11, %v1292_v4 }
 0x17f   : > { %v1046_v13 = vpop.permute.xlu1 %1045 }
 0x180   : > { %v1310_v30 = vsel %vm1278_vm10, %v1277_v17, %v1046_v13  ;;  %v1030_v21 = vpop.permute.xlu0 %1029 }
 0x181   : > { %1841 = vmatmul.mubr.msk.bf16.gmra.mxu1 %vm1338_vm11, %v1310_v30  ;;  %v1294_v37 = vsel %vm1278_vm10, %v1261_v51, %v1030_v21 }
 0x182   : > { %1825 = vmatmul.mubr.msk.bf16.gmra.mxu0 %vm1338_vm11, %v1294_v37 }
 0x185   : > { %v1830_v39 = vpop.f32.mrf.mxu1 }
 0x186   : > { %v1482_v48 = vadd.f32 %v1830_v39, %v2691_v10  ;;  %v1814_v57 = vpop.f32.mrf.mxu0 }
 0x187   : > { %v1473_v25 = vpop.f32.mrf.mxu1  ;;  %v1418_v1 = vadd.f32 %v1814_v57, %v2691_v10 }
 0x188   : > { %v1554_v32 = vmax.f32 %v1482_v48, 0.0  ;;  %v1474_v33 = vadd.f32 %v2691_v10, %v1473_v25  ;;  %v1409_v59 = vpop.f32.mrf.mxu0 }
 0x189   : > { %v1831_v62 = vpop.f32.mrf.mxu1  ;;  %v1538_v27 = vmax.f32 %v1418_v1, 0.0  ;;  %v1410_v46 = vadd.f32 %v2691_v10, %v1409_v59 }
 0x18a   : > { %1586 = vst.msk [vmem:[%s2698_s24 + $0x90] sm:$0xff] %vm1047_vm3, %v1554_v32  ;;  %v1552_v19 = vmax.f32 %v1474_v33, 0.0  ;;  %v1485_v35 = vadd.f32 %v1831_v62, %v2691_v10  ;;  %v1815_v12 = vpop.f32.mrf.mxu0 }
 0x18b   : > { %v1476_v18 = vpop.f32.mrf.mxu1  ;;  %1570 = vst.msk [vmem:[%s2698_s24 + $0x10] sm:$0xff] %vm1047_vm3, %v1538_v27  ;;  %v1536_v29 = vmax.f32 %v1410_v46, 0.0  ;;  %v1421_v40 = vadd.f32 %v1815_v12, %v2691_v10 }
 0x18c   : > { %1584 = vst.msk [vmem:[%s2698_s24 + $0x80] sm:$0xff] %vm1047_vm3, %v1552_v19  ;;  %v1555_v0 = vmax.f32 %v1485_v35, 0.0  ;;  %v1477_v60 = vadd.f32 %v2691_v10, %v1476_v18  ;;  %v1412_v6 = vpop.f32.mrf.mxu0 }
 0x18d   : > { %1568 = vst.msk [vmem:[%s2698_s24] sm:$0xff] %vm1047_vm3, %v1536_v29  ;;  %v1539_v23 = vmax.f32 %v1421_v40, 0.0  ;;  %v1413_v53 = vadd.f32 %v2691_v10, %v1412_v6 }
 0x18e   : > { %1587 = vst.msk [vmem:[%s2698_s24 + $0x98] sm:$0xff] %vm1047_vm3, %v1555_v0  ;;  %v1553_v34 = vmax.f32 %v1477_v60, 0.0 }
 0x18f   : > { %1571 = vst.msk [vmem:[%s2698_s24 + $0x18] sm:$0xff] %vm1047_vm3, %v1539_v23  ;;  %v1537_v52 = vmax.f32 %v1413_v53, 0.0 }
 0x190   : > { %1585 = vst.msk [vmem:[%s2698_s24 + $0x88] sm:$0xff] %vm1047_vm3, %v1553_v34 }
 0x191   : > { %1569 = vst.msk [vmem:[%s2698_s24 + $0x8] sm:$0xff] %vm1047_vm3, %v1537_v52 }
 0x1c5   : > { %v1834_v50 = vpop.f32.mrf.mxu1 }
 0x1c6   : > { %v1498_v7 = vadd.f32 %v1834_v50, %v2691_v10  ;;  %v1818_v47 = vpop.f32.mrf.mxu0 }
 0x1c7   : > { %v1489_v38 = vpop.f32.mrf.mxu1  ;;  %v1434_v8 = vadd.f32 %v1818_v47, %v2691_v10 }
 0x1c8   : > { %v1558_v20 = vmax.f32 %v1498_v7, 0.0  ;;  %v1490_v42 = vadd.f32 %v2691_v10, %v1489_v38  ;;  %v1425_v43 = vpop.f32.mrf.mxu0 }
 0x1c9   : > { %v1835_v11 = vpop.f32.mrf.mxu1  ;;  %v1542_v15 = vmax.f32 %v1434_v8, 0.0  ;;  %v1426_v56 = vadd.f32 %v2691_v10, %v1425_v43 }
 0x1ca   : > { %1590 = vst.msk [vmem:[%s2698_s24 + $0xb0] sm:$0xff] %vm1047_vm3, %v1558_v20  ;;  %v1556_v44 = vmax.f32 %v1490_v42, 0.0  ;;  %v1501_v22 = vadd.f32 %v1835_v11, %v2691_v10  ;;  %v1819_v49 = vpop.f32.mrf.mxu0 }
 0x1cb   : > { %v1492_v58 = vpop.f32.mrf.mxu1  ;;  %1574 = vst.msk [vmem:[%s2698_s24 + $0x30] sm:$0xff] %vm1047_vm3, %v1542_v15  ;;  %v1540_v2 = vmax.f32 %v1426_v56, 0.0  ;;  %v1437_v24 = vadd.f32 %v1819_v49, %v2691_v10 }
 0x1cc   : > { %1588 = vst.msk [vmem:[%s2698_s24 + $0xa0] sm:$0xff] %vm1047_vm3, %v1556_v44  ;;  %v1559_v14 = vmax.f32 %v1501_v22, 0.0  ;;  %v1493_v3 = vadd.f32 %v2691_v10, %v1492_v58  ;;  %v1428_v61 = vpop.f32.mrf.mxu0 }
 0x1cd   : > { %1572 = vst.msk [vmem:[%s2698_s24 + $0x20] sm:$0xff] %vm1047_vm3, %v1540_v2  ;;  %v1543_v26 = vmax.f32 %v1437_v24, 0.0  ;;  %v1429_v5 = vadd.f32 %v2691_v10, %v1428_v61 }
 0x1ce   : > { %1591 = vst.msk [vmem:[%s2698_s24 + $0xb8] sm:$0xff] %vm1047_vm3, %v1559_v14  ;;  %v1557_v41 = vmax.f32 %v1493_v3, 0.0 }
 0x1cf   : > { %1575 = vst.msk [vmem:[%s2698_s24 + $0x38] sm:$0xff] %vm1047_vm3, %v1543_v26  ;;  %v1541_v63 = vmax.f32 %v1429_v5, 0.0 }
 0x1d0   : > { %1589 = vst.msk [vmem:[%s2698_s24 + $0xa8] sm:$0xff] %vm1047_vm3, %v1557_v41 }
 0x1d1   : > { %1573 = vst.msk [vmem:[%s2698_s24 + $0x28] sm:$0xff] %vm1047_vm3, %v1541_v63 }
 0x205   : > { %v1838_v31 = vpop.f32.mrf.mxu1 }
 0x206   : > { %v1514_v28 = vadd.f32 %v1838_v31, %v2691_v10  ;;  %v1822_v45 = vpop.f32.mrf.mxu0 }
 0x207   : > { %v1505_v9 = vpop.f32.mrf.mxu1  ;;  %v1450_v16 = vadd.f32 %v1822_v45, %v2691_v10 }
 0x208   : > { %v1562_v54 = vmax.f32 %v1514_v28, 0.0  ;;  %v1506_v4 = vadd.f32 %v2691_v10, %v1505_v9  ;;  %v1441_v36 = vpop.f32.mrf.mxu0 }
 0x209   : > { %v1839_v17 = vpop.f32.mrf.mxu1  ;;  %v1546_v13 = vmax.f32 %v1450_v16, 0.0  ;;  %v1442_v55 = vadd.f32 %v2691_v10, %v1441_v36 }
 0x20a   : > { %1594 = vst.msk [vmem:[%s2698_s24 + $0xd0] sm:$0xff] %vm1047_vm3, %v1562_v54  ;;  %v1560_v30 = vmax.f32 %v1506_v4, 0.0  ;;  %v1517_v51 = vadd.f32 %v1839_v17, %v2691_v10  ;;  %v1823_v21 = vpop.f32.mrf.mxu0 }
 0x20b   : > { %v1508_v37 = vpop.f32.mrf.mxu1  ;;  %1578 = vst.msk [vmem:[%s2698_s24 + $0x50] sm:$0xff] %vm1047_vm3, %v1546_v13  ;;  %v1544_v39 = vmax.f32 %v1442_v55, 0.0  ;;  %v1453_v48 = vadd.f32 %v1823_v21, %v2691_v10 }
 0x20c   : > { %1592 = vst.msk [vmem:[%s2698_s24 + $0xc0] sm:$0xff] %vm1047_vm3, %v1560_v30  ;;  %v1563_v57 = vmax.f32 %v1517_v51, 0.0  ;;  %v1509_v25 = vadd.f32 %v2691_v10, %v1508_v37  ;;  %v1444_v1 = vpop.f32.mrf.mxu0 }
 0x20d   : > { %1576 = vst.msk [vmem:[%s2698_s24 + $0x40] sm:$0xff] %vm1047_vm3, %v1544_v39  ;;  %v1547_v32 = vmax.f32 %v1453_v48, 0.0  ;;  %v1445_v33 = vadd.f32 %v2691_v10, %v1444_v1 }
 0x20e   : > { %1595 = vst.msk [vmem:[%s2698_s24 + $0xd8] sm:$0xff] %vm1047_vm3, %v1563_v57  ;;  %v1561_v59 = vmax.f32 %v1509_v25, 0.0 }
 0x20f   : > { %1579 = vst.msk [vmem:[%s2698_s24 + $0x58] sm:$0xff] %vm1047_vm3, %v1547_v32  ;;  %v1545_v62 = vmax.f32 %v1445_v33, 0.0 }
 0x210   : > { %1593 = vst.msk [vmem:[%s2698_s24 + $0xc8] sm:$0xff] %vm1047_vm3, %v1561_v59 }
 0x211   : > { %1577 = vst.msk [vmem:[%s2698_s24 + $0x48] sm:$0xff] %vm1047_vm3, %v1545_v62 }
 0x241   : > { %v1842_v27 = vpop.f32.mrf.mxu1 }
 0x242   : > { %v1530_v46 = vadd.f32 %v1842_v27, %v2691_v10  ;;  %v1826_v19 = vpop.f32.mrf.mxu0 }
 0x243   : > { %v1521_v35 = vpop.f32.mrf.mxu1  ;;  %v1466_v12 = vadd.f32 %v1826_v19, %v2691_v10 }
 0x244   : > { %v1566_v18 = vmax.f32 %v1530_v46, 0.0  ;;  %v1522_v29 = vadd.f32 %v2691_v10, %v1521_v35  ;;  %v1457_v40 = vpop.f32.mrf.mxu0 }
 0x245   : > { %v1843_v0 = vpop.f32.mrf.mxu1  ;;  %v1550_v60 = vmax.f32 %v1466_v12, 0.0  ;;  %v1458_v6 = vadd.f32 %v2691_v10, %v1457_v40 }
 0x246   : > { %1598 = vst.msk [vmem:[%s2698_s24 + $0xf0] sm:$0xff] %vm1047_vm3, %v1566_v18  ;;  %v1564_v23 = vmax.f32 %v1522_v29, 0.0  ;;  %v1533_v53 = vadd.f32 %v1843_v0, %v2691_v10  ;;  %v1827_v34 = vpop.f32.mrf.mxu0 }
 0x247   : > { %v1524_v52 = vpop.f32.mrf.mxu1  ;;  %1582 = vst.msk [vmem:[%s2698_s24 + $0x70] sm:$0xff] %vm1047_vm3, %v1550_v60  ;;  %v1548_v50 = vmax.f32 %v1458_v6, 0.0  ;;  %v1469_v7 = vadd.f32 %v1827_v34, %v2691_v10 }
 0x248   : > { %1596 = vst.msk [vmem:[%s2698_s24 + $0xe0] sm:$0xff] %vm1047_vm3, %v1564_v23  ;;  %v1567_v47 = vmax.f32 %v1533_v53, 0.0  ;;  %v1525_v38 = vadd.f32 %v2691_v10, %v1524_v52  ;;  %v1460_v8 = vpop.f32.mrf.mxu0 }
 0x249   : > { %1580 = vst.msk [vmem:[%s2698_s24 + $0x60] sm:$0xff] %vm1047_vm3, %v1548_v50  ;;  %v1551_v20 = vmax.f32 %v1469_v7, 0.0  ;;  %v1461_v42 = vadd.f32 %v2691_v10, %v1460_v8 }
 0x24a   : > { %1599 = vst.msk [vmem:[%s2698_s24 + $0xf8] sm:$0xff] %vm1047_vm3, %v1567_v47  ;;  %v1565_v43 = vmax.f32 %v1525_v38, 0.0 }
 0x24b   : > { %1583 = vst.msk [vmem:[%s2698_s24 + $0x78] sm:$0xff] %vm1047_vm3, %v1551_v20  ;;  %v1549_v11 = vmax.f32 %v1461_v42, 0.0 }
 0x24c   : > { %1597 = vst.msk [vmem:[%s2698_s24 + $0xe8] sm:$0xff] %vm1047_vm3, %v1565_v43 }
 0x24d   : > { %1581 = vst.msk [vmem:[%s2698_s24 + $0x68] sm:$0xff] %vm1047_vm3, %v1549_v11 }
 0x24e PF: > { %s14_s17 = sadd.s32 1, %s1950_s17   ;;  %s2809_s15 = smov %s1946_s16 }
 0x24f   : > { %p11_p5 = scmp.ge.s32.totalorder %s14_s17, 4   ;;  %s2810_s16 = smov %s2812_s18 }
 0x251   :  { %13 = sbr.rel (!%p11_p5) target bundleno = 2 (0x2), region = 69 }

// kernel: up_block_forward.4
= control target key start
LH: loop header
LB: loop body
LE: loop exit
PB: predicated region body
PF: predicated region fallthrough
CT: control target
= control target key end

     0   :  { %s3853_s21 = smov 0   ;;  %s3855_s22 = smov 0   ;;  %s6072_s0 = inlined_call_operand.vmem [shape: bf16[2,24,18,4], index: 0, kind: input, shape index: {}, may-alias: {0,1}]   ;;  %s6073_s1 = inlined_call_operand.vmem [shape: bf16[2,24,18,4], index: 1, kind: input, shape index: {}, may-alias: {0,1}]   ;;  %s6074_s2 = inlined_call_operand.vmem [shape: bf16[2,24,18,4], index: 2, kind: input, shape index: {}, may-alias: {2,3}]   ;;  %s6075_s3 = inlined_call_operand.vmem [shape: bf16[2,24,18,4], index: 3, kind: input, shape index: {}, may-alias: {2,3}]   ;;  %s6076_s4 = inlined_call_operand.vmem [shape: bf16[72,4], index: 4, kind: input, shape index: {}]   ;;  %s6077_s5 = inlined_call_operand.vmem [shape: f32[1,4], index: 5, kind: input, shape index: {}]   ;;  %s6078_s6 = inlined_call_operand.vmem [shape: bf16[2,16,16,4], index: 6, kind: output, shape index: {}]  }
   0x1   :  { %s3857_s23 = smov 0  }
   0x2 LB: > { %s28_s24 = sadd.s32 1, %s3796_s22  ;;  %p3384_p0 = scmp.ge.s32.totalorder %s3800_s23, 1  ;;  %s3800_s23 = sphi %s3857_s23, %s16_s23   ;;  %s3796_s22 = sphi %s3855_s22, %s6300_s22   ;;  %s3792_s21 = sphi %s3853_s21, %s6299_s21  }
   0x3   : > { %p30_p1 = scmp.ge.s32.totalorder %s28_s24, 2  ;;  %p324_p2 = scmp.lt.s32.totalorder %s3800_s23, 3 }
   0x5   : > { %s6302_s24 = smov (%p30_p1, %s28_s24), 0  ;;  %p325_p3 = pnand %p3384_p0, %p324_p2 }
   0x7   : > { %328 = sbr.rel (%p325_p3) target bundleno = 921 (0x399), region = 44 }
   0xc   : > { %p414_p4 = scmp.lt.s32.totalorder %s3792_s21, 1  ;;  %vm6112_vm0 = vsmask.f32 7424  ;;  %s3802_s30 = smov 4   ;;  %vm6113_vm1 = vcmask 1046528   ;;  %vm1892_vm2 = vcmask 31744  }
   0xd   : > { %s3803_s13 = smov 8   ;;  %s3804_s14 = smov 12   ;;  %vm1925_vm3 = vcmask 64512   ;;  %vm1958_vm4 = vcmask 97280   ;;  %vm1991_vm5 = vcmask 130048   ;;  %vm2024_vm6 = vcmask 162816  }
   0xe   : > { %s6304_s21 = smov (!%p414_p4, %s3792_s21), 1  ;;  %s3805_s18 = smov 16   ;;  %vm2057_vm7 = vcmask 195584   ;;  %vm2863_vm8 = vcmask 1043456   ;;  %vm6114_vm9 = vcmask 228352   ;;  %vm2123_vm10 = vcmask 261120  }
   0xf   : > { %s3874_s25 = smul.u32 288, %s6304_s21  ;;  %s3806_s19 = smov 20   ;;  %vm2156_vm11 = vcmask 293888   ;;  %vm2189_vm12 = vcmask 326656   ;;  %vm6115_vm13 = vcmask 359424   ;;  %vm2255_vm14 = vcmask 392192  }
  0x10   : > { %s3807_s20 = smov 24   ;;  %s3809_s26 = smov 32   ;;  %vm2288_vm15 = vcmask 424960  }
  0x11   : > { %s3880_s28 = scalar_lea.vmem %s6072_s0, %s3874_s25  ;;  %s3520_s29 = sadd.s32 192, %s3874_s25 }
  0x12   : > { %v3883_v0 = vld [vmem:[%s3880_s28 + $0x18] sm:$0xff]   ;;  %v3886_v1 = vld [vmem:[%s3880_s28 + $0x20] ss:$0 sps:$4 sm:$0x11]   ;;  %v3902_v12 = vld [vmem:[%s3880_s28 + $0x24] sm:$0xff]   ;;  %s4093_s9 = scalar_lea.vmem %s6073_s1, %s3520_s29  ;;  %s4113_s12 = scalar_lea.vmem %s6075_s3, %s3520_s29 }
  0x13   : > { %v3889_v2 = vld [vmem:[%s3880_s28] sm:$0xff]   ;;  %v754_v3 = vshrl.u32 %v3883_v0, 16  ;;  %v756_v4 = vshll.u32 %v3883_v0, 16  ;;  %v761_v5 = vshll.u32 %v3886_v1, 16  ;;  %v766_v17 = vshrl.u32 %v3902_v12, 16  ;;  %v3910_v19 = vld [vmem:[%s3880_s28 + $0xc] sm:$0xff]   ;;  %s4242_s17 = scalar_lea.vmem %s6074_s2, %s3874_s25 }
  0x14   : > { %v3896_v6 = vld [vmem:[%s3880_s28 + $0x8] ss:$0 sps:$4 sm:$0x11]   ;;  %v730_v7 = vshrl.u32 %v3889_v2, 16  ;;  %v732_v8 = vshll.u32 %v3889_v2, 16  ;;  %v768_v18 = vshll.u32 %v3902_v12, 16 }
  0x15   : > { %v758_v9 = vrot.slane %v756_v4, 1  ;;  %v763_v10 = vrot.slane %v761_v5, 1  ;;  %v737_v11 = vshll.u32 %v3896_v6, 16  ;;  %v3905_v14 = vld [vmem:[%s3880_s28 + $0x2c] ss:$0 sps:$4 sm:$0x11]  }
  0x16   : > { %v734_v13 = vrot.slane %v732_v8, 1  ;;  %v773_v21 = vshll.u32 %v3905_v14, 16  ;;  %v3914_v22 = vld [vmem:[%s3880_s28 + $0x14] ss:$0 sps:$4 sm:$0x11]   ;;  %v770_v24 = vrot.slane %v768_v18, 1 }
  0x17   : > { %v759_v15 = vor.u32 %v758_v9, %v754_v3  ;;  %v739_v16 = vrot.slane %v737_v11, 1  ;;  %v742_v25 = vshrl.u32 %v3910_v19, 16  ;;  %v744_v26 = vshll.u32 %v3910_v19, 16  ;;  %v3922_v27 = vld [vmem:[%s3880_s28 + $0x3c] sm:$0xff]   ;;  %v3935_v37 = vld [vmem:[%s3880_s28 + $0x30] sm:$0xff]   ;;  %v3955_v49 = vld [vmem:[%s3880_s28 + $0x48] sm:$0xff]  }
  0x18   : > { %v735_v20 = vor.u32 %v734_v13, %v730_v7  ;;  %v775_v29 = vrot.slane %v773_v21, 1  ;;  %v749_v30 = vshll.u32 %v3914_v22, 16  ;;  %v771_v31 = vor.u32 %v770_v24, %v766_v17  ;;  %v3930_v33 = vld [vmem:[%s3880_s28 + $0x44] ss:$0 sps:$4 sm:$0x11]   ;;  %v3949_v45 = vld [vmem:[%s3880_s28 + $0x54] sm:$0xff]  }
  0x19   : > { %v3917_v23 = vsel %vm6112_vm0, %v759_v15, %v763_v10  ;;  %v746_v32 = vrot.slane %v744_v26, 1  ;;  %v790_v34 = vshrl.u32 %v3922_v27, 16  ;;  %v792_v35 = vshll.u32 %v3922_v27, 16  ;;  %v3944_v42 = vld [vmem:[%s3880_s28 + $0x38] ss:$0 sps:$4 sm:$0x11]  }
  0x1a   : > { %925 = vrot.lane.b32.xlu1 %v3917_v23, %s3802_s30  ;;  %v740_v28 = vsel %vm6112_vm0, %v735_v20, %v739_v16  ;;  %v751_v36 = vrot.slane %v749_v30, 1  ;;  %v3938_v38 = vsel %vm6112_vm0, %v771_v31, %v775_v29  ;;  %v797_v41 = vshll.u32 %v3930_v33, 16  ;;  %v3961_v52 = vld [vmem:[%s3880_s28 + $0x5c] ss:$0 sps:$4 sm:$0x11]   ;;  %v3974_v61 = vld [vmem:[%s3880_s28 + $0x6c] sm:$0xff]  }
  0x1b   : > { %921 = vrot.lane.b32.xlu0 %v740_v28, %s3802_s30  ;;  %v747_v39 = vor.u32 %v746_v32, %v742_v25  ;;  %v794_v40 = vrot.slane %v792_v35, 1  ;;  %v778_v43 = vshrl.u32 %v3935_v37, 16  ;;  %v780_v44 = vshll.u32 %v3935_v37, 16  ;;  %v3977_v63 = vld [vmem:[%s3880_s28 + $0x50] ss:$0 sps:$4 sm:$0x11]  }
  0x1c   : > { %v799_v48 = vrot.slane %v797_v41, 1  ;;  %v785_v51 = vshll.u32 %v3944_v42, 16  ;;  %v814_v53 = vshrl.u32 %v3949_v45, 16  ;;  %v816_v55 = vshll.u32 %v3949_v45, 16  ;;  %v3995_v20 = vld [vmem:[%s3880_s28 + $0x60] sm:$0xff]   ;;  %s3808_s25 = smov 28  }
  0x1d   : > { %v3952_v46 = vsel %vm6112_vm0, %v747_v39, %v751_v36  ;;  %v795_v47 = vor.u32 %v794_v40, %v790_v34  ;;  %v782_v50 = vrot.slane %v780_v44, 1  ;;  %v802_v56 = vshrl.u32 %v3955_v49, 16  ;;  %v3986_v9 = vld [vmem:[%s3880_s28 + $0x74] ss:$0 sps:$4 sm:$0x11]   ;;  %v4003_v24 = vld [vmem:[%s3880_s28 + $0x84] sm:$0xff]  }
  0x1e   : > { %927 = vrot.lane.b32.xlu1 %v3938_v38, %s3802_s30  ;;  %v787_v58 = vrot.slane %v785_v51, 1  ;;  %v821_v59 = vshll.u32 %v3961_v52, 16  ;;  %v804_v60 = vshll.u32 %v3955_v49, 16  ;;  %v818_v62 = vrot.slane %v816_v55, 1  ;;  %v4022_v39 = vld [vmem:[%s3880_s28 + $0x78] sm:$0xff]   ;;  %s3810_s27 = smov 36  }
  0x1f   : > { %923 = vrot.lane.b32.xlu0 %v3952_v46, %s3802_s30  ;;  %v3965_v54 = vsel %vm6112_vm0, %v795_v47, %v799_v48  ;;  %v783_v57 = vor.u32 %v782_v50, %v778_v43  ;;  %v809_v8 = vshll.u32 %v3977_v63, 16  ;;  %v838_v10 = vshrl.u32 %v3974_v61, 16  ;;  %v4000_v21 = vld [vmem:[%s3880_s28 + $0x68] ss:$0 sps:$4 sm:$0x11]   ;;  %v4033_v51 = vld [vmem:[%s3880_s28 + $0x9c] sm:$0xff]  }
  0x20   : > { %v823_v4 = vrot.slane %v821_v59, 1  ;;  %v806_v5 = vrot.slane %v804_v60, 1  ;;  %v819_v7 = vor.u32 %v818_v62, %v814_v53  ;;  %v840_v11 = vshll.u32 %v3974_v61, 16  ;;  %v4014_v32 = vld [vmem:[%s3880_s28 + $0x8c] ss:$0 sps:$4 sm:$0x11]  }
  0x21   : > { %v3980_v3 = vsel %vm6112_vm0, %v783_v57, %v787_v58  ;;  %v811_v16 = vrot.slane %v809_v8, 1  ;;  %v845_v18 = vshll.u32 %v3986_v9, 16  ;;  %v826_v29 = vshrl.u32 %v3995_v20, 16  ;;  %v4028_v44 = vld [vmem:[%s3880_s28 + $0x80] ss:$0 sps:$4 sm:$0x11]  }
  0x22   : > { %931 = vrot.lane.b32.xlu1 %v3965_v54, %s3802_s30  ;;  %v807_v13 = vor.u32 %v806_v5, %v802_v56  ;;  %v3991_v15 = vsel %vm6112_vm0, %v819_v7, %v823_v4  ;;  %v842_v17 = vrot.slane %v840_v11, 1  ;;  %v828_v30 = vshll.u32 %v3995_v20, 16  ;;  %v4037_v59 = vld [vmem:[%s3880_s28 + $0xa4] ss:$0 sps:$4 sm:$0x11]   ;;  %v4045_v7 = vld [vmem:[%s3880_s28 + $0x90] sm:$0xff]  }
  0x23   : > { %929 = vrot.lane.b32.xlu0 %v3980_v3, %s3802_s30  ;;  %v847_v28 = vrot.slane %v845_v18, 1  ;;  %v833_v31 = vshll.u32 %v4000_v21, 16  ;;  %v862_v34 = vshrl.u32 %v4003_v24, 16  ;;  %v864_v36 = vshll.u32 %v4003_v24, 16  ;;  %s3811_s29 = smov 40   ;;  %s3813_s7 = smov 48  }
  0x24   : > { %v4006_v25 = vsel %vm6112_vm0, %v807_v13, %v811_v16  ;;  %v843_v26 = vor.u32 %v842_v17, %v838_v10  ;;  %v830_v40 = vrot.slane %v828_v30, 1  ;;  %v869_v43 = vshll.u32 %v4014_v32, 16  ;;  %v4056_v16 = vld [vmem:[%s3880_s28 + $0x98] ss:$0 sps:$4 sm:$0x11]   ;;  %s3814_s8 = smov 52  }
  0x25   : > { %v835_v41 = vrot.slane %v833_v31, 1  ;;  %v866_v47 = vrot.slane %v864_v36, 1  ;;  %v850_v48 = vshrl.u32 %v4022_v39, 16  ;;  %v852_v50 = vshll.u32 %v4022_v39, 16  ;;  %v4067_v31 = vld [vmem:[%s3880_s28 + $0xa8] sm:$0xff]   ;;  %s3815_s10 = smov 56  }
  0x26   : > { %935 = vrot.lane.b32.xlu1 %v3991_v15, %s3802_s30  ;;  %v4018_v35 = vsel %vm6112_vm0, %v843_v26, %v847_v28  ;;  %v831_v53 = vor.u32 %v830_v40, %v826_v29  ;;  %v871_v55 = vrot.slane %v869_v43, 1  ;;  %v857_v56 = vshll.u32 %v4028_v44, 16  ;;  %v4061_v26 = vld [vmem:[%s3880_s28 + $0xb4] sm:$0xff]   ;;  %v4071_v40 = vld [vmem:[%s3880_s28 + $0xbc] ss:$0 sps:$4 sm:$0x11]  }
  0x27   : > { %933 = vrot.lane.b32.xlu0 %v4006_v25, %s3802_s30  ;;  %v867_v57 = vor.u32 %v866_v47, %v862_v34  ;;  %v854_v58 = vrot.slane %v852_v50, 1  ;;  %v886_v60 = vshrl.u32 %v4033_v51, 16  ;;  %v888_v62 = vshll.u32 %v4033_v51, 16  ;;  %s3816_s16 = smov 60   ;;  %s3817_s15 = smov 64  }
  0x28   : > { %v4042_v4 = vsel %vm6112_vm0, %v831_v53, %v835_v41  ;;  %v859_v5 = vrot.slane %v857_v56, 1  ;;  %v893_v13 = vshll.u32 %v4037_v59, 16  ;;  %v874_v17 = vshrl.u32 %v4045_v7, 16 }
  0x29   : > { %v4050_v8 = vsel %vm6112_vm0, %v867_v57, %v871_v55  ;;  %v855_v10 = vor.u32 %v854_v58, %v850_v48  ;;  %v890_v11 = vrot.slane %v888_v62, 1  ;;  %v876_v18 = vshll.u32 %v4045_v7, 16  ;;  %v4086_v58 = vld [vmem:[%s3880_s28 + $0xb0] ss:$0 sps:$4 sm:$0x11]  }
  0x2a   : > { %939 = vrot.lane.b32.xlu1 %v4018_v35, %s3802_s30  ;;  %v895_v30 = vrot.slane %v893_v13, 1  ;;  %v881_v36 = vshll.u32 %v4056_v16, 16  ;;  %v910_v41 = vshrl.u32 %v4061_v26, 16  ;;  %v912_v47 = vshll.u32 %v4061_v26, 16 }
  0x2b   : > { %937 = vrot.lane.b32.xlu0 %v4042_v4, %s3802_s30  ;;  %v4064_v28 = vsel %vm6112_vm0, %v855_v10, %v859_v5  ;;  %v891_v29 = vor.u32 %v890_v11, %v886_v60  ;;  %v878_v34 = vrot.slane %v876_v18, 1  ;;  %v898_v48 = vshrl.u32 %v4067_v31, 16 }
  0x2c   : > { %v883_v53 = vrot.slane %v881_v36, 1  ;;  %v917_v55 = vshll.u32 %v4071_v40, 16  ;;  %v900_v56 = vshll.u32 %v4067_v31, 16  ;;  %v914_v57 = vrot.slane %v912_v47, 1 }
  0x2d   : > { %v4077_v43 = vsel %vm6112_vm0, %v891_v29, %v895_v30  ;;  %v879_v50 = vor.u32 %v878_v34, %v874_v17  ;;  %v957_v10 = vrot.slane %v3910_v19, 1  ;;  %v905_v13 = vshll.u32 %v4086_v58, 16 }
  0x2e   : > { %943 = vrot.lane.b32.xlu1 %v4050_v8, %s3802_s30  ;;  %v919_v62 = vrot.slane %v917_v55, 1  ;;  %v902_v5 = vrot.slane %v900_v56, 1  ;;  %v915_v11 = vor.u32 %v914_v57, %v910_v41  ;;  %v958_v17 = vrot.slane %v3914_v22, 1 }
  0x2f   : > { %941 = vrot.lane.b32.xlu0 %v4064_v28, %s3802_s30  ;;  %v4096_v60 = vsel %vm6112_vm0, %v879_v50, %v883_v53  ;;  %v954_v29 = vrot.slane %v3889_v2, 1  ;;  %v907_v34 = vrot.slane %v905_v13, 1  ;;  %v955_v36 = vrot.slane %v3896_v6, 1 }
  0x30   : > { %v903_v18 = vor.u32 %v902_v5, %v898_v48  ;;  %v4105_v30 = vsel %vm6112_vm0, %v915_v11, %v919_v62  ;;  %v4121_v2 = vsel %vm6113_vm1, %v957_v10, %v958_v17  ;;  %v963_v41 = vrot.slane %v3902_v12, 1 }
  0x31   : > { %v964_v47 = vrot.slane %v3905_v14, 1  ;;  %v956_v6 = vsel %vm6113_vm1, %v954_v29, %v955_v36  ;;  %v960_v48 = vrot.slane %v3883_v0, 1  ;;  %v961_v50 = vrot.slane %v3886_v1, 1 }
  0x32   : > { %947 = vrot.lane.b32.xlu1 %v4077_v43, %s3802_s30  ;;  %v4118_v22 = vsel %vm6112_vm0, %v903_v18, %v907_v34  ;;  %v969_v55 = vrot.slane %v3922_v27, 1  ;;  %v970_v14 = vrot.slane %v3930_v33, 1  ;;  %v966_v57 = vrot.slane %v3935_v37, 1 }
  0x33   : > { %945 = vrot.lane.b32.xlu0 %v4096_v60, %s3802_s30  ;;  %v4133_v53 = vsel %vm6113_vm1, %v963_v41, %v964_v47  ;;  %v4139_v56 = vsel %vm6113_vm1, %v960_v48, %v961_v50  ;;  %v967_v1 = vrot.slane %v3944_v42, 1  ;;  %v975_v5 = vrot.slane %v3949_v45, 1 }
  0x34   : > { %v4146_v62 = vsel %vm6113_vm1, %v969_v55, %v970_v14  ;;  %v976_v10 = vrot.slane %v3961_v52, 1  ;;  %v972_v11 = vrot.slane %v3955_v49, 1  ;;  %v973_v42 = vrot.slane %v3977_v63, 1 }
  0x35   : > { %6116 = vst [vmem:[#allocation2_spill] sm:$0xff] %v4146_v62  ;;  %v4153_v33 = vsel %vm6113_vm1, %v966_v57, %v967_v1  ;;  %v981_v17 = vrot.slane %v3974_v61, 1  ;;  %v982_v52 = vrot.slane %v3986_v9, 1  ;;  %v978_v29 = vrot.slane %v3995_v20, 1 }
  0x36   : > { %951 = vrot.lane.b32.xlu1 %v4105_v30, %s3802_s30  ;;  %v4160_v13 = vsel %vm6113_vm1, %v975_v5, %v976_v10  ;;  %v4167_v18 = vsel %vm6113_vm1, %v972_v11, %v973_v42  ;;  %v979_v63 = vrot.slane %v4000_v21, 1  ;;  %v987_v36 = vrot.slane %v4003_v24, 1 }
  0x37   : > { %949 = vrot.lane.b32.xlu0 %v4118_v22, %s3802_s30  ;;  %6117 = vst [vmem:[#allocation3_spill] sm:$0xff] %v4160_v13  ;;  %6118 = vst [vmem:[#allocation4_spill] sm:$0xff] %v4167_v18  ;;  %v4174_v34 = vsel %vm6113_vm1, %v981_v17, %v982_v52  ;;  %v988_v9 = vrot.slane %v4014_v32, 1  ;;  %v984_v47 = vrot.slane %v4022_v39, 1  ;;  %v985_v21 = vrot.slane %v4028_v44, 1 }
  0x38   : > { %6119 = vst [vmem:[#allocation5_spill] sm:$0xff] %v4174_v34  ;;  %v4181_v41 = vsel %vm6113_vm1, %v978_v29, %v979_v63  ;;  %v993_v48 = vrot.slane %v4033_v51, 1  ;;  %v994_v32 = vrot.slane %v4037_v59, 1  ;;  %v990_v55 = vrot.slane %v4045_v7, 1 }
  0x39   : > { %6120 = vst [vmem:[#allocation6_spill] sm:$0xff] %v4181_v41  ;;  %v4195_v50 = vsel %vm6113_vm1, %v984_v47, %v985_v21  ;;  %v991_v44 = vrot.slane %v4056_v16, 1  ;;  %v999_v57 = vrot.slane %v4061_v26, 1  ;;  %v1000_v59 = vrot.slane %v4071_v40, 1 }
  0x3a   : > { %1004 = vrot.lane.b32.xlu1 %v4121_v2, %s3803_s13  ;;  %v4202_v14 = vsel %vm6113_vm1, %v993_v48, %v994_v32  ;;  %v996_v5 = vrot.slane %v4067_v31, 1  ;;  %v997_v16 = vrot.slane %v4086_v58, 1 }
  0x3b   : > { %1002 = vrot.lane.b32.xlu0 %v956_v6, %s3803_s13  ;;  %v4188_v6 = vsel %vm6113_vm1, %v987_v36, %v988_v9  ;;  %6121 = vst [vmem:[#allocation7_spill] sm:$0xff] %v4202_v14  ;;  %v4209_v1 = vsel %vm6113_vm1, %v990_v55, %v991_v44  ;;  %v4216_v10 = vsel %vm6113_vm1, %v999_v57, %v1000_v59 }
  0x3c   : > { %6122 = vst [vmem:[#allocation8_spill] sm:$0xff] %v4209_v1  ;;  %6123 = vst [vmem:[#allocation9_spill] sm:$0xff] %v4216_v10  ;;  %v4221_v40 = vsel %vm6113_vm1, %v996_v5, %v997_v16 }
  0x3d   : > { %6124 = vst [vmem:[#allocation10_spill] sm:$0xff] %v4221_v40 }
  0x3e   : > { %1008 = vrot.lane.b32.xlu1 %v4133_v53, %s3803_s13 }
  0x3f   : > { %1006 = vrot.lane.b32.xlu0 %v4139_v56, %s3803_s13 }
  0x42   : > { %1012 = vrot.lane.b32.xlu1 %v4146_v62, %s3803_s13 }
  0x43   : > { %1010 = vrot.lane.b32.xlu0 %v4153_v33, %s3803_s13 }
  0x46   : > { %1016 = vrot.lane.b32.xlu1 %v4160_v13, %s3803_s13 }
  0x47   : > { %1014 = vrot.lane.b32.xlu0 %v4167_v18, %s3803_s13 }
  0x4a   : > { %1020 = vrot.lane.b32.xlu1 %v4174_v34, %s3803_s13 }
  0x4b   : > { %1018 = vrot.lane.b32.xlu0 %v4181_v41, %s3803_s13 }
  0x4e   : > { %1024 = vrot.lane.b32.xlu1 %v4188_v6, %s3803_s13 }
  0x4f   : > { %1022 = vrot.lane.b32.xlu0 %v4195_v50, %s3803_s13 }
  0x52   : > { %1028 = vrot.lane.b32.xlu1 %v4202_v14, %s3803_s13 }
  0x53   : > { %1026 = vrot.lane.b32.xlu0 %v4209_v1, %s3803_s13 }
  0x56   : > { %1032 = vrot.lane.b32.xlu1 %v4216_v10, %s3803_s13 }
  0x57   : > { %1030 = vrot.lane.b32.xlu0 %v4221_v40, %s3803_s13 }
  0x5a   : > { %1041 = vrot.lane.b32.xlu1 %v3883_v0, %s3804_s14 }
  0x5b   : > { %1039 = vrot.lane.b32.xlu0 %v3910_v19, %s3804_s14  ;;  %v4247_v19 = vld [vmem:[%s4093_s9] sm:$0xff]  }
  0x5c   : > { %v1077_v42 = vshll.u32 %v4247_v19, 16  ;;  %v1075_v52 = vshrl.u32 %v4247_v19, 16 }
  0x5e   : > { %1045 = vrot.lane.b32.xlu1 %v3935_v37, %s3804_s14  ;;  %v1079_v29 = vrot.slane %v1077_v42, 1 }
  0x5f   : > { %1043 = vrot.lane.b32.xlu0 %v3902_v12, %s3804_s14 }
  0x60   : > { %v1080_v47 = vor.u32 %v1079_v29, %v1075_v52 }
  0x62   : > { %1049 = vrot.lane.b32.xlu1 %v3955_v49, %s3804_s14 }
  0x63   : > { %1047 = vrot.lane.b32.xlu0 %v3922_v27, %s3804_s14 }
  0x66   : > { %1053 = vrot.lane.b32.xlu1 %v3995_v20, %s3804_s14 }
  0x67   : > { %1051 = vrot.lane.b32.xlu0 %v3949_v45, %s3804_s14 }
  0x6a   : > { %1057 = vrot.lane.b32.xlu1 %v4022_v39, %s3804_s14 }
  0x6b   : > { %1055 = vrot.lane.b32.xlu0 %v3974_v61, %s3804_s14 }
  0x6e   : > { %1061 = vrot.lane.b32.xlu1 %v4045_v7, %s3804_s14 }
  0x6f   : > { %1059 = vrot.lane.b32.xlu0 %v4003_v24, %s3804_s14 }
  0x72   : > { %1065 = vrot.lane.b32.xlu1 %v4067_v31, %s3804_s14 }
  0x73   : > { %1063 = vrot.lane.b32.xlu0 %v4033_v51, %s3804_s14 }
  0x76   : > { %1069 = vrot.lane.b32.xlu1 %v4247_v19, %s3804_s14 }
  0x77   : > { %1067 = vrot.lane.b32.xlu0 %v4061_v26, %s3804_s14 }
  0x7a   : > { %1088 = vrot.lane.b32.xlu1 %v3917_v23, %s3805_s18 }
  0x7b   : > { %1086 = vrot.lane.b32.xlu0 %v3952_v46, %s3805_s18  ;;  %v3707_v46 = vld [vmem:[%s4093_s9 + $0x8] ss:$0 sps:$4 sm:$0x11]  }
  0x7c   : > { %v1082_v63 = vshll.u32 %v3707_v46, 16 }
  0x7e   : > { %1092 = vrot.lane.b32.xlu1 %v3980_v3, %s3805_s18  ;;  %v1084_v21 = vrot.slane %v1082_v63, 1 }
  0x7f   : > { %1090 = vrot.lane.b32.xlu0 %v3938_v38, %s3805_s18 }
  0x80   : > { %v4294_v32 = vsel %vm6112_vm0, %v1080_v47, %v1084_v21  ;;  %v1118_v21 = vrot.slane %v4247_v19, 1 }
  0x82   : > { %1096 = vrot.lane.b32.xlu1 %v4006_v25, %s3805_s18 }
  0x83   : > { %1094 = vrot.lane.b32.xlu0 %v3965_v54, %s3805_s18 }
  0x86   : > { %1100 = vrot.lane.b32.xlu1 %v4042_v4, %s3805_s18 }
  0x87   : > { %1098 = vrot.lane.b32.xlu0 %v3991_v15, %s3805_s18 }
  0x8a   : > { %1104 = vrot.lane.b32.xlu1 %v4064_v28, %s3805_s18 }
  0x8b   : > { %1102 = vrot.lane.b32.xlu0 %v4018_v35, %s3805_s18 }
  0x8c   : > { %v4266_v58 = vpop.permute.xlu1 %925 }
  0x8d   : > { %v4268_v11 = vpop.permute.xlu0 %921 }
  0x8e   : > { %6125 = vst [vmem:[#allocation11_spill] sm:$0xff] %v4268_v11  ;;  %1108 = vrot.lane.b32.xlu1 %v4096_v60, %s3805_s18 }
  0x8f   : > { %1106 = vrot.lane.b32.xlu0 %v4050_v8, %s3805_s18 }
  0x90   : > { %v4276_v17 = vpop.permute.xlu1 %927 }
  0x91   : > { %v4281_v36 = vpop.permute.xlu0 %923 }
  0x92   : > { %6126 = vst [vmem:[#allocation12_spill] sm:$0xff] %v4281_v36  ;;  %1112 = vrot.lane.b32.xlu1 %v4118_v22, %s3805_s18 }
  0x93   : > { %1110 = vrot.lane.b32.xlu0 %v4077_v43, %s3805_s18 }
  0x94   : > { %v4285_v9 = vpop.permute.xlu1 %931 }
  0x95   : > { %v4289_v48 = vpop.permute.xlu0 %929 }
  0x96   : > { %1116 = vrot.lane.b32.xlu1 %v4294_v32, %s3805_s18 }
  0x97   : > { %1114 = vrot.lane.b32.xlu0 %v4105_v30, %s3805_s18 }
  0x98   : > { %v4298_v55 = vpop.permute.xlu1 %935 }
  0x99   : > { %v4302_v44 = vpop.permute.xlu0 %933 }
  0x9a   : > { %1123 = vrot.lane.b32.xlu1 %v4139_v56, %s3806_s19 }
  0x9b   : > { %1121 = vrot.lane.b32.xlu0 %v4121_v2, %s3806_s19 }
  0x9c   : > { %v4306_v57 = vpop.permute.xlu1 %939 }
  0x9d   : > { %6127 = vst [vmem:[#allocation13_spill] sm:$0xff] %v4306_v57  ;;  %v4312_v59 = vpop.permute.xlu0 %937 }
  0x9e   : > { %6128 = vst [vmem:[#allocation14_spill] sm:$0xff] %v4312_v59  ;;  %1127 = vrot.lane.b32.xlu1 %v4153_v33, %s3806_s19 }
  0x9f   : > { %1125 = vrot.lane.b32.xlu0 %v4133_v53, %s3806_s19 }
  0xa0   : > { %v4316_v5 = vpop.permute.xlu1 %943 }
  0xa1   : > { %v4320_v16 = vpop.permute.xlu0 %941 }
  0xa2   : > { %1131 = vrot.lane.b32.xlu1 %v4167_v18, %s3806_s19 }
  0xa3   : > { %1129 = vrot.lane.b32.xlu0 %v4146_v62, %s3806_s19 }
  0xa4   : > { %v4324_v42 = vpop.permute.xlu1 %947 }
  0xa5   : > { %v4328_v2 = vpop.permute.xlu0 %945 }
  0xa6   : > { %1135 = vrot.lane.b32.xlu1 %v4181_v41, %s3806_s19  ;;  %v1119_v41 = vrot.slane %v3707_v46, 1 }
  0xa7   : > { %1133 = vrot.lane.b32.xlu0 %v4160_v13, %s3806_s19 }
  0xa8   : > { %v4334_v52 = vpop.permute.xlu1 %951 }
  0xa9   : > { %v4336_v29 = vpop.permute.xlu0 %949 }
  0xaa   : > { %1139 = vrot.lane.b32.xlu1 %v4195_v50, %s3806_s19 }
  0xab   : > { %1137 = vrot.lane.b32.xlu0 %v4174_v34, %s3806_s19  ;;  %v4354_v34 = vsel %vm6113_vm1, %v1118_v21, %v1119_v41 }
  0xac   : > { %v4342_v63 = vpop.permute.xlu1 %1004  ;;  %6131 = vst [vmem:[#allocation17_spill] sm:$0xff] %v4354_v34 }
  0xad   : > { %6129 = vst [vmem:[#allocation15_spill] sm:$0xff] %v4342_v63  ;;  %v4344_v47 = vpop.permute.xlu0 %1002 }
  0xae   : > { %6130 = vst [vmem:[#allocation16_spill] sm:$0xff] %v4344_v47  ;;  %1143 = vrot.lane.b32.xlu1 %v4209_v1, %s3806_s19 }
  0xaf   : > { %1141 = vrot.lane.b32.xlu0 %v4188_v6, %s3806_s19 }
  0xb0   : > { %v1009_v57 = vpop.permute.xlu1 %1008 }
  0xb1   : > { %v1007_v36 = vpop.permute.xlu0 %1006 }
  0xb2   : > { %1147 = vrot.lane.b32.xlu1 %v4221_v40, %s3806_s19 }
  0xb3   : > { %1145 = vrot.lane.b32.xlu0 %v4202_v14, %s3806_s19 }
  0xb4   : > { %v1013_v63 = vpop.permute.xlu1 %1012 }
  0xb5   : > { %v1011_v59 = vpop.permute.xlu0 %1010 }
  0xb6   : > { %1151 = vrot.lane.b32.xlu1 %v4354_v34, %s3806_s19 }
  0xb7   : > { %1149 = vrot.lane.b32.xlu0 %v4216_v10, %s3806_s19 }
  0xb8   : > { %v1017_v46 = vpop.permute.xlu1 %1016 }
  0xb9   : > { %v1015_v47 = vpop.permute.xlu0 %1014 }
  0xba   : > { %1160 = vrot.lane.b32.xlu1 %v3902_v12, %s3807_s20 }
  0xbb   : > { %1158 = vrot.lane.b32.xlu0 %v3883_v0, %s3807_s20 }
  0xbc   : > { %v4366_v41 = vpop.permute.xlu1 %1020 }
  0xbd   : > { %6132 = vst [vmem:[#allocation18_spill] sm:$0xff] %v4366_v41  ;;  %v4368_v21 = vpop.permute.xlu0 %1018 }
  0xbe   : > { %6133 = vst [vmem:[#allocation19_spill] sm:$0xff] %v4368_v21  ;;  %1164 = vrot.lane.b32.xlu1 %v3922_v27, %s3807_s20 }
  0xbf   : > { %1162 = vrot.lane.b32.xlu0 %v3935_v37, %s3807_s20 }
  0xc0   : > { %v1025_v34 = vpop.permute.xlu1 %1024 }
  0xc1   : > { %v1023_v11 = vpop.permute.xlu0 %1022 }
  0xc2   : > { %1168 = vrot.lane.b32.xlu1 %v3949_v45, %s3807_s20 }
  0xc3   : > { %1166 = vrot.lane.b32.xlu0 %v3955_v49, %s3807_s20 }
  0xc4   : > { %v4378_v10 = vpop.permute.xlu1 %1028 }
  0xc5   : > { %v4380_v13 = vpop.permute.xlu0 %1026 }
  0xc6   : > { %1172 = vrot.lane.b32.xlu1 %v3974_v61, %s3807_s20  ;;  %v1900_v61 = vsel %vm1892_vm2, %v3902_v12, %v4276_v17  ;;  %v3708_v12 = vld [vmem:[%s4093_s9 + $0xc] sm:$0xff]   ;;  %v1904_v17 = vsel %vm1892_vm2, %v3922_v27, %v4285_v9  ;;  %v1908_v27 = vsel %vm1892_vm2, %v3949_v45, %v4298_v55  ;;  %v1906_v9 = vsel %vm1892_vm2, %v3955_v49, %v4302_v44 }
  0xc7   : > { %1170 = vrot.lane.b32.xlu0 %v3995_v20, %s3807_s20  ;;  %v1933_v20 = vsel %vm1925_vm3, %v1900_v61, %v1009_v57  ;;  %v1937_v61 = vsel %vm1925_vm3, %v1904_v17, %v1013_v63  ;;  %v1916_v55 = vsel %vm1892_vm2, %v4003_v24, %v4316_v5 }
  0xc8   : > { %v4386_v41 = vpop.permute.xlu1 %1032 }
  0xc9   : > { %v4388_v21 = vpop.permute.xlu0 %1030 }
  0xca   : > { %1176 = vrot.lane.b32.xlu1 %v4003_v24, %s3807_s20 }
  0xcb   : > { %1174 = vrot.lane.b32.xlu0 %v4022_v39, %s3807_s20 }
  0xcc   : > { %v4394_v40 = vpop.permute.xlu1 %1041 }
  0xcd   : > { %6134 = vst [vmem:[#allocation20_spill] sm:$0xff] %v4394_v40  ;;  %v4396_v18 = vpop.permute.xlu0 %1039  ;;  %v1898_v40 = vsel %vm1892_vm2, %v3883_v0, %v4266_v58 }
  0xce   : > { %6135 = vst [vmem:[#allocation21_spill] sm:$0xff] %v4396_v18  ;;  %1180 = vrot.lane.b32.xlu1 %v4033_v51, %s3807_s20  ;;  %v1931_v62 = vsel %vm1925_vm3, %v1898_v40, %v1007_v36 }
  0xcf   : > { %1178 = vrot.lane.b32.xlu0 %v4045_v7, %s3807_s20 }
  0xd0   : > { %v1046_v14 = vpop.permute.xlu1 %1045 }
  0xd1   : > { %v4410_v18 = vsel %vm1958_vm4, %v1933_v20, %v1046_v14  ;;  %v1044_v1 = vpop.permute.xlu0 %1043  ;;  %v1902_v14 = vsel %vm1892_vm2, %v3935_v37, %v4289_v48  ;;  %v4518_v20 = vld [vmem:[%s4242_s17 + $0x78] sm:$0xff]  }
  0xd2   : > { %1184 = vrot.lane.b32.xlu1 %v4061_v26, %s3807_s20  ;;  %v4420_v57 = vsel %vm1958_vm4, %v1931_v62, %v1044_v1  ;;  %v1935_v58 = vsel %vm1925_vm3, %v1902_v14, %v1011_v59  ;;  %v1941_v1 = vsel %vm1925_vm3, %v1908_v27, %v1017_v46  ;;  %v1939_v59 = vsel %vm1925_vm3, %v1906_v9, %v1015_v47  ;;  %v4536_v14 = vld [vmem:[%s4242_s17 + $0x2c] ss:$0 sps:$4 sm:$0x11]  }
  0xd3   : > { %1182 = vrot.lane.b32.xlu0 %v4067_v31, %s3807_s20  ;;  %v1476_v9 = vshll.u32 %v4536_v14, 16 }
  0xd4   : > { %v1050_v0 = vpop.permute.xlu1 %1049 }
  0xd5   : > { %v4429_v40 = vsel %vm1958_vm4, %v1937_v61, %v1050_v0  ;;  %v1048_v36 = vpop.permute.xlu0 %1047 }
  0xd6   : > { %1188 = vrot.lane.b32.xlu1 %v3708_v12, %s3807_s20  ;;  %v4437_v62 = vsel %vm1958_vm4, %v1935_v58, %v1048_v36  ;;  %v4548_v58 = vld [vmem:[%s4242_s17 + $0x84] sm:$0xff]  }
  0xd7   : > { %1186 = vrot.lane.b32.xlu0 %v4247_v19, %s3807_s20 }
  0xd8   : > { %v1054_v37 = vpop.permute.xlu1 %1053 }
  0xd9   : > { %v4446_v48 = vsel %vm1958_vm4, %v1941_v1, %v1054_v37  ;;  %v1052_v63 = vpop.permute.xlu0 %1051 }
  0xda   : > { %1207 = vrot.lane.b32.xlu1 %v3938_v38, %s3808_s25  ;;  %v4452_v45 = vsel %vm1958_vm4, %v1939_v59, %v1052_v63  ;;  %v1949_v38 = vsel %vm1925_vm3, %v1916_v55, %v1025_v34  ;;  %v4484_v34 = vld [vmem:[%s4242_s17 + $0x18] sm:$0xff]   ;;  %v1553_v63 = vshrl.u32 %v4518_v20, 16 }
  0xdb   : > { %1205 = vrot.lane.b32.xlu0 %v3917_v23, %s3808_s25  ;;  %v1914_v23 = vsel %vm1892_vm2, %v4022_v39, %v4320_v16  ;;  %v1457_v61 = vshrl.u32 %v4484_v34, 16 }
  0xdc   : > { %v4456_v19 = vpop.permute.xlu1 %1057 }
  0xdd   : > { %6136 = vst [vmem:[#allocation22_spill] sm:$0xff] %v4456_v19  ;;  %v4458_v49 = vpop.permute.xlu0 %1055 }
  0xde   : > { %6137 = vst [vmem:[#allocation23_spill] sm:$0xff] %v4458_v49  ;;  %1211 = vrot.lane.b32.xlu1 %v3965_v54, %s3808_s25  ;;  %v1947_v54 = vsel %vm1925_vm3, %v1914_v23, %v1023_v11  ;;  %v1567_v23 = vshll.u32 %v4548_v58, 16 }
  0xdf   : > { %1209 = vrot.lane.b32.xlu0 %v3980_v3, %s3808_s25  ;;  %v1920_v3 = vsel %vm1892_vm2, %v4033_v51, %v4324_v42 }
  0xe0   : > { %v1062_v44 = vpop.permute.xlu1 %1061  ;;  %v1953_v39 = vsel %vm1925_vm3, %v1920_v3, %v4378_v10  ;;  %v4501_v10 = vld [vmem:[%s4242_s17 + $0x20] ss:$0 sps:$4 sm:$0x11]  }
  0xe1   : > { %v4472_v47 = vsel %vm1958_vm4, %v1949_v38, %v1062_v44  ;;  %v1060_v46 = vpop.permute.xlu0 %1059  ;;  %v4565_v44 = vld [vmem:[%s4242_s17 + $0x8c] ss:$0 sps:$4 sm:$0x11]  }
  0xe2   : > { %1215 = vrot.lane.b32.xlu1 %v3991_v15, %s3808_s25  ;;  %v4481_v24 = vsel %vm1958_vm4, %v1947_v54, %v1060_v46  ;;  %v1918_v15 = vsel %vm1892_vm2, %v4045_v7, %v4328_v2  ;;  %v1459_v7 = vshll.u32 %v4484_v34, 16  ;;  %v4511_v2 = vld [vmem:[%s4242_s17 + $0x24] sm:$0xff]   ;;  %v4571_v46 = vld [vmem:[%s4242_s17 + $0x30] sm:$0xff]  }
  0xe3   : > { %1213 = vrot.lane.b32.xlu0 %v4006_v25, %s3808_s25  ;;  %v1951_v51 = vsel %vm1925_vm3, %v1918_v15, %v4380_v13  ;;  %v1924_v25 = vsel %vm1892_vm2, %v4061_v26, %v4334_v52  ;;  %v1922_v26 = vsel %vm1892_vm2, %v4067_v31, %v4336_v29  ;;  %v1471_v31 = vshll.u32 %v4511_v2, 16 }
  0xe4   : > { %v1066_v11 = vpop.permute.xlu1 %1065  ;;  %v1957_v13 = vsel %vm1925_vm3, %v1924_v25, %v4386_v41  ;;  %v1955_v12 = vsel %vm1925_vm3, %v1922_v26, %v4388_v21  ;;  %v1461_v0 = vrot.slane %v1459_v7, 1  ;;  %v4544_v21 = vld [vmem:[%s4242_s17 + $0x80] ss:$0 sps:$4 sm:$0x11]   ;;  %v1469_v37 = vshrl.u32 %v4511_v2, 16 }
  0xe5   : > { %v4494_v5 = vsel %vm1958_vm4, %v1953_v39, %v1066_v11  ;;  %v1064_v16 = vpop.permute.xlu0 %1063  ;;  %v1560_v38 = vshll.u32 %v4544_v21, 16  ;;  %v1478_v39 = vrot.slane %v1476_v9, 1  ;;  %v1572_v25 = vshll.u32 %v4565_v44, 16  ;;  %v4602_v26 = vld [vmem:[%s4242_s17 + $0x3c] sm:$0xff]  }
  0xe6   : > { %1219 = vrot.lane.b32.xlu1 %v4018_v35, %s3808_s25  ;;  %v4507_v42 = vsel %vm1958_vm4, %v1951_v51, %v1064_v16  ;;  %v1462_v1 = vor.u32 %v1461_v0, %v1457_v61  ;;  %v1569_v16 = vrot.slane %v1567_v23, 1  ;;  %6140 = vst [vmem:[#allocation26_spill] sm:$0xff] %v4602_v26  ;;  %v2392_v23 = vshrl.u32 %v4536_v14, 16 }
  0xe7   : > { %1217 = vrot.lane.b32.xlu0 %v4042_v4, %s3808_s25  ;;  %v1464_v4 = vshll.u32 %v4501_v10, 16  ;;  %v1574_v0 = vrot.slane %v1572_v25, 1 }
  0xe8   : > { %v1070_v35 = vpop.permute.xlu1 %1069 }
  0xe9   : > { %v4524_v52 = vsel %vm1958_vm4, %v1957_v13, %v1070_v35  ;;  %v1068_v17 = vpop.permute.xlu0 %1067  ;;  %v1466_v27 = vrot.slane %v1464_v4, 1  ;;  %v1483_v13 = vshll.u32 %v4571_v46, 16 }
  0xea   : > { %1223 = vrot.lane.b32.xlu1 %v4050_v8, %s3808_s25  ;;  %v4532_v41 = vsel %vm1958_vm4, %v1955_v12, %v1068_v17  ;;  %v1555_v8 = vshll.u32 %v4518_v20, 16  ;;  %v4607_v17 = vld [vmem:[%s4242_s17 + $0x90] sm:$0xff]  }
  0xeb   : > { %1221 = vrot.lane.b32.xlu0 %v4064_v28, %s3808_s25  ;;  %v1473_v28 = vrot.slane %v1471_v31, 1  ;;  %v4578_v3 = vsel %vm6112_vm0, %v1462_v1, %v1466_v27  ;;  %v1485_v27 = vrot.slane %v1483_v13, 1 }
  0xec   : > { %v4541_v29 = vpop.permute.xlu1 %1088  ;;  %v1557_v55 = vrot.slane %v1555_v8, 1  ;;  %v1481_v8 = vshrl.u32 %v4571_v46, 16 }
  0xed   : > { %6138 = vst [vmem:[#allocation24_spill] sm:$0xff] %v4541_v29  ;;  %v4550_v36 = vpop.permute.xlu0 %1086 }
  0xee   : > { %6139 = vst [vmem:[#allocation25_spill] sm:$0xff] %v4550_v36  ;;  %1227 = vrot.lane.b32.xlu1 %v4077_v43, %s3808_s25  ;;  %v1558_v15 = vor.u32 %v1557_v55, %v1553_v63  ;;  %v1579_v63 = vshll.u32 %v4607_v17, 16 }
  0xef   : > { %1225 = vrot.lane.b32.xlu0 %v4096_v60, %s3808_s25 }
  0xf0   : > { %v1093_v59 = vpop.permute.xlu1 %1092  ;;  %v1581_v25 = vrot.slane %v1579_v63, 1 }
  0xf1   : > { %v4562_v43 = vsel %vm1991_vm5, %v4410_v18, %v1093_v59  ;;  %v1091_v54 = vpop.permute.xlu0 %1090  ;;  %v1474_v18 = vor.u32 %v1473_v28, %v1469_v37  ;;  %v4626_v37 = vld [vmem:[%s4242_s17 + $0x44] ss:$0 sps:$4 sm:$0x11]   ;;  %v1495_v28 = vshll.u32 %v4602_v26, 16 }
  0xf2   : > { %1231 = vrot.lane.b32.xlu1 %v4105_v30, %s3808_s25  ;;  %v4575_v60 = vsel %vm1991_vm5, %v4420_v57, %v1091_v54  ;;  %v1562_v30 = vrot.slane %v1560_v38, 1  ;;  %v1565_v57 = vshrl.u32 %v4548_v58, 16  ;;  %6141 = vst [vmem:[#allocation27_spill] sm:$0xff] %v4626_v37  ;;  %v4634_v59 = vld [vmem:[%s4242_s17 + $0x98] ss:$0 sps:$4 sm:$0x11]   ;;  %v1486_v54 = vor.u32 %v1485_v27, %v1481_v8 }
  0xf3   : > { %1229 = vrot.lane.b32.xlu0 %v4118_v22, %s3808_s25  ;;  %v4596_v35 = vsel %vm6112_vm0, %v1474_v18, %v1478_v39  ;;  %6143 = vst [vmem:[#allocation29_spill] sm:$0xff] %v4634_v59  ;;  %v1493_v39 = vshrl.u32 %v4602_v26, 16 }
  0xf4   : > { %v1097_v11 = vpop.permute.xlu1 %1096  ;;  %v1570_v61 = vor.u32 %v1569_v16, %v1565_v57  ;;  %v2406_v57 = vshrl.u32 %v4544_v21, 16  ;;  %v1577_v16 = vshrl.u32 %v4607_v17, 16 }
  0xf5   : > { %v4584_v51 = vsel %vm1991_vm5, %v4429_v40, %v1097_v11  ;;  %v1095_v7 = vpop.permute.xlu0 %1094  ;;  %v4599_v40 = vld [vmem:[%s4242_s17 + $0x38] ss:$0 sps:$4 sm:$0x11]   ;;  %v1497_v11 = vrot.slane %v1495_v28, 1  ;;  %v2408_v28 = vshrl.u32 %v4565_v44, 16 }
  0xf6   : > { %2434 = vrot.lane.b32.xlu1 %v4578_v3, %s3802_s30  ;;  %v4593_v22 = vsel %vm1991_vm5, %v4437_v62, %v1095_v7  ;;  %v4614_v62 = vsel %vm6112_vm0, %v1558_v15, %v1562_v30  ;;  %v4638_v55 = vsel %vm6112_vm0, %v1570_v61, %v1574_v0  ;;  %v1500_v15 = vshll.u32 %v4626_v37, 16 }
  0xf7   : > { %1233 = vrot.lane.b32.xlu0 %v4294_v32, %s3808_s25  ;;  %v2390_v32 = vshrl.u32 %v4501_v10, 16  ;;  %v1584_v7 = vshll.u32 %v4634_v59, 16  ;;  %v1498_v27 = vor.u32 %v1497_v11, %v1493_v39  ;;  %v1582_v63 = vor.u32 %v1581_v25, %v1577_v16  ;;  %v4689_v16 = vld [vmem:[%s4242_s17 + $0x50] ss:$0 sps:$4 sm:$0x11]  }
  0xf8   : > { %v1101_v12 = vpop.permute.xlu1 %1100 }
  0xf9   : > { %v4611_v4 = vsel %vm1991_vm5, %v4446_v48, %v1101_v12  ;;  %v1099_v31 = vpop.permute.xlu0 %1098  ;;  %v1488_v48 = vshll.u32 %v4599_v40, 16  ;;  %v4659_v12 = vld [vmem:[%s4242_s17 + $0xa4] ss:$0 sps:$4 sm:$0x11]  }
  0xfa   : > { %2438 = vrot.lane.b32.xlu1 %v4596_v35, %s3802_s30  ;;  %v4622_v1 = vsel %vm1991_vm5, %v4452_v45, %v1099_v31  ;;  %v4641_v45 = vld [vmem:[%s4242_s17 + $0x9c] sm:$0xff]   ;;  %6146 = vst [vmem:[#allocation32_spill] sm:$0xff] %v4659_v12  ;;  %v3725_v31 = vld [vmem:[%s4242_s17 + $0x48] sm:$0xff]  }
  0xfb   : > { %2466 = vrot.lane.b32.xlu0 %v4614_v62, %s3802_s30  ;;  %6144 = vst [vmem:[#allocation30_spill] sm:$0xff] %v4641_v45  ;;  %v1490_v18 = vrot.slane %v1488_v48, 1  ;;  %v1591_v61 = vshll.u32 %v4641_v45, 16  ;;  %v1502_v48 = vrot.slane %v1500_v15, 1  ;;  %v1507_v11 = vshll.u32 %v3725_v31, 16 }
  0xfc   : > { %v4631_v9 = vpop.permute.xlu1 %1104 }
  0xfd   : > { %6142 = vst [vmem:[#allocation28_spill] sm:$0xff] %v4631_v9  ;;  %v4643_v38 = vpop.permute.xlu0 %1102  ;;  %v4669_v8 = vsel %vm6112_vm0, %v1486_v54, %v1490_v18  ;;  %v1593_v54 = vrot.slane %v1591_v61, 1  ;;  %v1596_v18 = vshll.u32 %v4659_v12, 16 }
  0xfe   : > { %6145 = vst [vmem:[#allocation31_spill] sm:$0xff] %v4643_v38  ;;  %2436 = vrot.lane.b32.xlu1 %v2390_v32, %s3802_s30 }
  0xff   : > { %2470 = vrot.lane.b32.xlu0 %v4638_v55, %s3802_s30 }
 0x100   : > { %v1109_v30 = vpop.permute.xlu1 %1108 }
 0x101   : > { %v4656_v13 = vsel %vm1991_vm5, %v4472_v47, %v1109_v30  ;;  %v1107_v0 = vpop.permute.xlu0 %1106 }
 0x102   : > { %2440 = vrot.lane.b32.xlu1 %v2392_v23, %s3802_s30  ;;  %v4666_v32 = vsel %vm1991_vm5, %v4481_v24, %v1107_v0  ;;  %v1586_v23 = vrot.slane %v1584_v7, 1  ;;  %v1589_v24 = vshrl.u32 %v4641_v45, 16  ;;  %v3729_v7 = vld [vmem:[%s4242_s17 + $0xa8] sm:$0xff]  }
 0x103   : > { %2468 = vrot.lane.b32.xlu0 %v2406_v57, %s3802_s30  ;;  %v4686_v57 = vsel %vm6112_vm0, %v1498_v27, %v1502_v48  ;;  %v1598_v27 = vrot.slane %v1596_v18, 1  ;;  %v3731_v18 = vld [vmem:[%s4242_s17 + $0xb4] sm:$0xff]   ;;  %v1601_v49 = vshrl.u32 %v3729_v7, 16 }
 0x104   : > { %v1113_v47 = vpop.permute.xlu1 %1112  ;;  %6147 = vst [vmem:[#allocation33_spill] sm:$0xff] %v4686_v57  ;;  %v4699_v0 = vsel %vm6112_vm0, %v1582_v63, %v1586_v23 }
 0x105   : > { %v4675_v30 = vsel %vm1991_vm5, %v4494_v5, %v1113_v47  ;;  %v1111_v39 = vpop.permute.xlu0 %1110  ;;  %v3727_v5 = vld [vmem:[%s4242_s17 + $0x54] sm:$0xff]   ;;  %v2394_v47 = vshrl.u32 %v4599_v40, 16 }
 0x106   : > { %2442 = vrot.lane.b32.xlu1 %v4669_v8, %s3802_s30  ;;  %v4683_v15 = vsel %vm1991_vm5, %v4507_v42, %v1111_v39  ;;  %v1594_v42 = vor.u32 %v1593_v54, %v1589_v24  ;;  %v1509_v39 = vrot.slane %v1507_v11, 1  ;;  %v1519_v63 = vshll.u32 %v3727_v5, 16  ;;  %v4717_v24 = vld [vmem:[%s4242_s17 + $0xb0] ss:$0 sps:$4 sm:$0x11]  }
 0x107   : > { %2472 = vrot.lane.b32.xlu0 %v2408_v28, %s3802_s30  ;;  %v1505_v28 = vshrl.u32 %v3725_v31, 16  ;;  %v1603_v54 = vshll.u32 %v3729_v7, 16  ;;  %v2396_v11 = vshrl.u32 %v4626_v37, 16  ;;  %v1517_v29 = vshrl.u32 %v3727_v5, 16 }
 0x108   : > { %v1117_v25 = vpop.permute.xlu1 %1116  ;;  %v4720_v31 = vsel %vm6112_vm0, %v1594_v42, %v1598_v27  ;;  %v2410_v27 = vshrl.u32 %v4634_v59, 16  ;;  %v1615_v5 = vshll.u32 %v3731_v18, 16 }
 0x109   : > { %v4696_v61 = vsel %vm1991_vm5, %v4524_v52, %v1117_v25  ;;  %v1115_v48 = vpop.permute.xlu0 %1114  ;;  %v1512_v52 = vshll.u32 %v4689_v16, 16  ;;  %v4710_v25 = vld [vmem:[%s4242_s17 + $0x5c] ss:$0 sps:$4 sm:$0x11]   ;;  %6149 = vst [vmem:[#allocation35_spill] sm:$0xff] %v4720_v31  ;;  %v1605_v36 = vrot.slane %v1603_v54, 1 }
 0x10a   : > { %2446 = vrot.lane.b32.xlu1 %v4686_v57, %s3802_s30  ;;  %v4706_v9 = vsel %vm1991_vm5, %v4532_v41, %v1115_v48  ;;  %v1510_v48 = vor.u32 %v1509_v39, %v1505_v28  ;;  %v1524_v38 = vshll.u32 %v4710_v25, 16  ;;  %v4737_v28 = vld [vmem:[%s4242_s17 + $0xbc] ss:$0 sps:$4 sm:$0x11]  }
 0x10b   : > { %2474 = vrot.lane.b32.xlu0 %v4699_v0, %s3802_s30  ;;  %v1514_v19 = vrot.slane %v1512_v52, 1  ;;  %v4741_v52 = vld [vmem:[%s4242_s17 + $0x60] sm:$0xff]  }
 0x10c   : > { %v4714_v23 = vpop.permute.xlu1 %1123 }
 0x10d   : > { %6148 = vst [vmem:[#allocation34_spill] sm:$0xff] %v4714_v23  ;;  %v4723_v41 = vpop.permute.xlu0 %1121  ;;  %v1521_v23 = vrot.slane %v1519_v63, 1  ;;  %v4748_v7 = vsel %vm6112_vm0, %v1510_v48, %v1514_v19  ;;  %v1620_v19 = vshll.u32 %v4737_v28, 16 }
 0x10e   : > { %6150 = vst [vmem:[#allocation36_spill] sm:$0xff] %v4723_v41  ;;  %2444 = vrot.lane.b32.xlu1 %v2394_v47, %s3802_s30  ;;  %v1608_v41 = vshll.u32 %v4717_v24, 16  ;;  %6151 = vst [vmem:[#allocation37_spill] sm:$0xff] %v4748_v7 }
 0x10f   : > { %2478 = vrot.lane.b32.xlu0 %v4720_v31, %s3802_s30  ;;  %v1522_v54 = vor.u32 %v1521_v23, %v1517_v29  ;;  %v1526_v31 = vrot.slane %v1524_v38, 1  ;;  %v1531_v38 = vshll.u32 %v4741_v52, 16 }
 0x110   : > { %v1128_v42 = vpop.permute.xlu1 %1127  ;;  %v1610_v57 = vrot.slane %v1608_v41, 1  ;;  %v3737_v41 = vld [vmem:[%s4113_s12] sm:$0xff]  }
 0x111   : > { %v4734_v47 = vsel %vm2024_vm6, %v4562_v43, %v1128_v42  ;;  %v1126_v39 = vpop.permute.xlu0 %1125  ;;  %v2412_v42 = vshrl.u32 %v4659_v12, 16  ;;  %v1777_v12 = vshrl.u32 %v3737_v41, 16 }
 0x112   : > { %2448 = vrot.lane.b32.xlu1 %v2396_v11, %s3802_s30  ;;  %v4745_v63 = vsel %vm2024_vm6, %v4575_v60, %v1126_v39  ;;  %v1606_v11 = vor.u32 %v1605_v36, %v1601_v49  ;;  %v1613_v60 = vshrl.u32 %v3731_v18, 16  ;;  %v1617_v39 = vrot.slane %v1615_v5, 1  ;;  %v4768_v36 = vld [vmem:[%s4242_s17 + $0x68] ss:$0 sps:$4 sm:$0x11]  }
 0x113   : > { %2476 = vrot.lane.b32.xlu0 %v2410_v27, %s3802_s30  ;;  %v4765_v49 = vsel %vm6112_vm0, %v1522_v54, %v1526_v31  ;;  %v1622_v31 = vrot.slane %v1620_v19, 1  ;;  %v2398_v54 = vshrl.u32 %v4689_v16, 16  ;;  %v1779_v16 = vshll.u32 %v3737_v41, 16 }
 0x114   : > { %v1132_v43 = vpop.permute.xlu1 %1131  ;;  %6152 = vst [vmem:[#allocation38_spill] sm:$0xff] %v4765_v49  ;;  %v1618_v27 = vor.u32 %v1617_v39, %v1613_v60  ;;  %v4800_v39 = vld [vmem:[%s4113_s12 + $0x8] ss:$0 sps:$4 sm:$0x11]  }
 0x115   : > { %v4754_v45 = vsel %vm2024_vm6, %v4584_v51, %v1132_v43  ;;  %v1130_v29 = vpop.permute.xlu0 %1129  ;;  %v4771_v51 = vld [vmem:[%s4242_s17 + $0x6c] sm:$0xff]   ;;  %v1529_v43 = vshrl.u32 %v4741_v52, 16  ;;  %v1781_v37 = vrot.slane %v1779_v16, 1 }
 0x116   : > { %2450 = vrot.lane.b32.xlu1 %v4748_v7, %s3802_s30  ;;  %v4762_v23 = vsel %vm2024_vm6, %v4593_v22, %v1130_v29  ;;  %v4780_v22 = vsel %vm6112_vm0, %v1606_v11, %v1610_v57  ;;  %v4792_v57 = vld [vmem:[%s4242_s17 + $0x74] ss:$0 sps:$4 sm:$0x11]   ;;  %v1543_v11 = vshll.u32 %v4771_v51, 16  ;;  %v4803_v19 = vsel %vm6112_vm0, %v1618_v27, %v1622_v31 }
 0x117   : > { %2480 = vrot.lane.b32.xlu0 %v2412_v42, %s3802_s30  ;;  %6153 = vst [vmem:[#allocation39_spill] sm:$0xff] %v4780_v22  ;;  %v1533_v42 = vrot.slane %v1531_v38, 1  ;;  %6155 = vst [vmem:[#allocation41_spill] sm:$0xff] %v4803_v19  ;;  %v3739_v38 = vld [vmem:[%s4113_s12 + $0xc] sm:$0xff]   ;;  %v2414_v31 = vshrl.u32 %v4717_v24, 16 }
 0x118   : > { %v1136_v18 = vpop.permute.xlu1 %1135  ;;  %v1545_v7 = vrot.slane %v1543_v11, 1 }
 0x119   : > { %v4777_v48 = vsel %vm2024_vm6, %v4611_v4, %v1136_v18  ;;  %v1134_v5 = vpop.permute.xlu0 %1133  ;;  %v1536_v4 = vshll.u32 %v4768_v36, 16  ;;  %v2400_v18 = vshrl.u32 %v4710_v25, 16 }
 0x11a   : > { %2454 = vrot.lane.b32.xlu1 %v4765_v49, %s3802_s30  ;;  %v4788_v29 = vsel %vm2024_vm6, %v4622_v1, %v1134_v5  ;;  %v1534_v5 = vor.u32 %v1533_v42, %v1529_v43  ;;  %v2423_v43 = vshll.u32 %v3739_v38, 16 }
 0x11b   : > { %2482 = vrot.lane.b32.xlu0 %v4780_v22, %s3802_s30  ;;  %v1538_v49 = vrot.slane %v1536_v4, 1  ;;  %v1541_v22 = vshrl.u32 %v4771_v51, 16 }
 0x11c   : > { %v4797_v60 = vpop.permute.xlu1 %1139  ;;  %v2425_v59 = vrot.slane %v2423_v43, 1 }
 0x11d   : > { %6154 = vst [vmem:[#allocation40_spill] sm:$0xff] %v4797_v60  ;;  %v4806_v1 = vpop.permute.xlu0 %1137  ;;  %v1548_v60 = vshll.u32 %v4792_v57, 16  ;;  %v4827_v11 = vsel %vm6112_vm0, %v1534_v5, %v1538_v49  ;;  %v1546_v24 = vor.u32 %v1545_v7, %v1541_v22 }
 0x11e   : > { %6156 = vst [vmem:[#allocation42_spill] sm:$0xff] %v4806_v1  ;;  %2452 = vrot.lane.b32.xlu1 %v2398_v54, %s3802_s30  ;;  %v1784_v1 = vshll.u32 %v4800_v39, 16  ;;  %v3740_v54 = vld [vmem:[%s4113_s12 + $0x14] ss:$0 sps:$4 sm:$0x11]   ;;  %6157 = vst [vmem:[#allocation43_spill] sm:$0xff] %v4827_v11 }
 0x11f   : > { %2486 = vrot.lane.b32.xlu0 %v4803_v19, %s3802_s30  ;;  %v1550_v41 = vrot.slane %v1548_v60, 1 }
 0x120   : > { %v1144_v27 = vpop.permute.xlu1 %1143  ;;  %v1786_v19 = vrot.slane %v1784_v1, 1  ;;  %v2404_v1 = vshrl.u32 %v4792_v57, 16 }
 0x121   : > { %v4818_v25 = vsel %vm2024_vm6, %v4656_v13, %v1144_v27  ;;  %v1142_v42 = vpop.permute.xlu0 %1141  ;;  %v2416_v13 = vshrl.u32 %v4737_v28, 16  ;;  %v1782_v27 = vor.u32 %v1781_v37, %v1777_v12  ;;  %v4842_v49 = vsel %vm6112_vm0, %v1546_v24, %v1550_v41  ;;  %v3741_v24 = vld [vmem:[%s4242_s17] sm:$0xff]  }
 0x122   : > { %2456 = vrot.lane.b32.xlu1 %v2400_v18, %s3802_s30  ;;  %v4824_v4 = vsel %vm2024_vm6, %v4666_v32, %v1142_v42  ;;  %v2421_v18 = vshrl.u32 %v3739_v38, 16  ;;  %v2428_v32 = vshll.u32 %v3740_v54, 16 }
 0x123   : > { %2484 = vrot.lane.b32.xlu0 %v2414_v31, %s3802_s30 }
 0x124   : > { %v1148_v16 = vpop.permute.xlu1 %1147  ;;  %v2426_v28 = vor.u32 %v2425_v59, %v2421_v18  ;;  %v2430_v22 = vrot.slane %v2428_v32, 1  ;;  %v3743_v32 = vld [vmem:[%s4242_s17 + $0x8] ss:$0 sps:$4 sm:$0x11]  }
 0x125   : > { %v4833_v26 = vsel %vm2024_vm6, %v4675_v30, %v1148_v16  ;;  %v1146_v42 = vpop.permute.xlu0 %1145  ;;  %v4850_v30 = vsel %vm6112_vm0, %v1782_v27, %v1786_v19 }
 0x126   : > { %2458 = vrot.lane.b32.xlu1 %v4827_v11, %s3802_s30  ;;  %v4839_v7 = vsel %vm2024_vm6, %v4683_v15, %v1146_v42  ;;  %6158 = vst [vmem:[#allocation44_spill] sm:$0xff] %v4850_v30  ;;  %v2402_v15 = vshrl.u32 %v4768_v36, 16  ;;  %v2431_v19 = vsel %vm6112_vm0, %v2426_v28, %v2430_v22  ;;  %v1440_v28 = vshll.u32 %v3743_v32, 16  ;;  %v3744_v22 = vld [vmem:[%s4242_s17 + $0x14] ss:$0 sps:$4 sm:$0x11]  }
 0x127   : > { %2488 = vrot.lane.b32.xlu0 %v2416_v13, %s3802_s30  ;;  %v2432_v13 = vshrl.u32 %v3740_v54, 16 }
 0x128   : > { %v1152_v37 = vpop.permute.xlu1 %1151 }
 0x129   : > { %v4847_v12 = vsel %vm2024_vm6, %v4696_v61, %v1152_v37  ;;  %v1150_v60 = vpop.permute.xlu0 %1149 }
 0x12a   : > { %2462 = vrot.lane.b32.xlu1 %v4842_v49, %s3802_s30  ;;  %v4857_v38 = vsel %vm2024_vm6, %v4706_v9, %v1150_v60  ;;  %v2418_v9 = vshrl.u32 %v4800_v39, 16 }
 0x12b   : > { %2490 = vrot.lane.b32.xlu0 %v4850_v30, %s3802_s30 }
 0x12c   : > { %v4861_v61 = vpop.permute.xlu1 %1160 }
 0x12d   : > { %v4864_v59 = vpop.permute.xlu0 %1158 }
 0x12e   : > { %2460 = vrot.lane.b32.xlu1 %v2402_v15, %s3802_s30 }
 0x12f   : > { %2494 = vrot.lane.b32.xlu0 %v2431_v19, %s3802_s30  ;;  %v1442_v19 = vrot.slane %v1440_v28, 1 }
 0x130   : > { %v1165_v5 = vpop.permute.xlu1 %1164 }
 0x131   : > { %v4872_v31 = vsel %vm2057_vm7, %v4734_v47, %v1165_v5  ;;  %v1163_v43 = vpop.permute.xlu0 %1162  ;;  %v1435_v47 = vshll.u32 %v3741_v24, 16  ;;  %v1452_v5 = vshll.u32 %v3744_v22, 16 }
 0x132   : > { %6159 = vst [vmem:[#allocation45_spill] sm:$0xff] %v4872_v31  ;;  %2464 = vrot.lane.b32.xlu1 %v2404_v1, %s3802_s30  ;;  %v4878_v41 = vsel %vm2057_vm7, %v4745_v63, %v1163_v43  ;;  %v4892_v63 = vld [vmem:[%s4242_s17 + $0xc] sm:$0xff]  }
 0x133   : > { %2492 = vrot.lane.b32.xlu0 %v2418_v9, %s3802_s30  ;;  %v1437_v37 = vrot.slane %v1435_v47, 1  ;;  %v1447_v60 = vshll.u32 %v4892_v63, 16  ;;  %v1445_v1 = vshrl.u32 %v4892_v63, 16  ;;  %v1454_v47 = vrot.slane %v1452_v5, 1 }
 0x134   : > { %v1169_v16 = vpop.permute.xlu1 %1168 }
 0x135   : > { %v4883_v39 = vsel %vm2057_vm7, %v4754_v45, %v1169_v16  ;;  %v1167_v27 = vpop.permute.xlu0 %1166 }
 0x136   : > { %6160 = vst [vmem:[#allocation46_spill] sm:$0xff] %v4883_v39  ;;  %1240 = vrot.lane.b32.xlu1 %v4139_v56, %s3809_s26  ;;  %v4889_v18 = vsel %vm2057_vm7, %v4762_v23, %v1167_v27  ;;  %v1433_v56 = vshrl.u32 %v3741_v24, 16  ;;  %v3751_v39 = vld [vmem:[%s4242_s17 + $0x30] sm:$0xff]  }
 0x137   : > { %6161 = vst [vmem:[#allocation47_spill] sm:$0xff] %v4889_v18  ;;  %2496 = vrot.lane.b32.xlu0 %v2432_v13, %s3802_s30  ;;  %s3812_s30 = smov 44   ;;  %v3757_v18 = vld [vmem:[%s4242_s17 + $0xa4] ss:$0 sps:$4 sm:$0x11]  }
 0x138   : > { %v1173_v54 = vpop.permute.xlu1 %1172 }
 0x139   : > { %v4898_v45 = vsel %vm2057_vm7, %v4777_v48, %v1173_v54  ;;  %v1171_v42 = vpop.permute.xlu0 %1170 }
 0x13a   : > { %6162 = vst [vmem:[#allocation48_spill] sm:$0xff] %v4898_v45  ;;  %1242 = vrot.lane.b32.xlu1 %v4133_v53, %s3809_s26  ;;  %v4904_v23 = vsel %vm2057_vm7, %v4788_v29, %v1171_v42  ;;  %v1438_v53 = vor.u32 %v1437_v37, %v1433_v56  ;;  %v1449_v29 = vrot.slane %v1447_v60, 1  ;;  %v1656_v56 = vrot.slane %v3741_v24, 1 }
 0x13b   : > { %6163 = vst [vmem:[#allocation49_spill] sm:$0xff] %v4904_v23  ;;  %1256 = vrot.lane.b32.xlu0 %v4195_v50, %s3809_s26  ;;  %v1657_v37 = vrot.slane %v3743_v32, 1  ;;  %v1660_v32 = vrot.slane %v3744_v22, 1 }
 0x13c   : > { %v4910_v15 = vpop.permute.xlu1 %1176  ;;  %v1443_v13 = vsel %vm6112_vm0, %v1438_v53, %v1442_v19  ;;  %v1450_v27 = vor.u32 %v1449_v29, %v1445_v1  ;;  %v1681_v1 = vrot.slane %v4768_v36, 1 }
 0x13d   : > { %v4912_v48 = vpop.permute.xlu0 %1174 }
 0x13e   : > { %1352 = vrot.lane.b32.xlu1 %v3741_v24, %s3810_s27  ;;  %v1455_v42 = vsel %vm6112_vm0, %v1450_v27, %v1454_v47  ;;  %v1659_v24 = vrot.slane %v4892_v63, 1 }
 0x13f   : > { %1258 = vrot.lane.b32.xlu0 %v4188_v6, %s3809_s26 }
 0x140   : > { %v1181_v9 = vpop.permute.xlu1 %1180 }
 0x141   : > { %v4920_v50 = vsel %vm2057_vm7, %v4818_v25, %v1181_v9  ;;  %v1179_v43 = vpop.permute.xlu0 %1178  ;;  %v1683_v9 = vrot.slane %v4771_v51, 1 }
 0x142   : > { %6164 = vst [vmem:[#allocation50_spill] sm:$0xff] %v4920_v50  ;;  %1354 = vrot.lane.b32.xlu1 %v4892_v63, %s3810_s27  ;;  %v4926_v16 = vsel %vm2057_vm7, %v4824_v4, %v1179_v43 }
 0x143   : > { %6165 = vst [vmem:[#allocation51_spill] sm:$0xff] %v4926_v16  ;;  %1368 = vrot.lane.b32.xlu0 %v4741_v52, %s3810_s27  ;;  %v6205_v16 = vld [vmem:[#allocation35_spill] sm:$0xff] }
 0x144   : > { %v1185_v6 = vpop.permute.xlu1 %1184 }
 0x145   : > { %v4933_v25 = vsel %vm2057_vm7, %v4833_v26, %v1185_v6  ;;  %v1183_v54 = vpop.permute.xlu0 %1182 }
 0x146   : > { %6166 = vst [vmem:[#allocation52_spill] sm:$0xff] %v4933_v25  ;;  %1624 = vrot.lane.b32.xlu1 %v1443_v13, %s3811_s29  ;;  %v4938_v4 = vsel %vm2057_vm7, %v4839_v7, %v1183_v54  ;;  %v1658_v7 = vsel %vm6113_vm1, %v1656_v56, %v1657_v37  ;;  %v1662_v37 = vrot.slane %v4484_v34, 1 }
 0x147   : > { %6167 = vst [vmem:[#allocation53_spill] sm:$0xff] %v4938_v4  ;;  %1370 = vrot.lane.b32.xlu0 %v4771_v51, %s3810_s27 }
 0x148   : > { %v1189_v28 = vpop.permute.xlu1 %1188 }
 0x149   : > { %v4945_v26 = vsel %vm2057_vm7, %v4847_v12, %v1189_v28  ;;  %v1187_v60 = vpop.permute.xlu0 %1186  ;;  %v1680_v12 = vrot.slane %v4741_v52, 1  ;;  %v1684_v52 = vrot.slane %v4792_v57, 1 }
 0x14a   : > { %6168 = vst [vmem:[#allocation54_spill] sm:$0xff] %v4945_v26  ;;  %1626 = vrot.lane.b32.xlu1 %v1455_v42, %s3811_s29  ;;  %v4950_v53 = vsel %vm2057_vm7, %v4857_v38, %v1187_v60  ;;  %v1661_v38 = vsel %vm6113_vm1, %v1659_v24, %v1660_v32  ;;  %v3745_v60 = vld [vmem:[%s6076_s4 + $0x20] ss:$0 sps:$4 sm:$0xff]   ;;  %v1686_v32 = vrot.slane %v4518_v20, 1 }
 0x14b   : > { %6169 = vst [vmem:[#allocation55_spill] sm:$0xff] %v4950_v53  ;;  %1640 = vrot.lane.b32.xlu0 %v4827_v11, %s3811_s29  ;;  %v4969_v5 = vsel %vm6113_vm1, %v1680_v12, %v1681_v1  ;;  %v1685_v13 = vsel %vm6113_vm1, %v1683_v9, %v1684_v52  ;;  %3629 = vmatprep.subr.msk.bf16.mxu0 %vm2863_vm8, %v3745_v60  ;;  %v1687_v12 = vrot.slane %v4544_v21, 1 }
 0x14c   : > { %v4956_v19 = vpop.permute.xlu1 %1207  ;;  %6171 = vst [vmem:[#allocation57_spill] sm:$0xff] %v4969_v5  ;;  %3630 = vmatprep.subr.msk.bf16.mxu1 %vm2863_vm8, %v3745_v60 }
 0x14d   : > { %v4960_v29 = vpop.permute.xlu0 %1205 }
 0x14e   : > { %1704 = vrot.lane.b32.xlu1 %v1658_v7, %s3812_s30 }
 0x14f   : > { %1642 = vrot.lane.b32.xlu0 %v4842_v49, %s3811_s29 }
 0x150   : > { %v4966_v22 = vpop.permute.xlu1 %1211 }
 0x151   : > { %6170 = vst [vmem:[#allocation56_spill] sm:$0xff] %v4966_v22  ;;  %v4973_v36 = vpop.permute.xlu0 %1209  ;;  %v6203_v22 = vld [vmem:[#allocation16_spill] sm:$0xff] }
 0x152   : > { %1706 = vrot.lane.b32.xlu1 %v1661_v38, %s3812_s30 }
 0x153   : > { %1720 = vrot.lane.b32.xlu0 %v4969_v5, %s3812_s30  ;;  %v6192_v5 = vld [vmem:[#allocation29_spill] sm:$0xff] }
 0x154   : > { %v4978_v43 = vpop.permute.xlu1 %1215 }
 0x155   : > { %6172 = vst [vmem:[#allocation58_spill] sm:$0xff] %v4978_v43  ;;  %v4981_v27 = vpop.permute.xlu0 %1213  ;;  %v3752_v43 = vld [vmem:[%s4242_s17 + $0x90] sm:$0xff]  }
 0x156   : > { %6173 = vst [vmem:[#allocation59_spill] sm:$0xff] %v4981_v27  ;;  %1741 = vrot.lane.b32.xlu1 %v4892_v63, %s3813_s7  ;;  %v1696_v27 = vrot.slane %v3757_v18, 1 }
 0x157   : > { %1722 = vrot.lane.b32.xlu0 %v1685_v13, %s3812_s30 }
 0x158   : > { %v4986_v57 = vpop.permute.xlu1 %1219 }
 0x159   : > { %6174 = vst [vmem:[#allocation60_spill] sm:$0xff] %v4986_v57  ;;  %v4988_v47 = vpop.permute.xlu0 %1217 }
 0x15a   : > { %6175 = vst [vmem:[#allocation61_spill] sm:$0xff] %v4988_v47  ;;  %1743 = vrot.lane.b32.xlu1 %v4484_v34, %s3813_s7 }
 0x15b   : > { %1757 = vrot.lane.b32.xlu0 %v4771_v51, %s3813_s7  ;;  %v1663_v51 = vrot.slane %v4501_v10, 1 }
 0x15c   : > { %v4994_v6 = vpop.permute.xlu1 %1223 }
 0x15d   : > { %v4996_v54 = vpop.permute.xlu0 %1221  ;;  %v5020_v7 = vsel %vm6113_vm1, %v1662_v37, %v1663_v51  ;;  %v5037_v37 = vsel %vm6113_vm1, %v1686_v32, %v1687_v12 }
 0x15e   : > { %1788 = vrot.lane.b32.xlu1 %v1455_v42, %s3814_s8 }
 0x15f   : > { %1759 = vrot.lane.b32.xlu0 %v4518_v20, %s3813_s7 }
 0x160   : > { %v5001_v63 = vpop.permute.xlu1 %1227 }
 0x161   : > { %6176 = vst [vmem:[#allocation62_spill] sm:$0xff] %v5001_v63  ;;  %v5003_v56 = vpop.permute.xlu0 %1225 }
 0x162   : > { %6177 = vst [vmem:[#allocation63_spill] sm:$0xff] %v5003_v56  ;;  %1790 = vrot.lane.b32.xlu1 %v4578_v3, %s3814_s8 }
 0x163   : > { %1804 = vrot.lane.b32.xlu0 %v4842_v49, %s3814_s8  ;;  %v2865_v49 = vsel %vm2863_vm8, %v3745_v60, 0  ;;  %v3747_v60 = vld [vmem:[%s6076_s4 + $0x10] sm:$0xff]   ;;  %vm2321_vm8 = vcmask 457728  }
 0x164   : > { %v5011_v28 = vpop.permute.xlu1 %1231  ;;  %3578 = vmatpush3.bf16.msra.mxu0 %v2865_v49  ;;  %3624 = vmatpush3.bf16.msra.mxu1 %v2865_v49 }
 0x165   : > { %6178 = vst [vmem:[#allocation64_spill] sm:$0xff] %v5011_v28  ;;  %v5013_v42 = vpop.permute.xlu0 %1229 }
 0x166   : > { %6179 = vst [vmem:[#allocation65_spill] sm:$0xff] %v5013_v42  ;;  %1823 = vrot.lane.b32.xlu1 %v1661_v38, %s3815_s10  ;;  %v3746_v38 = vld [vmem:[%s6076_s4 + $0x18] sm:$0xff]  }
 0x167   : > { %1806 = vrot.lane.b32.xlu0 %v4614_v62, %s3814_s8  ;;  %3579 = vmatprep.subr.bf16.mxu0 %v3746_v38  ;;  %v6204_v42 = vld [vmem:[#allocation21_spill] sm:$0xff] }
 0x168   : > { %v2435_v24 = vpop.permute.xlu1 %2434  ;;  %3580 = vmatpush3.bf16.msra.mxu0 %v3746_v38  ;;  %3620 = vmatprep.subr.bf16.mxu1 %v3746_v38 }
 0x169   : > { %v5026_v1 = vpop.permute.xlu0 %1233  ;;  %v2499_v9 = vsel %vm1892_vm2, %v4484_v34, %v2435_v24  ;;  %3625 = vmatpush3.bf16.msra.mxu1 %v3746_v38  ;;  %3581 = vmatprep.subr.bf16.mxu0 %v3747_v60  ;;  %v3748_v38 = vld [vmem:[%s6076_s4 + $0x8] sm:$0xff]  }
 0x16a   : > { %6180 = vst [vmem:[#allocation66_spill] sm:$0xff] %v5026_v1  ;;  %1825 = vrot.lane.b32.xlu1 %v5020_v7, %s3815_s10  ;;  %v2564_v24 = vshll.u32 %v2499_v9, 16  ;;  %3621 = vmatprep.subr.bf16.mxu1 %v3747_v60 }
 0x16b   : > { %1839 = vrot.lane.b32.xlu0 %v1685_v13, %s3815_s10 }
 0x16c   : > { %v2439_v52 = vpop.permute.xlu1 %2438  ;;  %3582 = vmatpush3.bf16.msra.mxu0 %v3747_v60  ;;  %v2566_v57 = vrot.slane %v2564_v24, 1 }
 0x16d   : > { %v2467_v51 = vpop.permute.xlu0 %2466  ;;  %3626 = vmatpush3.bf16.msra.mxu1 %v3747_v60  ;;  %3583 = vmatprep.subr.bf16.mxu0 %v3748_v38 }
 0x16e   : > { %1860 = vrot.lane.b32.xlu1 %v4484_v34, %s3816_s16  ;;  %v2531_v32 = vsel %vm1892_vm2, %v4518_v20, %v2467_v51  ;;  %3622 = vmatprep.subr.bf16.mxu1 %v3748_v38 }
 0x16f   : > { %1841 = vrot.lane.b32.xlu0 %v5037_v37, %s3815_s10  ;;  %v2644_v23 = vshll.u32 %v2531_v32, 16 }
 0x170   : > { %v2437_v13 = vpop.permute.xlu1 %2436  ;;  %3584 = vmatpush3.bf16.msra.mxu0 %v3748_v38 }
 0x171   : > { %v2501_v49 = vsel %vm1892_vm2, %v4501_v10, %v2437_v13  ;;  %v2471_v45 = vpop.permute.xlu0 %2470  ;;  %v2562_v13 = vshrl.u32 %v2499_v9, 16  ;;  %3627 = vmatpush3.bf16.msra.mxu1 %v3748_v38  ;;  %v2503_v9 = vsel %vm1892_vm2, %v4511_v2, %v2439_v52  ;;  %v2646_v1 = vrot.slane %v2644_v23, 1 }
 0x172   : > { %v2568_v12 = vshll.u32 %v2501_v49, 16  ;;  %1244 = vrot.lane.b32.xlu1 %v4153_v33, %s3809_s26  ;;  %v3749_v33 = vld [vmem:[%s6076_s4] sm:$0xff]   ;;  %v2642_v52 = vshrl.u32 %v2531_v32, 16 }
 0x173   : > { %1876 = vrot.lane.b32.xlu0 %v4518_v20, %s3816_s16  ;;  %v2567_v60 = vor.u32 %v2566_v57, %v2562_v13  ;;  %3585 = vmatprep.subr.bf16.mxu0 %v3749_v33 }
 0x174   : > { %v2441_v10 = vpop.permute.xlu1 %2440  ;;  %v2570_v47 = vrot.slane %v2568_v12, 1  ;;  %v6181_v12 = vld [vmem:[#allocation8_spill] sm:$0xff]  ;;  %3586 = vmatpush3.bf16.msra.mxu0 %v3749_v33  ;;  %3623 = vmatprep.subr.bf16.mxu1 %v3749_v33  ;;  %v2647_v23 = vor.u32 %v2646_v1, %v2642_v52  ;;  %v2572_v1 = vshrl.u32 %v2503_v9, 16 }
 0x175   : > { %v2469_v51 = vpop.permute.xlu0 %2468  ;;  %v2505_v57 = vsel %vm1892_vm2, %v4536_v14, %v2441_v10  ;;  %3628 = vmatpush3.bf16.msra.mxu1 %v3749_v33  ;;  %v6182_v10 = vld [vmem:[#allocation2_spill] sm:$0xff] }
 0x176   : > { %1862 = vrot.lane.b32.xlu1 %v4511_v2, %s3816_s16  ;;  %v2533_v24 = vsel %vm1892_vm2, %v4544_v21, %v2469_v51  ;;  %v2571_v26 = vsel %vm6112_vm0, %v2567_v60, %v2570_v47  ;;  %v2574_v21 = vshll.u32 %v2503_v9, 16  ;;  %v2578_v47 = vshll.u32 %v2505_v57, 16 }
 0x177   : > { %v2648_v49 = vshll.u32 %v2533_v24, 16  ;;  %1260 = vrot.lane.b32.xlu0 %v6181_v12, %s3809_s26  ;;  %v2535_v60 = vsel %vm1892_vm2, %v4548_v58, %v2471_v45 }
 0x178   : > { %v5068_v53 = vpop.permute.xlu1 %2442  ;;  %v2654_v12 = vshll.u32 %v2535_v60, 16  ;;  %v2580_v57 = vrot.slane %v2578_v47, 1  ;;  %v2652_v9 = vshrl.u32 %v2535_v60, 16 }
 0x179   : > { %v2473_v38 = vpop.permute.xlu0 %2472  ;;  %v2650_v13 = vrot.slane %v2648_v49, 1 }
 0x17a   : > { %2722 = vrot.lane.b32.xlu1 %v2571_v26, %s3817_s15  ;;  %v2576_v26 = vrot.slane %v2574_v21, 1  ;;  %v2537_v32 = vsel %vm1892_vm2, %v4565_v44, %v2473_v38  ;;  %v6183_v21 = vld [vmem:[#allocation7_spill] sm:$0xff]  ;;  %v2656_v38 = vrot.slane %v2654_v12, 1 }
 0x17b   : > { %1878 = vrot.lane.b32.xlu0 %v4548_v58, %s3816_s16  ;;  %v2651_v33 = vsel %vm6112_vm0, %v2647_v23, %v2650_v13 }
 0x17c   : > { %v5076_v51 = vpop.permute.xlu1 %2446  ;;  %v2577_v45 = vor.u32 %v2576_v26, %v2572_v1  ;;  %v2657_v26 = vor.u32 %v2656_v38, %v2652_v9  ;;  %v1689_v9 = vrot.slane %v4548_v58, 1 }
 0x17d   : > { %v5080_v24 = vpop.permute.xlu0 %2474 }
 0x17e   : > { %1246 = vrot.lane.b32.xlu1 %v6182_v10, %s3809_s26  ;;  %v2658_v10 = vshll.u32 %v2537_v32, 16  ;;  %v2581_v23 = vsel %vm6112_vm0, %v2577_v45, %v2580_v57  ;;  %v1665_v45 = vrot.slane %v4511_v2, 1 }
 0x17f   : > { %2738 = vrot.lane.b32.xlu0 %v2651_v33, %s3817_s15 }
 0x180   : > { %v5088_v49 = vpop.permute.xlu1 %2444  ;;  %v2660_v47 = vrot.slane %v2658_v10, 1  ;;  %v1666_v10 = vrot.slane %v4536_v14, 1  ;;  %v1690_v14 = vrot.slane %v4565_v44, 1 }
 0x181   : > { %v5090_v52 = vpop.permute.xlu0 %2478 }
 0x182   : > { %1356 = vrot.lane.b32.xlu1 %v4484_v34, %s3810_s27  ;;  %v2661_v1 = vsel %vm6112_vm0, %v2657_v26, %v2660_v47  ;;  %v1667_v38 = vsel %vm6113_vm1, %v1665_v45, %v1666_v10 }
 0x183   : > { %1262 = vrot.lane.b32.xlu0 %v6183_v21, %s3809_s26 }
 0x184   : > { %v5096_v13 = vpop.permute.xlu1 %2448 }
 0x185   : > { %v5099_v33 = vpop.permute.xlu0 %2476 }
 0x186   : > { %2724 = vrot.lane.b32.xlu1 %v2581_v23, %s3817_s15 }
 0x187   : > { %1372 = vrot.lane.b32.xlu0 %v4518_v20, %s3810_s27 }
 0x188   : > { %v5104_v34 = vpop.permute.xlu1 %2450 }
 0x189   : > { %v5106_v32 = vpop.permute.xlu0 %2480 }
 0x18a   : > { %1358 = vrot.lane.b32.xlu1 %v4511_v2, %s3810_s27 }
 0x18b   : > { %2740 = vrot.lane.b32.xlu0 %v2661_v1, %s3817_s15 }
 0x18c   : > { %v5112_v12 = vpop.permute.xlu1 %2454 }
 0x18d   : > { %v5114_v57 = vpop.permute.xlu0 %2482 }
 0x18e   : > { %1628 = vrot.lane.b32.xlu1 %v4578_v3, %s3811_s29 }
 0x18f   : > { %1374 = vrot.lane.b32.xlu0 %v4548_v58, %s3810_s27 }
 0x190   : > { %v5120_v20 = vpop.permute.xlu1 %2452 }
 0x191   : > { %v5122_v60 = vpop.permute.xlu0 %2486 }
 0x192   : > { %1630 = vrot.lane.b32.xlu1 %v4596_v35, %s3811_s29 }
 0x193   : > { %1644 = vrot.lane.b32.xlu0 %v4614_v62, %s3811_s29 }
 0x194   : > { %v5130_v21 = vpop.permute.xlu1 %2456 }
 0x195   : > { %v5132_v3 = vpop.permute.xlu0 %2484 }
 0x196   : > { %1708 = vrot.lane.b32.xlu1 %v5020_v7, %s3812_s30  ;;  %v1691_v7 = vsel %vm6113_vm1, %v1689_v9, %v1690_v14  ;;  %v1668_v9 = vrot.slane %v4571_v46, 1 }
 0x197   : > { %1646 = vrot.lane.b32.xlu0 %v4638_v55, %s3811_s29 }
 0x198   : > { %v5139_v23 = vpop.permute.xlu1 %2458 }
 0x199   : > { %6184 = vst [vmem:[#allocation8_spill] sm:$0xff] %v5139_v23  ;;  %v5143_v47 = vpop.permute.xlu0 %2488 }
 0x19a   : > { %1710 = vrot.lane.b32.xlu1 %v1667_v38, %s3812_s30 }
 0x19b   : > { %1724 = vrot.lane.b32.xlu0 %v5037_v37, %s3812_s30 }
 0x19c   : > { %v5148_v62 = vpop.permute.xlu1 %2462 }
 0x19d   : > { %6185 = vst [vmem:[#allocation2_spill] sm:$0xff] %v5148_v62  ;;  %v5151_v26 = vpop.permute.xlu0 %2490  ;;  %v1692_v62 = vrot.slane %v4607_v17, 1 }
 0x19e   : > { %6186 = vst [vmem:[#allocation7_spill] sm:$0xff] %v5151_v26  ;;  %1745 = vrot.lane.b32.xlu1 %v4511_v2, %s3813_s7 }
 0x19f   : > { %1726 = vrot.lane.b32.xlu0 %v1691_v7, %s3812_s30 }
 0x1a0   : > { %v5156_v1 = vpop.permute.xlu1 %2460 }
 0x1a1   : > { %6187 = vst [vmem:[#allocation67_spill] sm:$0xff] %v5156_v1  ;;  %v5158_v44 = vpop.permute.xlu0 %2494 }
 0x1a2   : > { %6188 = vst [vmem:[#allocation68_spill] sm:$0xff] %v5158_v44  ;;  %1747 = vrot.lane.b32.xlu1 %v4571_v46, %s3813_s7  ;;  %v1693_v44 = vrot.slane %v6192_v5, 1 }
 0x1a3   : > { %1761 = vrot.lane.b32.xlu0 %v4548_v58, %s3813_s7  ;;  %v1669_v58 = vrot.slane %v4599_v40, 1 }
 0x1a4   : > { %v5164_v37 = vpop.permute.xlu1 %2464 }
 0x1a5   : > { %6189 = vst [vmem:[#allocation69_spill] sm:$0xff] %v5164_v37  ;;  %v5166_v45 = vpop.permute.xlu0 %2492  ;;  %v5188_v37 = vsel %vm6113_vm1, %v1668_v9, %v1669_v58  ;;  %v5207_v9 = vsel %vm6113_vm1, %v1692_v62, %v1693_v44  ;;  %v2509_v58 = vsel %vm1892_vm2, %v4599_v40, %v5088_v49  ;;  %v2539_v62 = vsel %vm1892_vm2, %v4607_v17, %v5080_v24  ;;  %v6193_v40 = vld [vmem:[#allocation4_spill] sm:$0xff]  ;;  %v6194_v24 = vld [vmem:[#allocation26_spill] sm:$0xff] }
 0x1a6   : > { %6190 = vst [vmem:[#allocation70_spill] sm:$0xff] %v5166_v45  ;;  %1792 = vrot.lane.b32.xlu1 %v4596_v35, %s3814_s8  ;;  %v2664_v11 = vshll.u32 %v2539_v62, 16 }
 0x1a7   : > { %1763 = vrot.lane.b32.xlu0 %v4607_v17, %s3813_s7 }
 0x1a8   : > { %v5172_v2 = vpop.permute.xlu1 %1240 }
 0x1a9   : > { %v5174_v10 = vpop.permute.xlu0 %2496 }
 0x1aa   : > { %6191 = vst [vmem:[#allocation71_spill] sm:$0xff] %v5174_v10  ;;  %1794 = vrot.lane.b32.xlu1 %v4669_v8, %s3814_s8 }
 0x1ab   : > { %1808 = vrot.lane.b32.xlu0 %v4638_v55, %s3814_s8  ;;  %v2507_v55 = vsel %vm1892_vm2, %v4571_v46, %v5068_v53 }
 0x1ac   : > { %v5182_v14 = vpop.permute.xlu1 %1242  ;;  %v2584_v23 = vshll.u32 %v2507_v55, 16 }
 0x1ad   : > { %v5184_v35 = vpop.permute.xlu0 %1256 }
 0x1ae   : > { %1827 = vrot.lane.b32.xlu1 %v1667_v38, %s3815_s10  ;;  %v2586_v49 = vrot.slane %v2584_v23, 1  ;;  %v2511_v23 = vsel %vm1892_vm2, %v6194_v24, %v5076_v51  ;;  %v6197_v51 = vld [vmem:[#allocation30_spill] sm:$0xff] }
 0x1af   : > { %1810 = vrot.lane.b32.xlu0 %v4699_v0, %s3814_s8 }
 0x1b0   : > { %v5192_v10 = vpop.permute.xlu1 %1352 }
 0x1b1   : > { %v5196_v1 = vpop.permute.xlu0 %1258 }
 0x1b2   : > { %1829 = vrot.lane.b32.xlu1 %v5188_v37, %s3815_s10 }
 0x1b3   : > { %1843 = vrot.lane.b32.xlu0 %v1691_v7, %s3815_s10  ;;  %v2588_v7 = vshll.u32 %v2509_v58, 16  ;;  %v2582_v58 = vshrl.u32 %v2507_v55, 16 }
 0x1b4   : > { %v5204_v38 = vpop.permute.xlu1 %1354 }
 0x1b5   : > { %v5212_v45 = vpop.permute.xlu0 %1368  ;;  %v2590_v30 = vrot.slane %v2588_v7, 1  ;;  %v2587_v28 = vor.u32 %v2586_v49, %v2582_v58  ;;  %v6196_v7 = vld [vmem:[#allocation27_spill] sm:$0xff]  ;;  %v2594_v49 = vshll.u32 %v2511_v23, 16 }
 0x1b6   : > { %1864 = vrot.lane.b32.xlu1 %v4571_v46, %s3816_s16  ;;  %v2541_v46 = vsel %vm1892_vm2, %v6192_v5, %v5099_v33  ;;  %v6195_v5 = vld [vmem:[#allocation10_spill] sm:$0xff]  ;;  %v2666_v33 = vrot.slane %v2664_v11, 1  ;;  %v2513_v50 = vsel %vm1892_vm2, %v6196_v7, %v5096_v13  ;;  %v6198_v13 = vld [vmem:[#allocation3_spill] sm:$0xff] }
 0x1b7   : > { %1845 = vrot.lane.b32.xlu0 %v5207_v9, %s3815_s10  ;;  %v2591_v55 = vsel %vm6112_vm0, %v2587_v28, %v2590_v30  ;;  %v2543_v30 = vsel %vm1892_vm2, %v6197_v51, %v5090_v52 }
 0x1b8   : > { %v5218_v53 = vpop.permute.xlu1 %1624 }
 0x1b9   : > { %v5223_v44 = vpop.permute.xlu0 %1370 }
 0x1ba   : > { %1248 = vrot.lane.b32.xlu1 %v6193_v40, %s3809_s26  ;;  %v2668_v40 = vshll.u32 %v2541_v46, 16  ;;  %v2662_v46 = vshrl.u32 %v2539_v62, 16 }
 0x1bb   : > { %1880 = vrot.lane.b32.xlu0 %v4607_v17, %s3816_s16 }
 0x1bc   : > { %v5232_v26 = vpop.permute.xlu1 %1626  ;;  %v2670_v58 = vrot.slane %v2668_v40, 1  ;;  %v2667_v11 = vor.u32 %v2666_v33, %v2662_v46  ;;  %v6199_v40 = vld [vmem:[#allocation32_spill] sm:$0xff]  ;;  %v2674_v46 = vshll.u32 %v2543_v30, 16 }
 0x1bd   : > { %v5234_v25 = vpop.permute.xlu0 %1640  ;;  %v2545_v7 = vsel %vm1892_vm2, %v6199_v40, %v5106_v32 }
 0x1be   : > { %1866 = vrot.lane.b32.xlu1 %v6194_v24, %s3816_s16  ;;  %v2671_v62 = vsel %vm6112_vm0, %v2667_v11, %v2670_v58  ;;  %v2678_v58 = vshll.u32 %v2545_v7, 16  ;;  %v6200_v11 = vld [vmem:[#allocation9_spill] sm:$0xff] }
 0x1bf   : > { %1264 = vrot.lane.b32.xlu0 %v6195_v5, %s3809_s26  ;;  %v2598_v5 = vshll.u32 %v2513_v50, 16  ;;  %v2592_v50 = vshrl.u32 %v2511_v23, 16 }
 0x1c0   : > { %v5243_v17 = vpop.permute.xlu1 %1704  ;;  %v2680_v40 = vrot.slane %v2678_v58, 1 }
 0x1c1   : > { %v5249_v63 = vpop.permute.xlu0 %1642  ;;  %v2600_v52 = vrot.slane %v2598_v5, 1  ;;  %v2672_v5 = vshrl.u32 %v2543_v30, 16 }
 0x1c2   : > { %2726 = vrot.lane.b32.xlu1 %v2591_v55, %s3817_s15  ;;  %v2596_v55 = vrot.slane %v2594_v49, 1 }
 0x1c3   : > { %1882 = vrot.lane.b32.xlu0 %v6197_v51, %s3816_s16 }
 0x1c4   : > { %v5254_v24 = vpop.permute.xlu1 %1706  ;;  %v2597_v49 = vor.u32 %v2596_v55, %v2592_v50  ;;  %v3753_v50 = vld [vmem:[%s4242_s17 + $0x3c] sm:$0xff]  }
 0x1c5   : > { %v5259_v28 = vpop.permute.xlu0 %1720 }
 0x1c6   : > { %1250 = vrot.lane.b32.xlu1 %v6198_v13, %s3809_s26  ;;  %v2676_v13 = vrot.slane %v2674_v46, 1 }
 0x1c7   : > { %2742 = vrot.lane.b32.xlu0 %v2671_v62, %s3817_s15  ;;  %v2601_v62 = vsel %vm6112_vm0, %v2597_v49, %v2600_v52 }
 0x1c8   : > { %v5268_v33 = vpop.permute.xlu1 %1741  ;;  %v2677_v55 = vor.u32 %v2676_v13, %v2672_v5  ;;  %v1671_v13 = vrot.slane %v3753_v50, 1 }
 0x1c9   : > { %v5270_v51 = vpop.permute.xlu0 %1722 }
 0x1ca   : > { %1360 = vrot.lane.b32.xlu1 %v3751_v39, %s3810_s27  ;;  %v2681_v46 = vsel %vm6112_vm0, %v2677_v55, %v2680_v40  ;;  %v3756_v40 = vld [vmem:[%s3880_s28] sm:$0xff]   ;;  %v6202_v55 = vld [vmem:[#allocation11_spill] sm:$0xff]  ;;  %vm2354_vm0 = vcmask 490496  }
 0x1cb   : > { %1266 = vrot.lane.b32.xlu0 %v6200_v11, %s3809_s26  ;;  %v6201_v11 = vld [vmem:[#allocation33_spill] sm:$0xff] }
 0x1cc   : > { %v5276_v32 = vpop.permute.xlu1 %1743 }
 0x1cd   : > { %v5279_v23 = vpop.permute.xlu0 %1757 }
 0x1ce   : > { %2728 = vrot.lane.b32.xlu1 %v2601_v62, %s3817_s15  ;;  %v3755_v62 = vld [vmem:[%s4242_s17 + $0x44] ss:$0 sps:$4 sm:$0x11]  }
 0x1cf   : > { %1376 = vrot.lane.b32.xlu0 %v3752_v43, %s3810_s27  ;;  %v5299_v43 = vld [vmem:[%s4242_s17 + $0x9c] sm:$0xff]   ;;  %v1672_v5 = vrot.slane %v3755_v62, 1 }
 0x1d0   : > { %v5284_v39 = vpop.permute.xlu1 %1788 }
 0x1d1   : > { %v5286_v7 = vpop.permute.xlu0 %1759  ;;  %v5324_v62 = vsel %vm6113_vm1, %v1671_v13, %v1672_v5  ;;  %v6208_v5 = vld [vmem:[#allocation14_spill] sm:$0xff] }
 0x1d2   : > { %1362 = vrot.lane.b32.xlu1 %v3753_v50, %s3810_s27 }
 0x1d3   : > { %2744 = vrot.lane.b32.xlu0 %v2681_v46, %s3817_s15  ;;  %v1894_v46 = vsel %vm1892_vm2, %v3756_v40, %v6202_v55  ;;  %v6206_v40 = vld [vmem:[#allocation25_spill] sm:$0xff] }
 0x1d4   : > { %v5292_v52 = vpop.permute.xlu1 %1790  ;;  %v1927_v4 = vsel %vm1925_vm3, %v1894_v46, %v6203_v22  ;;  %v6207_v22 = vld [vmem:[#allocation36_spill] sm:$0xff] }
 0x1d5   : > { %v5294_v30 = vpop.permute.xlu0 %1804 }
 0x1d6   : > { %1632 = vrot.lane.b32.xlu1 %v4669_v8, %s3811_s29 }
 0x1d7   : > { %1378 = vrot.lane.b32.xlu0 %v5299_v43, %s3810_s27 }
 0x1d8   : > { %v5303_v49 = vpop.permute.xlu1 %1823 }
 0x1d9   : > { %v5305_v58 = vpop.permute.xlu0 %1806 }
 0x1da   : > { %1634 = vrot.lane.b32.xlu1 %v6201_v11, %s3811_s29 }
 0x1db   : > { %1648 = vrot.lane.b32.xlu0 %v4699_v0, %s3811_s29  ;;  %v1960_v0 = vsel %vm1958_vm4, %v1927_v4, %v6204_v42  ;;  %v3758_v42 = vld [vmem:[%s3880_s28 + $0x60] sm:$0xff]  }
 0x1dc   : > { %v5312_v8 = vpop.permute.xlu1 %1825  ;;  %v1993_v55 = vsel %vm1991_vm5, %v1960_v0, %v6206_v40  ;;  %v1910_v0 = vsel %vm1892_vm2, %v3758_v42, %v6208_v5  ;;  %v6210_v42 = vld [vmem:[#allocation23_spill] sm:$0xff] }
 0x1dd   : > { %v5317_v31 = vpop.permute.xlu0 %1839  ;;  %v2026_v46 = vsel %vm2024_vm6, %v1993_v55, %v6207_v22  ;;  %v6209_v55 = vld [vmem:[#allocation19_spill] sm:$0xff] }
 0x1de   : > { %1712 = vrot.lane.b32.xlu1 %v5188_v37, %s3812_s30  ;;  %v1695_v37 = vrot.slane %v5299_v43, 1  ;;  %v2059_v4 = vsel %vm2057_vm7, %v2026_v46, %v4864_v59  ;;  %v1943_v22 = vsel %vm1925_vm3, %v1910_v0, %v6209_v55 }
 0x1df   : > { %1650 = vrot.lane.b32.xlu0 %v6205_v16, %s3811_s29  ;;  %v2092_v18 = vsel %vm6114_vm9, %v2059_v4, %v4960_v29  ;;  %v1976_v5 = vsel %vm1958_vm4, %v1943_v22, %v6210_v42  ;;  %v6211_v4 = vld [vmem:[#allocation31_spill] sm:$0xff]  ;;  %v6213_v22 = vld [vmem:[#allocation12_spill] sm:$0xff] }
 0x1e0   : > { %v1861_v56 = vpop.permute.xlu1 %1860  ;;  %v2125_v59 = vsel %vm2123_vm10, %v2092_v18, %v5172_v2  ;;  %v5356_v46 = vsel %vm6113_vm1, %v1695_v37, %v1696_v27  ;;  %v2009_v0 = vsel %vm1991_vm5, %v1976_v5, %v6211_v4  ;;  %v6212_v27 = vld [vmem:[#allocation42_spill] sm:$0xff]  ;;  %vm2754_vm1 = vcmask 523264  }
 0x1e1   : > { %v5336_v13 = vpop.permute.xlu0 %1841  ;;  %v2158_v29 = vsel %vm2156_vm11, %v2125_v59, %v5192_v10  ;;  %v2042_v37 = vsel %vm2024_vm6, %v2009_v0, %v6212_v27 }
 0x1e2   : > { %1714 = vrot.lane.b32.xlu1 %v5324_v62, %s3812_s30  ;;  %v2191_v2 = vsel %vm2189_vm12, %v2158_v29, %v5218_v53  ;;  %v3759_v53 = vld [vmem:[%s3880_s28 + $0xc] sm:$0xff]  }
 0x1e3   : > { %1728 = vrot.lane.b32.xlu0 %v5207_v9, %s3812_s30  ;;  %v2224_v18 = vsel %vm6115_vm13, %v2191_v2, %v5243_v17  ;;  %v1896_v59 = vsel %vm1892_vm2, %v3759_v53, %v6213_v22  ;;  %v5389_v29 = vld [vmem:[%s4242_s17 + $0x48] sm:$0xff]   ;;  %v6218_v22 = vld [vmem:[#allocation13_spill] sm:$0xff] }
 0x1e4   : > { %v5349_v40 = vpop.permute.xlu1 %1244  ;;  %v2257_v55 = vsel %vm2255_vm14, %v2224_v18, %v5268_v33  ;;  %v6216_v18 = vld [vmem:[#allocation24_spill] sm:$0xff] }
 0x1e5   : > { %v1877_v9 = vpop.permute.xlu0 %1876  ;;  %v2290_v42 = vsel %vm2288_vm15, %v2257_v55, %v5284_v39  ;;  %v6215_v39 = vld [vmem:[#allocation20_spill] sm:$0xff]  ;;  %v6217_v55 = vld [vmem:[#allocation34_spill] sm:$0xff] }
 0x1e6   : > { %1749 = vrot.lane.b32.xlu1 %v3753_v50, %s3813_s7  ;;  %v2075_v50 = vsel %vm2057_vm7, %v2042_v37, %v4912_v48  ;;  %v6214_v48 = vld [vmem:[#allocation15_spill] sm:$0xff] }
 0x1e7   : > { %1730 = vrot.lane.b32.xlu0 %v5356_v46, %s3812_s30  ;;  %v2108_v17 = vsel %vm6114_vm9, %v2075_v50, %v4996_v54  ;;  %v1929_v33 = vsel %vm1925_vm3, %v1896_v59, %v6214_v48  ;;  %v2323_v54 = vsel %vm2321_vm8, %v2290_v42, %v5303_v49  ;;  %vm2830_vm9 = vcmask 588800   ;;  %v6219_v42 = vld [vmem:[#allocation18_spill] sm:$0xff] }
 0x1e8   : > { %v5373_v10 = vpop.permute.xlu1 %1862  ;;  %v2141_v4 = vsel %vm2123_vm10, %v2108_v17, %v5184_v35  ;;  %v1962_v0 = vsel %vm1958_vm4, %v1929_v33, %v6215_v39  ;;  %v2356_v27 = vsel %vm2354_vm0, %v2323_v54, %v1861_v56  ;;  %v5434_v33 = vld [vmem:[%s4242_s17 + $0xa8] sm:$0xff]  }
 0x1e9   : > { %v5386_v5 = vpop.permute.xlu0 %1260  ;;  %v2174_v2 = vsel %vm2156_vm11, %v2141_v4, %v5212_v45  ;;  %v1995_v35 = vsel %vm1991_vm5, %v1962_v0, %v6216_v18  ;;  %v6221_v4 = vld [vmem:[#allocation22_spill] sm:$0xff] }
 0x1ea   : > { %1751 = vrot.lane.b32.xlu1 %v5389_v29, %s3813_s7  ;;  %v2207_v49 = vsel %vm2189_vm12, %v2174_v2, %v5234_v25  ;;  %v2028_v53 = vsel %vm2024_vm6, %v1995_v35, %v6217_v55  ;;  %v6222_v2 = vld [vmem:[#allocation37_spill] sm:$0xff]  ;;  %v6223_v35 = vld [vmem:[#allocation28_spill] sm:$0xff] }
 0x1eb   : > { %1765 = vrot.lane.b32.xlu0 %v5299_v43, %s3813_s7  ;;  %v2240_v45 = vsel %vm6115_vm13, %v2207_v49, %v5259_v28  ;;  %v3761_v43 = vld [vmem:[%s3880_s28 + $0x6c] sm:$0xff]   ;;  %v2061_v25 = vsel %vm2057_vm7, %v2028_v53, %v4861_v61  ;;  %vm6220_vm13 = vcmask 228352  }
 0x1ec   : > { %v2723_v37 = vpop.permute.xlu1 %2722  ;;  %v1912_v59 = vsel %vm1892_vm2, %v3761_v43, %v6218_v22  ;;  %v2273_v17 = vsel %vm2255_vm14, %v2240_v45, %v5279_v23  ;;  %v2094_v48 = vsel %vm6220_vm13, %v2061_v25, %v4956_v19  ;;  %v6224_v55 = vld [vmem:[#allocation40_spill] sm:$0xff] }
 0x1ed   : > { %v2756_v50 = vsel %vm2754_vm1, %v2356_v27, %v2723_v37  ;;  %v5415_v56 = vpop.permute.xlu0 %1878  ;;  %v1945_v28 = vsel %vm1925_vm3, %v1912_v59, %v6219_v42  ;;  %v2127_v54 = vsel %vm2123_vm10, %v2094_v48, %v5182_v14  ;;  %v1674_v27 = vrot.slane %v5389_v29, 1  ;;  %v3763_v37 = vld [vmem:[%s4242_s17 + $0x50] ss:$0 sps:$4 sm:$0x11]  }
 0x1ee   : > { %1796 = vrot.lane.b32.xlu1 %v6201_v11, %s3814_s8  ;;  %3587 = vmatprep.mubr.msk.bf16.mxu0 %vm2830_vm9, %v2756_v50  ;;  %v2306_v11 = vsel %vm2288_vm15, %v2273_v17, %v5294_v30  ;;  %v1978_v23 = vsel %vm1958_vm4, %v1945_v28, %v6221_v4  ;;  %v2160_v30 = vsel %vm2156_vm11, %v2127_v54, %v5204_v38  ;;  %v1675_v18 = vrot.slane %v3763_v37, 1  ;;  %v5459_v50 = vld [vmem:[%s4093_s9 + $0x14] ss:$0 sps:$4 sm:$0x11]   ;;  %v5462_v38 = vld [vmem:[%s4093_s9 + $0xc] sm:$0xff]   ;;  %vm6226_vm4 = vmmov %vm6220_vm13 }
 0x1ef   : > { %1767 = vrot.lane.b32.xlu0 %v5434_v33, %s3813_s7  ;;  %v2339_v19 = vsel %vm2321_vm8, %v2306_v11, %v5317_v31  ;;  %v2011_v49 = vsel %vm1991_vm5, %v1978_v23, %v6223_v35  ;;  %v2193_v14 = vsel %vm2189_vm12, %v2160_v30, %v5232_v26  ;;  %vm6225_vm3 = vcmask 359424   ;;  %v6228_v28 = vld [vmem:[#allocation39_spill] sm:$0xff]  ;;  %v3765_v4 = vld [vmem:[%s4242_s17 + $0xb0] ss:$0 sps:$4 sm:$0x11]  }
 0x1f0   : > { %v5438_v61 = vpop.permute.xlu1 %1246  ;;  %v2372_v39 = vsel %vm2354_vm0, %v2339_v19, %v1877_v9  ;;  %v1196_v9 = vshll.u32 %v5462_v38, 16  ;;  %v2044_v53 = vsel %vm2024_vm6, %v2011_v49, %v6224_v55  ;;  %v2226_v45 = vsel %vm6225_vm3, %v2193_v14, %v5254_v24  ;;  %vm6229_vm6 = vmmov %vm6225_vm3 }
 0x1f1   : > { %v2739_v0 = vpop.permute.xlu0 %2738  ;;  %v2077_v43 = vsel %vm2057_vm7, %v2044_v53, %v4910_v15  ;;  %v2259_v22 = vsel %vm2255_vm14, %v2226_v45, %v5276_v32  ;;  %vm6227_vm5 = vcmask 1046528   ;;  %v1194_v15 = vshrl.u32 %v5462_v38, 16 }
 0x1f2   : > { %1798 = vrot.lane.b32.xlu1 %v6222_v2, %s3814_s8  ;;  %v2772_v31 = vsel %vm2754_vm1, %v2372_v39, %v2739_v0  ;;  %v2110_v59 = vsel %vm6226_vm4, %v2077_v43, %v4994_v6  ;;  %v2292_v25 = vsel %vm2288_vm15, %v2259_v22, %v5292_v52  ;;  %v1198_v17 = vrot.slane %v1196_v9, 1  ;;  %vm6230_vm7 = vmmov %vm6227_vm5  ;;  %v6233_v43 = vld [vmem:[#allocation6_spill] sm:$0xff] }
 0x1f3   : > { %1812 = vrot.lane.b32.xlu0 %v6205_v16, %s3814_s8  ;;  %3603 = vmatprep.mubr.msk.bf16.mxu1 %vm2830_vm9, %v2772_v31  ;;  %v5487_v16 = vsel %vm6227_vm5, %v1674_v27, %v1675_v18  ;;  %v2143_v32 = vsel %vm2123_vm10, %v2110_v59, %v5196_v1  ;;  %v2325_v6 = vsel %vm2321_vm8, %v2292_v25, %v5312_v8  ;;  %v1201_v52 = vshll.u32 %v5459_v50, 16 }
 0x1f4   : > { %v5472_v26 = vpop.permute.xlu1 %1356  ;;  %v2176_v42 = vsel %vm2156_vm11, %v2143_v32, %v5223_v44  ;;  %v1698_v8 = vrot.slane %v5434_v33, 1  ;;  %v1699_v23 = vrot.slane %v3765_v4, 1  ;;  %vm6231_vm13 = vsmask.f32 7424  ;;  %v5565_v32 = vld [vmem:[%s4242_s17 + $0xb4] sm:$0xff]  }
 0x1f5   : > { %v5482_v24 = vpop.permute.xlu0 %1262  ;;  %v2209_v11 = vsel %vm2189_vm12, %v2176_v42, %v5249_v63  ;;  %v1199_v63 = vor.u32 %v1198_v17, %v1194_v15  ;;  %v1203_v19 = vrot.slane %v1201_v52, 1  ;;  %v2549_v35 = vsel %vm1892_vm2, %v3765_v4, %v5132_v3  ;;  %v6232_v3 = vld [vmem:[#allocation17_spill] sm:$0xff]  ;;  %vm6234_vm3 = vmmov %vm6231_vm13 }
 0x1f6   : > { %1831 = vrot.lane.b32.xlu1 %v5324_v62, %s3815_s10  ;;  %v2358_v62 = vsel %vm2354_vm0, %v2325_v6, %v5373_v10  ;;  %v2242_v54 = vsel %vm6229_vm6, %v2209_v11, %v5270_v51  ;;  %v5524_v0 = vsel %vm6230_vm7, %v1698_v8, %v1699_v23  ;;  %v2688_v55 = vshll.u32 %v2549_v35, 16  ;;  %v3768_v4 = vld [vmem:[%s4242_s17 + $0xbc] ss:$0 sps:$4 sm:$0x11]   ;;  %vm6235_vm4 = vmmov %vm6234_vm3 }
 0x1f7   : > { %1814 = vrot.lane.b32.xlu0 %v6228_v28, %s3814_s8  ;;  %v2275_v10 = vsel %vm2255_vm14, %v2242_v54, %v5286_v7  ;;  %v1204_v18 = vsel %vm6231_vm13, %v1199_v63, %v1203_v19  ;;  %v1237_v52 = vrot.slane %v5462_v38, 1  ;;  %v1238_v42 = vrot.slane %v5459_v50, 1  ;;  %v3769_v63 = vld [vmem:[%s4242_s17 + $0x5c] ss:$0 sps:$4 sm:$0x11]   ;;  %vm6237_vm6 = vmmov %vm6234_vm3 }
 0x1f8   : > { %v2725_v48 = vpop.permute.xlu1 %2724  ;;  %v2308_v30 = vsel %vm2288_vm15, %v2275_v10, %v5305_v58  ;;  %v2690_v59 = vrot.slane %v2688_v55, 1  ;;  %v2553_v50 = vsel %vm1892_vm2, %v3768_v4, %v5143_v47  ;;  %v2521_v19 = vsel %vm1892_vm2, %v3769_v63, %v5130_v21  ;;  %vm6238_vm7 = vmmov %vm6234_vm3 }
 0x1f9   : > { %v2758_v1 = vsel %vm2754_vm1, %v2358_v62, %v2725_v48  ;;  %v5508_v44 = vpop.permute.xlu0 %1372  ;;  %v2341_v51 = vsel %vm2321_vm8, %v2308_v30, %v5336_v13  ;;  %v2551_v62 = vsel %vm1892_vm2, %v5565_v32, %v5122_v60  ;;  %v5575_v48 = vld [vmem:[%s4242_s17 + $0x54] sm:$0xff]   ;;  %v1239_v10 = vsel %vm6227_vm5, %v1237_v52, %v1238_v42  ;;  %v6240_v42 = vld [vmem:[#allocation38_spill] sm:$0xff]  ;;  %vm6241_vm13 = vmmov %vm6227_vm5 }
 0x1fa   : > { %1833 = vrot.lane.b32.xlu1 %v5487_v16, %s3815_s10  ;;  %3588 = vmatmul.mubr.msk.bf16.vlgmr.msra.gmra.mxu0 %vm2830_vm9, %v2758_v1  ;;  %v2374_v27 = vsel %vm2354_vm0, %v2341_v51, %v5415_v56  ;;  %v2515_v56 = vsel %vm1892_vm2, %v5389_v29, %v5104_v34  ;;  %v2519_v38 = vsel %vm1892_vm2, %v5575_v48, %v5112_v12  ;;  %v2694_v60 = vshll.u32 %v2551_v62, 16 }
 0x1fb   : > { %1847 = vrot.lane.b32.xlu0 %v5356_v46, %s3815_s10  ;;  %v2547_v46 = vsel %vm1892_vm2, %v5434_v33, %v5114_v57  ;;  %v2517_v57 = vsel %vm1892_vm2, %v3763_v37, %v5120_v20  ;;  %v2604_v9 = vshll.u32 %v2515_v56, 16  ;;  %v2602_v25 = vshrl.u32 %v2515_v56, 16 }
 0x1fc   : > { %v5519_v39 = vpop.permute.xlu1 %1358  ;;  %v2684_v14 = vshll.u32 %v2547_v46, 16  ;;  %v2608_v45 = vshll.u32 %v2517_v57, 16  ;;  %v2682_v22 = vshrl.u32 %v2547_v46, 16  ;;  %v2614_v30 = vshll.u32 %v2519_v38, 16 }
 0x1fd   : > { %v2741_v7 = vpop.permute.xlu0 %2740  ;;  %v2606_v37 = vrot.slane %v2604_v9, 1  ;;  %v2698_v51 = vshll.u32 %v2553_v50, 16  ;;  %v2696_v47 = vrot.slane %v2694_v60, 1  ;;  %v2692_v56 = vshrl.u32 %v2551_v62, 16  ;;  %v6244_v50 = vld [vmem:[#allocation47_spill] sm:$0xff] }
 0x1fe   : > { %1868 = vrot.lane.b32.xlu1 %v5389_v29, %s3816_s16  ;;  %v2774_v58 = vsel %vm2754_vm1, %v2374_v27, %v2741_v7  ;;  %v2686_v53 = vrot.slane %v2684_v14, 1  ;;  %v2610_v17 = vrot.slane %v2608_v45, 1  ;;  %v2618_v7 = vshll.u32 %v2521_v19, 16 }
 0x1ff   : > { %1849 = vrot.lane.b32.xlu0 %v5524_v0, %s3815_s10  ;;  %3604 = vmatmul.mubr.msk.bf16.vlgmr.msra.gmra.mxu1 %vm2830_vm9, %v2774_v58  ;;  %v2607_v1 = vor.u32 %v2606_v37, %v2602_v25  ;;  %v6236_v58 = vld [vmem:[#allocation5_spill] sm:$0xff]  ;;  %v2616_v46 = vrot.slane %v2614_v30, 1  ;;  %v2700_v35 = vrot.slane %v2698_v51, 1  ;;  %v2612_v14 = vshrl.u32 %v2519_v38, 16  ;;  %v6247_v51 = vld [vmem:[#allocation63_spill] sm:$0xff] }
 0x200   : > { %v5538_v13 = vpop.permute.xlu1 %1628  ;;  %v2687_v6 = vor.u32 %v2686_v53, %v2682_v22  ;;  %v2697_v57 = vor.u32 %v2696_v47, %v2692_v56  ;;  %v2620_v9 = vrot.slane %v2618_v7, 1  ;;  %v1702_v52 = vrot.slane %v3768_v4, 1  ;;  %v6243_v4 = vld [vmem:[#allocation59_spill] sm:$0xff]  ;;  %v6250_v7 = vld [vmem:[#allocation65_spill] sm:$0xff] }
 0x201   : > { %v5545_v49 = vpop.permute.xlu0 %1374  ;;  %v2611_v54 = vsel %vm6235_vm4, %v2607_v1, %v2610_v17  ;;  %v1701_v17 = vrot.slane %v5565_v32, 1  ;;  %v1677_v1 = vrot.slane %v5575_v48, 1  ;;  %v6248_v47 = vld [vmem:[#allocation51_spill] sm:$0xff] }
 0x202   : > { %1235 = vrot.lane.b32.xlu1 %v1204_v18, %s3808_s25  ;;  %v2691_v8 = vsel %vm6234_vm3, %v2687_v6, %v2690_v59  ;;  %v2701_v53 = vsel %vm6237_vm6, %v2697_v57, %v2700_v35  ;;  %v6239_v6 = vld [vmem:[#allocation41_spill] sm:$0xff]  ;;  %vm6242_vm3 = vcmask 228352   ;;  %vm6246_vm6 = vcmask 359424  }
 0x203   : > { %1884 = vrot.lane.b32.xlu0 %v5434_v33, %s3816_s16  ;;  %v2096_v38 = vsel %vm6242_vm3, %v4878_v41, %v4973_v36  ;;  %vm6245_vm4 = vmmov %vm6242_vm3 }
 0x204   : > { %v5552_v31 = vpop.permute.xlu1 %1630  ;;  %v2100_v60 = vsel %vm6245_vm4, %v6244_v50, %v6243_v4 }
 0x205   : > { %v5554_v34 = vpop.permute.xlu0 %1644 }
 0x206   : > { %1268 = vrot.lane.b32.xlu1 %v6232_v3, %s3809_s26  ;;  %v2617_v3 = vor.u32 %v2616_v46, %v2612_v14 }
 0x207   : > { %1252 = vrot.lane.b32.xlu0 %v6233_v43, %s3809_s26 }
 0x208   : > { %v5560_v20 = vpop.permute.xlu1 %1708  ;;  %v2621_v43 = vsel %vm6238_vm7, %v2617_v3, %v2620_v9  ;;  %vm6249_vm7 = vmmov %vm6242_vm3 }
 0x209   : > { %v5562_v15 = vpop.permute.xlu0 %1646 }
 0x20a   : > { %1886 = vrot.lane.b32.xlu1 %v5565_v32, %s3816_s16 }
 0x20b   : > { %1870 = vrot.lane.b32.xlu0 %v5575_v48, %s3816_s16 }
 0x20c   : > { %v5579_v11 = vpop.permute.xlu1 %1710 }
 0x20d   : > { %v5588_v23 = vpop.permute.xlu0 %1724 }
 0x20e   : > { %2746 = vrot.lane.b32.xlu1 %v2691_v8, %s3817_s15  ;;  %v1678_v8 = vrot.slane %v3769_v63, 1 }
 0x20f   : > { %2730 = vrot.lane.b32.xlu0 %v2611_v54, %s3817_s15 }
 0x210   : > { %v1746_v12 = vpop.permute.xlu1 %1745  ;;  %v5657_v63 = vsel %vm6227_vm5, %v1677_v1, %v1678_v8  ;;  %vm6258_vm5 = vmmov %vm6245_vm4 }
 0x211   : > { %v5597_v27 = vpop.permute.xlu0 %1726 }
 0x212   : > { %1270 = vrot.lane.b32.xlu1 %v1239_v10, %s3809_s26  ;;  %v2129_v10 = vsel %vm2123_vm10, %v2096_v38, %v5349_v40 }
 0x213   : > { %1254 = vrot.lane.b32.xlu0 %v6236_v58, %s3809_s26  ;;  %v2162_v41 = vsel %vm2156_vm11, %v2129_v10, %v5472_v26  ;;  %v2112_v26 = vsel %vm6249_vm7, %v6248_v47, %v6247_v51  ;;  %v6251_v58 = vld [vmem:[#allocation53_spill] sm:$0xff]  ;;  %v6261_v10 = vld [vmem:[#allocation50_spill] sm:$0xff]  ;;  %vm6262_vm7 = vmmov %vm6245_vm4 }
 0x214   : > { %v5602_v18 = vpop.permute.xlu1 %1747 }
 0x215   : > { %v5604_v21 = vpop.permute.xlu0 %1761 }
 0x216   : > { %1380 = vrot.lane.b32.xlu1 %v5434_v33, %s3810_s27 }
 0x217   : > { %1364 = vrot.lane.b32.xlu0 %v5389_v29, %s3810_s27 }
 0x218   : > { %v1793_v55 = vpop.permute.xlu1 %1792 }
 0x219   : > { %v5611_v45 = vpop.permute.xlu0 %1763 }
 0x21a   : > { %2748 = vrot.lane.b32.xlu1 %v2701_v53, %s3817_s15  ;;  %v5697_v53 = vld [vmem:[%s4113_s12] sm:$0xff]  }
 0x21b   : > { %2732 = vrot.lane.b32.xlu0 %v2621_v43, %s3817_s15  ;;  %v6255_v43 = vld [vmem:[#allocation45_spill] sm:$0xff] }
 0x21c   : > { %v5616_v37 = vpop.permute.xlu1 %1794 }
 0x21d   : > { %v1809_v33 = vpop.permute.xlu0 %1808 }
 0x21e   : > { %1382 = vrot.lane.b32.xlu1 %v5565_v32, %s3810_s27 }
 0x21f   : > { %1366 = vrot.lane.b32.xlu0 %v5575_v48, %s3810_s27 }
 0x220   : > { %v1828_v29 = vpop.permute.xlu1 %1827 }
 0x221   : > { %v5622_v22 = vpop.permute.xlu0 %1810 }
 0x222   : > { %1652 = vrot.lane.b32.xlu1 %v6228_v28, %s3811_s29 }
 0x223   : > { %1636 = vrot.lane.b32.xlu0 %v6222_v2, %s3811_s29  ;;  %v5641_v2 = vsel %vm6241_vm13, %v1701_v17, %v1702_v52  ;;  %vm6252_vm13 = vmmov %vm6242_vm3  ;;  %v6257_v17 = vld [vmem:[#allocation46_spill] sm:$0xff] }
 0x224   : > { %v5628_v59 = vpop.permute.xlu1 %1829  ;;  %v2116_v46 = vsel %vm6252_vm13, %v6251_v58, %v6250_v7  ;;  %vm6253_vm3 = vmmov %vm6246_vm6 }
 0x225   : > { %v1844_v25 = vpop.permute.xlu0 %1843  ;;  %vm6265_vm13 = vmmov %vm6245_vm4 }
 0x226   : > { %1654 = vrot.lane.b32.xlu1 %v6239_v6, %s3811_s29 }
 0x227   : > { %1638 = vrot.lane.b32.xlu0 %v6240_v42, %s3811_s29 }
 0x228   : > { %v1865_v62 = vpop.permute.xlu1 %1864 }
 0x229   : > { %v5636_v28 = vpop.permute.xlu0 %1845 }
 0x22a   : > { %1732 = vrot.lane.b32.xlu1 %v5524_v0, %s3812_s30 }
 0x22b   : > { %1716 = vrot.lane.b32.xlu0 %v5487_v16, %s3812_s30  ;;  %v2195_v16 = vsel %vm2189_vm12, %v2162_v41, %v5538_v13  ;;  %v6263_v41 = vld [vmem:[#allocation64_spill] sm:$0xff] }
 0x22c   : > { %v1249_v54 = vpop.permute.xlu1 %1248  ;;  %v2228_v19 = vsel %vm6246_vm6, %v2195_v16, %v5560_v20  ;;  %v2145_v20 = vsel %vm2123_vm10, %v2112_v26, %v5386_v5  ;;  %vm6259_vm6 = vmmov %vm6253_vm3  ;;  %v3772_v26 = vld [vmem:[%s4113_s12 + $0x8] ss:$0 sps:$4 sm:$0x11]  }
 0x22d   : > { %v5654_v0 = vsel %vm2123_vm10, %v2100_v60, %v1249_v54  ;;  %v1881_v36 = vpop.permute.xlu0 %1880  ;;  %v2261_v30 = vsel %vm2255_vm14, %v2228_v19, %v1746_v12  ;;  %v2178_v14 = vsel %vm2156_vm11, %v2145_v20, %v5508_v44  ;;  %v1821_v7 = vrot.slane %v3772_v26, 1 }
 0x22e   : > { %1734 = vrot.lane.b32.xlu1 %v5641_v2, %s3812_s30  ;;  %v2294_v13 = vsel %vm2288_vm15, %v2261_v30, %v1793_v55  ;;  %v1820_v30 = vrot.slane %v5697_v53, 1 }
 0x22f   : > { %1718 = vrot.lane.b32.xlu0 %v5657_v63, %s3812_s30  ;;  %v2327_v12 = vsel %vm2321_vm8, %v2294_v13, %v1828_v29  ;;  %v6256_v29 = vld [vmem:[#allocation58_spill] sm:$0xff] }
 0x230   : > { %v1867_v40 = vpop.permute.xlu1 %1866  ;;  %v2360_v57 = vsel %vm2354_vm0, %v2327_v12, %v1865_v62  ;;  %v2102_v52 = vsel %vm6258_vm5, %v6257_v17, %v6256_v29  ;;  %v5711_v62 = vld [vmem:[%s4242_s17 + $0x60] sm:$0xff]   ;;  %v6269_v12 = vld [vmem:[#allocation7_spill] sm:$0xff]  ;;  %v6273_v17 = vld [vmem:[#allocation68_spill] sm:$0xff] }
 0x231   : > { %v1265_v56 = vpop.permute.xlu0 %1264  ;;  %v3774_v29 = vld [vmem:[%s4113_s12 + $0xc] sm:$0xff]  }
 0x232   : > { %1769 = vrot.lane.b32.xlu1 %v5565_v32, %s3813_s7  ;;  %v5683_v35 = vsel %vm2123_vm10, %v2116_v46, %v1265_v56  ;;  %v2211_v32 = vsel %vm2189_vm12, %v2178_v14, %v5554_v34  ;;  %v6267_v46 = vld [vmem:[#allocation43_spill] sm:$0xff] }
 0x233   : > { %1753 = vrot.lane.b32.xlu0 %v5575_v48, %s3813_s7  ;;  %v2244_v55 = vsel %vm6253_vm3, %v2211_v32, %v5588_v23  ;;  %v6254_v48 = vld [vmem:[#allocation56_spill] sm:$0xff]  ;;  %v6271_v32 = vld [vmem:[#allocation70_spill] sm:$0xff] }
 0x234   : > { %v2727_v9 = vpop.permute.xlu1 %2726  ;;  %v2277_v44 = vsel %vm2255_vm14, %v2244_v55, %v5604_v21  ;;  %v2098_v34 = vsel %vm6245_vm4, %v6255_v43, %v6254_v48  ;;  %vm6268_vm4 = vcmask 1046528   ;;  %v3773_v43 = vld [vmem:[%s4242_s17 + $0x68] ss:$0 sps:$4 sm:$0x11]  }
 0x235   : > { %v2760_v5 = vsel %vm2754_vm1, %v2360_v57, %v2727_v9  ;;  %v1883_v3 = vpop.permute.xlu0 %1882  ;;  %v2310_v23 = vsel %vm2288_vm15, %v2277_v44, %v1809_v33  ;;  %v2131_v8 = vsel %vm2123_vm10, %v2098_v34, %v5438_v61  ;;  %v6270_v57 = vld [vmem:[#allocation8_spill] sm:$0xff]  ;;  %v6272_v34 = vld [vmem:[#allocation67_spill] sm:$0xff] }
 0x236   : > { %3591 = vmatprep.mubr.msk.bf16.mxu0 %vm2830_vm9, %v2760_v5  ;;  %1771 = vrot.lane.b32.xlu1 %v5697_v53, %s3813_s7  ;;  %v2343_v21 = vsel %vm2321_vm8, %v2310_v23, %v1844_v25  ;;  %v2164_v4 = vsel %vm2156_vm11, %v2131_v8, %v5519_v39  ;;  %v2557_v5 = vsel %vm1892_vm2, %v3772_v26, %v6271_v32  ;;  %v6274_v23 = vld [vmem:[#allocation57_spill] sm:$0xff]  ;;  %v3775_v8 = vld [vmem:[%s4242_s17 + $0x6c] sm:$0xff]  }
 0x237   : > { %1755 = vrot.lane.b32.xlu0 %v5711_v62, %s3813_s7  ;;  %v2376_v50 = vsel %vm2354_vm0, %v2343_v21, %v1881_v36  ;;  %v2197_v33 = vsel %vm2189_vm12, %v2164_v4, %v5552_v31  ;;  %v6264_v36 = vld [vmem:[#allocation52_spill] sm:$0xff]  ;;  %v6275_v21 = vld [vmem:[#allocation2_spill] sm:$0xff] }
 0x238   : > { %v1251_v1 = vpop.permute.xlu1 %1250  ;;  %v2230_v61 = vsel %vm6259_vm6, %v2197_v33, %v5579_v11  ;;  %v2118_v16 = vsel %vm6265_vm13, %v6264_v36, %v6263_v41  ;;  %v3776_v4 = vld [vmem:[%s4113_s12 + $0x14] ss:$0 sps:$4 sm:$0x11]   ;;  %s3523_s12 = sshll.u32 %s6304_s21, 7 }
 0x239   : > { %v2135_v38 = vsel %vm2123_vm10, %v2102_v52, %v1251_v1  ;;  %v2743_v60 = vpop.permute.xlu0 %2742  ;;  %v2263_v25 = vsel %vm2255_vm14, %v2230_v61, %v5602_v18  ;;  %v2559_v52 = vsel %vm1892_vm2, %v3774_v29, %v6273_v17  ;;  %v2708_v1 = vshll.u32 %v2557_v5, 16  ;;  %s5932_s25 = scalar_lea.vmem %s6078_s6, %s3523_s12 }
 0x23a   : > { %1816 = vrot.lane.b32.xlu1 %v6239_v6, %s3814_s8  ;;  %v2776_v54 = vsel %vm2754_vm1, %v2376_v50, %v2743_v60  ;;  %v6260_v6 = vld [vmem:[#allocation62_spill] sm:$0xff]  ;;  %v2296_v11 = vsel %vm2288_vm15, %v2263_v25, %v5616_v37  ;;  %v6276_v50 = vld [vmem:[#allocation71_spill] sm:$0xff]  ;;  %v2714_v25 = vshll.u32 %v2559_v52, 16 }
 0x23b   : > { %1800 = vrot.lane.b32.xlu0 %v6240_v42, %s3814_s8  ;;  %3607 = vmatprep.mubr.msk.bf16.mxu1 %vm2830_vm9, %v2776_v54  ;;  %v2114_v31 = vsel %vm6262_vm7, %v6261_v10, %v6260_v6  ;;  %v6266_v42 = vld [vmem:[#allocation44_spill] sm:$0xff]  ;;  %v2329_v51 = vsel %vm2321_vm8, %v2296_v11, %v5628_v59  ;;  %v2561_v60 = vsel %vm1892_vm2, %v3776_v4, %v6276_v50  ;;  %v6284_v4 = vld [vmem:[#allocation55_spill] sm:$0xff] }
 0x23c   : > { %v5732_v39 = vpop.permute.xlu1 %1360  ;;  %v2147_v18 = vsel %vm2123_vm10, %v2114_v31, %v5482_v24  ;;  %v2362_v58 = vsel %vm2354_vm0, %v2329_v51, %v1867_v40  ;;  %v1822_v40 = vsel %vm6268_vm4, %v1820_v30, %v1821_v7  ;;  %v3777_v10 = vld [vmem:[%s4242_s17 + $0x74] ss:$0 sps:$4 sm:$0x11]   ;;  %v6277_v31 = vld [vmem:[#allocation69_spill] sm:$0xff]  ;;  %v2716_v26 = vrot.slane %v2714_v25, 1 }
 0x23d   : > { %v1267_v19 = vpop.permute.xlu0 %1266  ;;  %v2180_v37 = vsel %vm2156_vm11, %v2147_v18, %v5545_v49  ;;  %v2529_v41 = vsel %vm1892_vm2, %v3777_v10, %v6277_v31  ;;  %v6287_v25 = vld [vmem:[#allocation49_spill] sm:$0xff] }
 0x23e   : > { %1818 = vrot.lane.b32.xlu1 %v6266_v42, %s3814_s8  ;;  %v5752_v47 = vsel %vm2123_vm10, %v2118_v16, %v1267_v19  ;;  %v2213_v24 = vsel %vm2189_vm12, %v2180_v37, %v5562_v15  ;;  %v2555_v15 = vsel %vm1892_vm2, %v5697_v53, %v6269_v12  ;;  %v2710_v19 = vrot.slane %v2708_v1, 1  ;;  %v6282_v1 = vld [vmem:[#allocation54_spill] sm:$0xff] }
 0x23f   : > { %1802 = vrot.lane.b32.xlu0 %v6267_v46, %s3814_s8  ;;  %v2246_v59 = vsel %vm6253_vm3, %v2213_v24, %v5597_v27  ;;  %v2702_v11 = vshrl.u32 %v2555_v15, 16  ;;  %v2718_v42 = vshll.u32 %v2561_v60, 16  ;;  %v2638_v7 = vshll.u32 %v2529_v41, 16  ;;  %vm6285_vm3 = vmmov %vm6265_vm13 }
 0x240   : > { %v2729_v13 = vpop.permute.xlu1 %2728  ;;  %v2279_v49 = vsel %vm2255_vm14, %v2246_v59, %v5611_v45  ;;  %vm6288_vm4 = vmmov %vm6285_vm3 }
 0x241   : > { %v2762_v56 = vsel %vm2754_vm1, %v2362_v58, %v2729_v13  ;;  %v5765_v20 = vpop.permute.xlu0 %1376  ;;  %v2312_v27 = vsel %vm2288_vm15, %v2279_v49, %v5622_v22  ;;  %v2720_v13 = vrot.slane %v2718_v42, 1 }
 0x242   : > { %3592 = vmatmul.mubr.msk.bf16.gmra.mxu0 %vm2830_vm9, %v2762_v56  ;;  %1851 = vrot.lane.b32.xlu1 %v5641_v2, %s3815_s10  ;;  %v2523_v2 = vsel %vm1892_vm2, %v5711_v62, %v6270_v57  ;;  %v2345_v45 = vsel %vm2321_vm8, %v2312_v27, %v5636_v28  ;;  %v2525_v28 = vsel %vm1892_vm2, %v3773_v43, %v6272_v34 }
 0x243   : > { %1835 = vrot.lane.b32.xlu0 %v5657_v63, %s3815_s10  ;;  %v2378_v22 = vsel %vm2354_vm0, %v2345_v45, %v1883_v3  ;;  %v2704_v63 = vshll.u32 %v2555_v15, 16  ;;  %v2624_v48 = vshll.u32 %v2523_v2, 16  ;;  %v2628_v61 = vshll.u32 %v2525_v28, 16 }
 0x244   : > { %v1363_v14 = vpop.permute.xlu1 %1362  ;;  %v2622_v30 = vshrl.u32 %v2523_v2, 16  ;;  %v2182_v10 = vsel %vm2156_vm11, %v5683_v35, %v5765_v20 }
 0x245   : > { %v5786_v9 = vsel %vm2156_vm11, %v2135_v38, %v1363_v14  ;;  %v2745_v55 = vpop.permute.xlu0 %2744  ;;  %v2527_v38 = vsel %vm1892_vm2, %v3775_v8, %v6275_v21  ;;  %v2706_v54 = vrot.slane %v2704_v63, 1  ;;  %v2626_v6 = vrot.slane %v2624_v48, 1 }
 0x246   : > { %1853 = vrot.lane.b32.xlu1 %v1822_v40, %s3815_s10  ;;  %v2778_v44 = vsel %vm2754_vm1, %v2378_v22, %v2745_v55  ;;  %v2634_v16 = vshll.u32 %v2527_v38, 16  ;;  %v2630_v51 = vrot.slane %v2628_v61, 1  ;;  %vm6278_vm2 = vsmask.f32 7424  ;;  %v6286_v61 = vld [vmem:[#allocation61_spill] sm:$0xff] }
 0x247   : > { %1837 = vrot.lane.b32.xlu0 %v6274_v23, %s3815_s10  ;;  %3608 = vmatmul.mubr.msk.bf16.gmra.mxu1 %vm2830_vm9, %v2778_v44  ;;  %v2627_v37 = vor.u32 %v2626_v6, %v2622_v30  ;;  %v2632_v59 = vshrl.u32 %v2527_v38, 16  ;;  %v2640_v40 = vrot.slane %v2638_v7, 1  ;;  %vm6279_vm5 = vmmov %vm6278_vm2  ;;  %v6283_v38 = vld [vmem:[#allocation66_spill] sm:$0xff]  ;;  %v2104_v6 = vsel %vm6288_vm4, %v6287_v25, %v6286_v61 }
 0x248   : > { %v5802_v3 = vpop.permute.xlu1 %1632  ;;  %v2636_v46 = vrot.slane %v2634_v16, 1  ;;  %vm6280_vm6 = vmmov %vm6278_vm2  ;;  %v2120_v50 = vsel %vm6285_vm3, %v6284_v4, %v6283_v38 }
 0x249   : > { %v5810_v33 = vpop.permute.xlu0 %1378  ;;  %v2631_v12 = vsel %vm6279_vm5, %v2627_v37, %v2630_v51  ;;  %vm6281_vm7 = vmmov %vm6278_vm2 }
 0x24a   : > { %1888 = vrot.lane.b32.xlu1 %v5697_v53, %s3816_s16  ;;  %v2707_v53 = vor.u32 %v2706_v54, %v2702_v11  ;;  %v2637_v27 = vor.u32 %v2636_v46, %v2632_v59  ;;  %v2166_v11 = vsel %vm2156_vm11, %v5654_v0, %v5732_v39 }
 0x24b   : > { %1872 = vrot.lane.b32.xlu0 %v5711_v62, %s3816_s16  ;;  %v2712_v62 = vshrl.u32 %v2559_v52, 16  ;;  %v2199_v30 = vsel %vm2189_vm12, %v2166_v11, %v5802_v3 }
 0x24c   : > { %v5819_v36 = vpop.permute.xlu1 %1634  ;;  %v2711_v24 = vsel %vm6278_vm2, %v2707_v53, %v2710_v19  ;;  %v2641_v2 = vsel %vm6281_vm7, %v2637_v27, %v2640_v40  ;;  %vm6289_vm2 = vcmask 359424  }
 0x24d   : > { %v1649_v18 = vpop.permute.xlu0 %1648  ;;  %v2717_v49 = vor.u32 %v2716_v26, %v2712_v62  ;;  %vm6290_vm5 = vmmov %vm6289_vm2  ;;  %v2201_v27 = vsel %vm2189_vm12, %v5786_v9, %v5819_v36 }
 0x24e   : > { %1890 = vrot.lane.b32.xlu1 %v3774_v29, %s3816_s16  ;;  %v2215_v41 = vsel %vm2189_vm12, %v2182_v10, %v1649_v18  ;;  %vm6292_vm7 = vmmov %vm6289_vm2 }
 0x24f   : > { %1874 = vrot.lane.b32.xlu0 %v3775_v8, %s3816_s16  ;;  %v2721_v14 = vsel %vm6280_vm6, %v2717_v49, %v2720_v13  ;;  %vm6291_vm6 = vmmov %vm6289_vm2 }
 0x250   : > { %v1713_v58 = vpop.permute.xlu1 %1712  ;;  %vm6296_vm4 = vmmov %vm6289_vm2 }
 0x251   : > { %v5824_v56 = vpop.permute.xlu0 %1650  ;;  %v2232_v35 = vsel %vm6290_vm5, %v2199_v30, %v1713_v58  ;;  %v6294_v30 = vld [vmem:[#allocation48_spill] sm:$0xff] }
 0x252   : > { %2750 = vrot.lane.b32.xlu1 %v2711_v24, %s3817_s15  ;;  %v2184_v24 = vsel %vm2156_vm11, %v5752_v47, %v5810_v33 }
 0x253   : > { %2734 = vrot.lane.b32.xlu0 %v2631_v12, %s3817_s15  ;;  %v2217_v49 = vsel %vm2189_vm12, %v2184_v24, %v5824_v56 }
 0x254   : > { %v1715_v15 = vpop.permute.xlu1 %1714 }
 0x255   : > { %v1729_v57 = vpop.permute.xlu0 %1728 }
 0x256   : > { %2752 = vrot.lane.b32.xlu1 %v2721_v14, %s3817_s15  ;;  %v2248_v19 = vsel %vm6289_vm2, %v2215_v41, %v1729_v57  ;;  %v2234_v57 = vsel %vm6292_vm7, %v2201_v27, %v1715_v15  ;;  %v5907_v41 = vld [vmem:[%s6077_s5] ss:$0 sm:$0xff] }
 0x257   : > { %2736 = vrot.lane.b32.xlu0 %v2641_v2, %s3817_s15 }
 0x258   : > { %v1750_v45 = vpop.permute.xlu1 %1749 }
 0x259   : > { %v1731_v32 = vpop.permute.xlu0 %1730  ;;  %v2265_v51 = vsel %vm2255_vm14, %v2232_v35, %v1750_v45 }
 0x25a   : > { %v2250_v40 = vsel %vm6291_vm6, %v2217_v49, %v1731_v32 }
 0x25c   : > { %v1752_v5 = vpop.permute.xlu1 %1751 }
 0x25d   : > { %v1766_v22 = vpop.permute.xlu0 %1765  ;;  %v2267_v47 = vsel %vm2255_vm14, %v2234_v57, %v1752_v5 }
 0x25e   : > { %v2281_v53 = vsel %vm2255_vm14, %v2248_v19, %v1766_v22 }
 0x260   : > { %v1797_v55 = vpop.permute.xlu1 %1796 }
 0x261   : > { %v1768_v63 = vpop.permute.xlu0 %1767  ;;  %v2298_v7 = vsel %vm2288_vm15, %v2265_v51, %v1797_v55 }
 0x262   : > { %v2283_v14 = vsel %vm2255_vm14, %v2250_v40, %v1768_v63 }
 0x264   : > { %v1799_v44 = vpop.permute.xlu1 %1798 }
 0x265   : > { %v1813_v48 = vpop.permute.xlu0 %1812  ;;  %v2300_v56 = vsel %vm2288_vm15, %v2267_v47, %v1799_v44 }
 0x266   : > { %v2314_v20 = vsel %vm2288_vm15, %v2281_v53, %v1813_v48 }
 0x268   : > { %v1832_v43 = vpop.permute.xlu1 %1831 }
 0x269   : > { %v1815_v34 = vpop.permute.xlu0 %1814  ;;  %v2331_v37 = vsel %vm2321_vm8, %v2298_v7, %v1832_v43 }
 0x26a   : > { %v2316_v2 = vsel %vm2288_vm15, %v2283_v14, %v1815_v34 }
 0x26c   : > { %v1834_v28 = vpop.permute.xlu1 %1833 }
 0x26d   : > { %v1848_v29 = vpop.permute.xlu0 %1847  ;;  %v2333_v55 = vsel %vm2321_vm8, %v2300_v56, %v1834_v28 }
 0x26e   : > { %v2347_v26 = vsel %vm2321_vm8, %v2314_v20, %v1848_v29 }
 0x270   : > { %v1869_v17 = vpop.permute.xlu1 %1868 }
 0x271   : > { %v1850_v52 = vpop.permute.xlu0 %1849  ;;  %v2364_v46 = vsel %vm2354_vm0, %v2331_v37, %v1869_v17 }
 0x272   : > { %v2349_v33 = vsel %vm2321_vm8, %v2316_v2, %v1850_v52 }
 0x274   : > { %v1236_v23 = vpop.permute.xlu1 %1235 }
 0x275   : > { %v5835_v8 = vsel %vm6265_vm13, %v6282_v1, %v1236_v23  ;;  %v1885_v21 = vpop.permute.xlu0 %1884  ;;  %vm6295_vm13 = vmmov %vm6285_vm3  ;;  %vm3188_vm3 = vcmask 27648  }
 0x276   : > { %v2380_v0 = vsel %vm2354_vm0, %v2347_v26, %v1885_v21 }
 0x278   : > { %v1269_v60 = vpop.permute.xlu1 %1268 }
 0x279   : > { %v5841_v54 = vsel %vm2123_vm10, %v2120_v50, %v1269_v60  ;;  %v1253_v31 = vpop.permute.xlu0 %1252 }
 0x27a   : > { %v5851_v16 = vsel %vm2123_vm10, %v2104_v6, %v1253_v31 }
 0x27c   : > { %v1887_v42 = vpop.permute.xlu1 %1886 }
 0x27d   : > { %v1871_v18 = vpop.permute.xlu0 %1870  ;;  %v2382_v32 = vsel %vm2354_vm0, %v2349_v33, %v1887_v42  ;;  %v6293_v42 = vld [vmem:[#allocation60_spill] sm:$0xff] }
 0x27e   : > { %v2366_v36 = vsel %vm2354_vm0, %v2333_v55, %v1871_v18  ;;  %v2106_v53 = vsel %vm6295_vm13, %v6294_v30, %v6293_v42 }
 0x280   : > { %v2747_v39 = vpop.permute.xlu1 %2746 }
 0x281   : > { %v2780_v3 = vsel %vm2754_vm1, %v2380_v0, %v2747_v39  ;;  %v2731_v62 = vpop.permute.xlu0 %2730 }
 0x282   : > { %3611 = vmatprep.mubr.msk.bf16.mxu1 %vm2830_vm9, %v2780_v3  ;;  %v2764_v58 = vsel %vm2754_vm1, %v2364_v46, %v2731_v62 }
 0x283   : > { %3595 = vmatprep.mubr.msk.bf16.mxu0 %vm2830_vm9, %v2764_v58 }
 0x284   : > { %v1271_v13 = vpop.permute.xlu1 %1270 }
 0x285   : > { %v1255_v59 = vpop.permute.xlu0 %1254  ;;  %v2155_v20 = vsel %vm2123_vm10, %v5835_v8, %v1271_v13 }
 0x286   : > { %v2139_v46 = vsel %vm2123_vm10, %v2106_v53, %v1255_v59  ;;  %vm6297_vm10 = vmmov %vm6289_vm2 }
 0x288   : > { %v1381_v12 = vpop.permute.xlu1 %1380 }
 0x289   : > { %v1365_v45 = vpop.permute.xlu0 %1364  ;;  %v2186_v18 = vsel %vm2156_vm11, %v5841_v54, %v1381_v12 }
 0x28a   : > { %v2170_v51 = vsel %vm2156_vm11, %v5851_v16, %v1365_v45 }
 0x28c   : > { %v2749_v22 = vpop.permute.xlu1 %2748 }
 0x28d   : > { %v2782_v9 = vsel %vm2754_vm1, %v2382_v32, %v2749_v22  ;;  %v2733_v63 = vpop.permute.xlu0 %2732 }
 0x28e   : > { %3612 = vmatmul.mubr.msk.bf16.gmra.mxu1 %vm2830_vm9, %v2782_v9  ;;  %v2766_v15 = vsel %vm2754_vm1, %v2366_v36, %v2733_v63 }
 0x28f   : > { %3596 = vmatmul.mubr.msk.bf16.gmra.mxu0 %vm2830_vm9, %v2766_v15 }
 0x290   : > { %v1383_v5 = vpop.permute.xlu1 %1382 }
 0x291   : > { %v1367_v48 = vpop.permute.xlu0 %1366  ;;  %v2188_v8 = vsel %vm2156_vm11, %v2155_v20, %v1383_v5 }
 0x292   : > { %v2172_v40 = vsel %vm2156_vm11, %v2139_v46, %v1367_v48  ;;  %vm6298_vm11 = vmmov %vm6289_vm2 }
 0x294   : > { %v1653_v43 = vpop.permute.xlu1 %1652 }
 0x295   : > { %v1637_v44 = vpop.permute.xlu0 %1636  ;;  %v2219_v0 = vsel %vm2189_vm12, %v2186_v18, %v1653_v43 }
 0x296   : > { %v2203_v39 = vsel %vm2189_vm12, %v2170_v51, %v1637_v44 }
 0x298   : > { %v1655_v34 = vpop.permute.xlu1 %1654 }
 0x299   : > { %v1639_v29 = vpop.permute.xlu0 %1638  ;;  %v2221_v12 = vsel %vm2189_vm12, %v2188_v8, %v1655_v34 }
 0x29a   : > { %v2205_v22 = vsel %vm2189_vm12, %v2172_v40, %v1639_v29 }
 0x29c   : > { %v1733_v17 = vpop.permute.xlu1 %1732 }
 0x29d   : > { %v1717_v52 = vpop.permute.xlu0 %1716  ;;  %v2252_v62 = vsel %vm6296_vm4, %v2219_v0, %v1733_v17 }
 0x29e   : > { %v2236_v54 = vsel %vm6289_vm2, %v2203_v39, %v1717_v52 }
 0x2a0   : > { %v1735_v28 = vpop.permute.xlu1 %1734 }
 0x2a1   : > { %v5894_v23 = vpop.permute.xlu0 %1718  ;;  %v2254_v55 = vsel %vm6297_vm10, %v2221_v12, %v1735_v28 }
 0x2a2   : > { %v2238_v34 = vsel %vm6298_vm11, %v2205_v22, %v5894_v23 }
 0x2a4   : > { %v1770_v1 = vpop.permute.xlu1 %1769 }
 0x2a5   : > { %v1754_v21 = vpop.permute.xlu0 %1753  ;;  %v2285_v13 = vsel %vm2255_vm14, %v2252_v62, %v1770_v1 }
 0x2a6   : > { %v2269_v27 = vsel %vm2255_vm14, %v2236_v54, %v1754_v21 }
 0x2a8   : > { %v1772_v38 = vpop.permute.xlu1 %1771 }
 0x2a9   : > { %v5896_v4 = vpop.permute.xlu0 %1755  ;;  %v2287_v29 = vsel %vm2255_vm14, %v2254_v55, %v1772_v38 }
 0x2aa   : > { %v2271_v23 = vsel %vm2255_vm14, %v2238_v34, %v5896_v4 }
 0x2ac   : > { %v1817_v50 = vpop.permute.xlu1 %1816 }
 0x2ad   : > { %v1801_v60 = vpop.permute.xlu0 %1800  ;;  %v2318_v14 = vsel %vm2288_vm15, %v2285_v13, %v1817_v50 }
 0x2ae   : > { %v2302_v9 = vsel %vm2288_vm15, %v2269_v27, %v1801_v60 }
 0x2b0   : > { %v5898_v61 = vpop.permute.xlu1 %1818 }
 0x2b1   : > { %v5900_v25 = vpop.permute.xlu0 %1802  ;;  %v2320_v38 = vsel %vm2288_vm15, %v2287_v29, %v5898_v61 }
 0x2b2   : > { %v2304_v61 = vsel %vm2288_vm15, %v2271_v23, %v5900_v25 }
 0x2b4   : > { %v1852_v6 = vpop.permute.xlu1 %1851 }
 0x2b5   : > { %v1836_v10 = vpop.permute.xlu0 %1835  ;;  %v2351_v36 = vsel %vm2321_vm8, %v2318_v14, %v1852_v6 }
 0x2b6   : > { %v2335_v17 = vsel %vm2321_vm8, %v2302_v9, %v1836_v10 }
 0x2b8   : > { %v5902_v31 = vpop.permute.xlu1 %1853 }
 0x2b9   : > { %v5909_v11 = vpop.permute.xlu0 %1837  ;;  %v2353_v18 = vsel %vm2321_vm8, %v2320_v38, %v5902_v31 }
 0x2ba   : > { %v3589_v19 = vpop.f32.mrf.mxu0  ;;  %v2337_v51 = vsel %vm2321_vm8, %v2304_v61, %v5909_v11 }
 0x2bb   : > { %v2910_v35 = vadd.f32 %v3589_v19, %v5907_v41 }
 0x2bc   : > { %v2901_v26 = vpop.f32.mrf.mxu0  ;;  %v1889_v7 = vpop.permute.xlu1 %1888 }
 0x2bd   : > { %v3030_v37 = vmax.f32 %v2910_v35, 0.0  ;;  %v2902_v3 = vadd.f32 %v5907_v41, %v2901_v26  ;;  %v1873_v16 = vpop.permute.xlu0 %1872  ;;  %v2384_v52 = vsel %vm2354_vm0, %v2351_v36, %v1889_v7 }
 0x2be   : > { %v3590_v58 = vpop.f32.mrf.mxu0  ;;  %v2368_v10 = vsel %vm2354_vm0, %v2335_v17, %v1873_v16 }
 0x2bf   : > { %v3526_v24 = vpack.c.bf16 %v3030_v37, %v3030_v37  ;;  %v3028_v49 = vmax.f32 %v2902_v3, 0.0  ;;  %v2913_v59 = vadd.f32 %v3590_v58, %v5907_v41  ;;  %v3605_v57 = vpop.f32.mrf.mxu1 }
 0x2c0   : > { %v2904_v2 = vpop.f32.mrf.mxu0  ;;  %v2974_v33 = vadd.f32 %v3605_v57, %v5907_v41  ;;  %v1891_v32 = vpop.permute.xlu1 %1890 }
 0x2c1   : > { %3191 = vst.msk [vmem:[%s5932_s25 + $0x8] sm:$0xf] %vm3188_vm3, %v3526_v24  ;;  %v3524_v45 = vpack.c.bf16 %v3028_v49, %v3028_v49  ;;  %v3031_v47 = vmax.f32 %v2913_v59, 0.0  ;;  %v2905_v56 = vadd.f32 %v5907_v41, %v2904_v2  ;;  %v2965_v63 = vpop.f32.mrf.mxu1  ;;  %v1875_v15 = vpop.permute.xlu0 %1874  ;;  %v2386_v26 = vsel %vm2354_vm0, %v2353_v18, %v1891_v32 }
 0x2c2   : > { %v3046_v48 = vmax.f32 %v2974_v33, 0.0  ;;  %v2966_v44 = vadd.f32 %v5907_v41, %v2965_v63  ;;  %v2370_v37 = vsel %vm2354_vm0, %v2337_v51, %v1875_v15 }
 0x2c3   : > { %3189 = vst.msk [vmem:[%s5932_s25] sm:$0xf] %vm3188_vm3, %v3524_v45  ;;  %v3527_v5 = vpack.c.bf16 %v3031_v47, %v3031_v47  ;;  %v3029_v43 = vmax.f32 %v2905_v56, 0.0  ;;  %v3606_v28 = vpop.f32.mrf.mxu1 }
 0x2c4   : > { %v3542_v1 = vpack.c.bf16 %v3046_v48, %v3046_v48  ;;  %v3044_v50 = vmax.f32 %v2966_v44, 0.0  ;;  %v2977_v60 = vadd.f32 %v3606_v28, %v5907_v41  ;;  %v2751_v6 = vpop.permute.xlu1 %2750 }
 0x2c5   : > { %3192 = vst.msk [vmem:[%s5932_s25 + $0xc] sm:$0xf] %vm3188_vm3, %v3527_v5  ;;  %v3525_v21 = vpack.c.bf16 %v3029_v43, %v3029_v43  ;;  %v2784_v19 = vsel %vm2754_vm1, %v2384_v52, %v2751_v6  ;;  %v2968_v42 = vpop.f32.mrf.mxu1  ;;  %v2735_v30 = vpop.permute.xlu0 %2734 }
 0x2c6   : > { %3207 = vst.msk [vmem:[%s5932_s25 + $0x48] sm:$0xf] %vm3188_vm3, %v3542_v1  ;;  %v3540_v53 = vpack.c.bf16 %v3044_v50, %v3044_v50  ;;  %v3047_v35 = vmax.f32 %v2977_v60, 0.0  ;;  %v2969_v20 = vadd.f32 %v5907_v41, %v2968_v42  ;;  %v2768_v4 = vsel %vm2754_vm1, %v2368_v10, %v2735_v30  ;;  %3615 = vmatprep.mubr.msk.bf16.mxu1 %vm2830_vm9, %v2784_v19 }
 0x2c7   : > { %3190 = vst.msk [vmem:[%s5932_s25 + $0x4] sm:$0xf] %vm3188_vm3, %v3525_v21  ;;  %3599 = vmatprep.mubr.msk.bf16.mxu0 %vm2830_vm9, %v2768_v4 }
 0x2c8   : > { %3205 = vst.msk [vmem:[%s5932_s25 + $0x40] sm:$0xf] %vm3188_vm3, %v3540_v53  ;;  %v3543_v7 = vpack.c.bf16 %v3047_v35, %v3047_v35  ;;  %v3045_v0 = vmax.f32 %v2969_v20, 0.0  ;;  %v2753_v39 = vpop.permute.xlu1 %2752 }
 0x2c9   : > { %v2786_v25 = vsel %vm2754_vm1, %v2386_v26, %v2753_v39  ;;  %v2737_v3 = vpop.permute.xlu0 %2736 }
 0x2ca   : > { %3208 = vst.msk [vmem:[%s5932_s25 + $0x4c] sm:$0xf] %vm3188_vm3, %v3543_v7  ;;  %v3541_v31 = vpack.c.bf16 %v3045_v0, %v3045_v0  ;;  %v2770_v46 = vsel %vm2754_vm1, %v2370_v37, %v2737_v3  ;;  %3616 = vmatmul.mubr.msk.bf16.gmra.mxu1 %vm2830_vm9, %v2786_v25 }
 0x2cb   : > { %3600 = vmatmul.mubr.msk.bf16.gmra.mxu0 %vm2830_vm9, %v2770_v46 }
 0x2cc   : > { %3206 = vst.msk [vmem:[%s5932_s25 + $0x44] sm:$0xf] %vm3188_vm3, %v3541_v31 }
 0x302   : > { %v3593_v11 = vpop.f32.mrf.mxu0 }
 0x303   : > { %v2926_v8 = vadd.f32 %v3593_v11, %v5907_v41 }
 0x304   : > { %v2917_v62 = vpop.f32.mrf.mxu0 }
 0x305   : > { %v3034_v54 = vmax.f32 %v2926_v8, 0.0  ;;  %v2918_v16 = vadd.f32 %v5907_v41, %v2917_v62 }
 0x306   : > { %v3594_v58 = vpop.f32.mrf.mxu0 }
 0x307   : > { %v3530_v13 = vpack.c.bf16 %v3034_v54, %v3034_v54  ;;  %v3032_v24 = vmax.f32 %v2918_v16, 0.0  ;;  %v2929_v49 = vadd.f32 %v3594_v58, %v5907_v41  ;;  %v3609_v59 = vpop.f32.mrf.mxu1 }
 0x308   : > { %v2920_v40 = vpop.f32.mrf.mxu0  ;;  %v2990_v14 = vadd.f32 %v3609_v59, %v5907_v41 }
 0x309   : > { %3195 = vst.msk [vmem:[%s5932_s25 + $0x18] sm:$0xf] %vm3188_vm3, %v3530_v13  ;;  %v3528_v12 = vpack.c.bf16 %v3032_v24, %v3032_v24  ;;  %v3035_v27 = vmax.f32 %v2929_v49, 0.0  ;;  %v2921_v57 = vadd.f32 %v5907_v41, %v2920_v40  ;;  %v2981_v2 = vpop.f32.mrf.mxu1 }
 0x30a   : > { %v3050_v47 = vmax.f32 %v2990_v14, 0.0  ;;  %v2982_v56 = vadd.f32 %v5907_v41, %v2981_v2 }
 0x30b   : > { %3193 = vst.msk [vmem:[%s5932_s25 + $0x10] sm:$0xf] %vm3188_vm3, %v3528_v12  ;;  %v3531_v45 = vpack.c.bf16 %v3035_v27, %v3035_v27  ;;  %v3033_v33 = vmax.f32 %v2921_v57, 0.0  ;;  %v3610_v32 = vpop.f32.mrf.mxu1 }
 0x30c   : > { %v3546_v22 = vpack.c.bf16 %v3050_v47, %v3050_v47  ;;  %v3048_v9 = vmax.f32 %v2982_v56, 0.0  ;;  %v2993_v36 = vadd.f32 %v3610_v32, %v5907_v41 }
 0x30d   : > { %3196 = vst.msk [vmem:[%s5932_s25 + $0x1c] sm:$0xf] %vm3188_vm3, %v3531_v45  ;;  %v3529_v55 = vpack.c.bf16 %v3033_v33, %v3033_v33  ;;  %v2984_v63 = vpop.f32.mrf.mxu1 }
 0x30e   : > { %3211 = vst.msk [vmem:[%s5932_s25 + $0x58] sm:$0xf] %vm3188_vm3, %v3546_v22  ;;  %v3544_v15 = vpack.c.bf16 %v3048_v9, %v3048_v9  ;;  %v3051_v5 = vmax.f32 %v2993_v36, 0.0  ;;  %v2985_v48 = vadd.f32 %v5907_v41, %v2984_v63 }
 0x30f   : > { %3194 = vst.msk [vmem:[%s5932_s25 + $0x14] sm:$0xf] %vm3188_vm3, %v3529_v55 }
 0x310   : > { %3209 = vst.msk [vmem:[%s5932_s25 + $0x50] sm:$0xf] %vm3188_vm3, %v3544_v15  ;;  %v3547_v43 = vpack.c.bf16 %v3051_v5, %v3051_v5  ;;  %v3049_v44 = vmax.f32 %v2985_v48, 0.0 }
 0x312   : > { %3212 = vst.msk [vmem:[%s5932_s25 + $0x5c] sm:$0xf] %vm3188_vm3, %v3547_v43  ;;  %v3545_v34 = vpack.c.bf16 %v3049_v44, %v3049_v44 }
 0x314   : > { %3210 = vst.msk [vmem:[%s5932_s25 + $0x54] sm:$0xf] %vm3188_vm3, %v3545_v34 }
 0x34e   : > { %v3613_v29 = vpop.f32.mrf.mxu1 }
 0x34f   : > { %v3006_v17 = vadd.f32 %v3613_v29, %v5907_v41  ;;  %v3597_v52 = vpop.f32.mrf.mxu0 }
 0x350   : > { %v2997_v28 = vpop.f32.mrf.mxu1  ;;  %v2942_v1 = vadd.f32 %v3597_v52, %v5907_v41 }
 0x351   : > { %v3054_v21 = vmax.f32 %v3006_v17, 0.0  ;;  %v2998_v50 = vadd.f32 %v5907_v41, %v2997_v28  ;;  %v2933_v60 = vpop.f32.mrf.mxu0 }
 0x352   : > { %v3614_v6 = vpop.f32.mrf.mxu1  ;;  %v3038_v23 = vmax.f32 %v2942_v1, 0.0  ;;  %v2934_v10 = vadd.f32 %v5907_v41, %v2933_v60 }
 0x353   : > { %v3550_v38 = vpack.c.bf16 %v3054_v21, %v3054_v21  ;;  %v3052_v19 = vmax.f32 %v2998_v50, 0.0  ;;  %v3598_v42 = vpop.f32.mrf.mxu0  ;;  %v3009_v30 = vadd.f32 %v3614_v6, %v5907_v41 }
 0x354   : > { %v3000_v53 = vpop.f32.mrf.mxu1  ;;  %v3534_v35 = vpack.c.bf16 %v3038_v23, %v3038_v23  ;;  %v3036_v20 = vmax.f32 %v2934_v10, 0.0  ;;  %v2945_v61 = vadd.f32 %v3598_v42, %v5907_v41 }
 0x355   : > { %3215 = vst.msk [vmem:[%s5932_s25 + $0x68] sm:$0xf] %vm3188_vm3, %v3550_v38  ;;  %v3548_v4 = vpack.c.bf16 %v3052_v19, %v3052_v19  ;;  %v3055_v18 = vmax.f32 %v3009_v30, 0.0  ;;  %v2936_v51 = vpop.f32.mrf.mxu0  ;;  %v3001_v26 = vadd.f32 %v5907_v41, %v3000_v53 }
 0x356   : > { %3199 = vst.msk [vmem:[%s5932_s25 + $0x28] sm:$0xf] %vm3188_vm3, %v3534_v35  ;;  %v3532_v7 = vpack.c.bf16 %v3036_v20, %v3036_v20  ;;  %v3039_v0 = vmax.f32 %v2945_v61, 0.0  ;;  %v2937_v39 = vadd.f32 %v5907_v41, %v2936_v51 }
 0x357   : > { %3213 = vst.msk [vmem:[%s5932_s25 + $0x60] sm:$0xf] %vm3188_vm3, %v3548_v4  ;;  %v3551_v37 = vpack.c.bf16 %v3055_v18, %v3055_v18  ;;  %v3053_v25 = vmax.f32 %v3001_v26, 0.0 }
 0x358   : > { %3197 = vst.msk [vmem:[%s5932_s25 + $0x20] sm:$0xf] %vm3188_vm3, %v3532_v7  ;;  %v3535_v3 = vpack.c.bf16 %v3039_v0, %v3039_v0  ;;  %v3037_v31 = vmax.f32 %v2937_v39, 0.0 }
 0x359   : > { %3216 = vst.msk [vmem:[%s5932_s25 + $0x6c] sm:$0xf] %vm3188_vm3, %v3551_v37  ;;  %v3549_v46 = vpack.c.bf16 %v3053_v25, %v3053_v25 }
 0x35a   : > { %3200 = vst.msk [vmem:[%s5932_s25 + $0x2c] sm:$0xf] %vm3188_vm3, %v3535_v3  ;;  %v3533_v11 = vpack.c.bf16 %v3037_v31, %v3037_v31 }
 0x35b   : > { %3214 = vst.msk [vmem:[%s5932_s25 + $0x64] sm:$0xf] %vm3188_vm3, %v3549_v46 }
 0x35c   : > { %3198 = vst.msk [vmem:[%s5932_s25 + $0x24] sm:$0xf] %vm3188_vm3, %v3533_v11 }
 0x38a   : > { %v3617_v8 = vpop.f32.mrf.mxu1 }
 0x38b   : > { %v3601_v62 = vpop.f32.mrf.mxu0  ;;  %v3022_v54 = vadd.f32 %v3617_v8, %v5907_v41 }
 0x38c   : > { %v2958_v16 = vadd.f32 %v3601_v62, %v5907_v41  ;;  %v3013_v58 = vpop.f32.mrf.mxu1 }
 0x38d   : > { %v3058_v13 = vmax.f32 %v3022_v54, 0.0  ;;  %v2949_v24 = vpop.f32.mrf.mxu0  ;;  %v3014_v49 = vadd.f32 %v5907_v41, %v3013_v58 }
 0x38e   : > { %v3042_v59 = vmax.f32 %v2958_v16, 0.0  ;;  %v2950_v40 = vadd.f32 %v5907_v41, %v2949_v24  ;;  %v3618_v12 = vpop.f32.mrf.mxu1 }
 0x38f   : > { %v3554_v27 = vpack.c.bf16 %v3058_v13, %v3058_v13  ;;  %v3056_v14 = vmax.f32 %v3014_v49, 0.0  ;;  %v3602_v57 = vpop.f32.mrf.mxu0  ;;  %v3025_v2 = vadd.f32 %v3618_v12, %v5907_v41 }
 0x390   : > { %v3538_v45 = vpack.c.bf16 %v3042_v59, %v3042_v59  ;;  %v3040_v47 = vmax.f32 %v2950_v40, 0.0  ;;  %v2961_v33 = vadd.f32 %v3602_v57, %v5907_v41  ;;  %v3016_v56 = vpop.f32.mrf.mxu1 }
 0x391   : > { %3219 = vst.msk [vmem:[%s5932_s25 + $0x78] sm:$0xf] %vm3188_vm3, %v3554_v27  ;;  %v3552_v32 = vpack.c.bf16 %v3056_v14, %v3056_v14  ;;  %v3059_v22 = vmax.f32 %v3025_v2, 0.0  ;;  %v2952_v55 = vpop.f32.mrf.mxu0  ;;  %v3017_v9 = vadd.f32 %v5907_v41, %v3016_v56 }
 0x392   : > { %3203 = vst.msk [vmem:[%s5932_s25 + $0x38] sm:$0xf] %vm3188_vm3, %v3538_v45  ;;  %v3536_v36 = vpack.c.bf16 %v3040_v47, %v3040_v47  ;;  %v3043_v63 = vmax.f32 %v2961_v33, 0.0  ;;  %v2953_v15 = vadd.f32 %v5907_v41, %v2952_v55 }
 0x393   : > { %3217 = vst.msk [vmem:[%s5932_s25 + $0x70] sm:$0xf] %vm3188_vm3, %v3552_v32  ;;  %v3555_v5 = vpack.c.bf16 %v3059_v22, %v3059_v22  ;;  %v3057_v48 = vmax.f32 %v3017_v9, 0.0 }
 0x394   : > { %3201 = vst.msk [vmem:[%s5932_s25 + $0x30] sm:$0xf] %vm3188_vm3, %v3536_v36  ;;  %v3539_v43 = vpack.c.bf16 %v3043_v63, %v3043_v63  ;;  %v3041_v44 = vmax.f32 %v2953_v15, 0.0 }
 0x395   : > { %3220 = vst.msk [vmem:[%s5932_s25 + $0x7c] sm:$0xf] %vm3188_vm3, %v3555_v5  ;;  %v3553_v34 = vpack.c.bf16 %v3057_v48, %v3057_v48 }
 0x396   : > { %3204 = vst.msk [vmem:[%s5932_s25 + $0x3c] sm:$0xf] %vm3188_vm3, %v3539_v43  ;;  %v3537_v29 = vpack.c.bf16 %v3041_v44, %v3041_v44 }
 0x397   : > { %3218 = vst.msk [vmem:[%s5932_s25 + $0x74] sm:$0xf] %vm3188_vm3, %v3553_v34 }
 0x398   : > { %3202 = vst.msk [vmem:[%s5932_s25 + $0x34] sm:$0xf] %vm3188_vm3, %v3537_v29 }
 0x399 PF: > { %s16_s23 = sadd.s32 1, %s3800_s23   ;;  %s6299_s21 = smov %s3796_s22 }
 0x39a   : > { %p13_p5 = scmp.ge.s32.totalorder %s16_s23, 4   ;;  %s6300_s22 = smov %s6302_s24 }
 0x39c   :  { %15 = sbr.rel (!%p13_p5) target bundleno = 2 (0x2), region = 83 }

</bundles_post_ra>
